<compile_context>
chip_gen: v7x
topology: tpu7x:2x2x1
jax: 0.10.0
libtpu: 0.0.40
codegen_flags: <defaults>
</compile_context>

<pallas_src>
import jax
import jax.numpy as jnp
from jax import lax
from jax.experimental import pallas as pl
from jax.experimental.pallas import tpu as pltpu

INPUT_SIZE = 6
HIDDEN_SIZE = 50
NUM_LAYERS = 2
OUTPUT_SIZE = 1
HP = 128     # lane-aligned padded hidden size (one gate = one full 128-lane block)
IP = 8       # padded input feature dim (layer-0 projection is off the critical path)


def lstm_fc_kernel(x_ref, w_ih0_ref, w_hh0_ref, b0_ref, w1_ref, b1_ref,
                   fc_w_ref, fc_b_ref, out_ref, proj_ref):
    T, Bp, G = proj_ref.shape          # (T, 8, 4*Hp): aligned per-step slabs
    Hp = w_hh0_ref.shape[0]            # padded hidden (128)

    def gate_act(gates, c):
        # PyTorch gate order (i, f, g, o); every slice is a full 128-lane block.
        i = jax.nn.sigmoid(gates[:, 0 * Hp:1 * Hp])
        f = jax.nn.sigmoid(gates[:, 1 * Hp:2 * Hp])
        g = jnp.tanh(gates[:, 2 * Hp:3 * Hp])
        o = jax.nn.sigmoid(gates[:, 3 * Hp:4 * Hp])
        c_new = f * c + i * g
        h_new = o * jnp.tanh(c_new)
        return h_new, c_new

    zeros = jnp.zeros((Bp, Hp), jnp.float32)

    # ---- layer-0 input projection (bias folded), batched over all T steps:
    # one (T*Bp, Ip) @ (Ip, G) matmul, entirely off the serial recurrence path.
    proj = (jnp.dot(x_ref[...], w_ih0_ref[...],
                    preferred_element_type=jnp.float32) + b0_ref[...])
    proj_ref[...] = proj.reshape(T, Bp, G)   # sublane-tile aligned split (Bp == 8)

    # Hoisted layer-1 bias broadcast (JAX does not CSE broadcast_in_dim).
    b1b = jnp.broadcast_to(b1_ref[...], (Bp, G))

    def cell0(t, h1, c1):
        # proj_ref[t] is a full (8, 4*Hp) aligned slab: no masked sublane loads.
        gates = proj_ref[t] + jnp.dot(h1, w_hh0_ref[...],
                                      preferred_element_type=jnp.float32)
        return gate_act(gates, c1)

    def cell1(h1_in, h2, c2):
        # Fused layer-1: [W_ih_l1; W_hh_l1] stacked -> single K=2*Hp=256 MXU dot.
        # TODO(synk): nn.LSTM inter-layer dropout=0.2 is training-only; this
        # kernel implements inference (no dropout).
        lhs = jnp.concatenate([h1_in, h2], axis=-1)              # (Bp, 2*Hp)
        gates = jnp.dot(lhs, w1_ref[...],
                        preferred_element_type=jnp.float32) + b1b
        return gate_act(gates, c2)

    # ---- software-pipelined recurrence: iteration t runs layer-0 cell t and
    # layer-1 cell t-1; both only read h1_{t-1}, so they are independent and
    # the serialized chain shrinks from 2T cells to ~T+1 cells.
    h1, c1 = cell0(0, zeros, zeros)                               # prologue

    def step(t, carry):
        h1, c1, h2, c2 = carry                                    # h1_{t-1}, h2_{t-2}
        h1n, c1n = cell0(t, h1, c1)                               # layer-0 cell t
        h2n, c2n = cell1(h1, h2, c2)                              # layer-1 cell t-1
        return h1n, c1n, h2n, c2n

    unroll = True if T <= 32 else 8    # bounded unroll once sequences get long
    h1, c1, h2, c2 = lax.fori_loop(1, T, step, (h1, c1, zeros, zeros),
                                   unroll=unroll)

    h2, _ = cell1(h1, h2, c2)                                     # epilogue: cell T-1

    # ---- fc head: VPU multiply + lane reduction (avoids an N=1 MXU matmul).
    # Padded lanes of h2 and fc_w are zero, so they do not leak into the sum.
    out_ref[...] = (jnp.sum(h2 * fc_w_ref[...], axis=-1, keepdims=True)
                    + fc_b_ref[...])


# -------------------- weight packing (gate-block, lane-aligned) --------------------

def _pack_gate_cols(w, H, Hp):
    """w: (4H, in) PyTorch layout -> (in, 4*Hp): each gate in its own Hp lane block."""
    wt = jnp.asarray(w, jnp.float32).T                        # (in, 4H)
    out = jnp.zeros((wt.shape[0], 4 * Hp), jnp.float32)
    for g in range(4):
        out = out.at[:, g * Hp:g * Hp + H].set(wt[:, g * H:(g + 1) * H])
    return out


def _pack_gate_bias(b, H, Hp):
    out = jnp.zeros((4 * Hp,), jnp.float32)
    for g in range(4):
        out = out.at[g * Hp:g * Hp + H].set(b[g * H:(g + 1) * H])
    return out.reshape(1, 4 * Hp)


def _pad_rows(w, rows):
    """Zero-pad the leading dim to `rows`."""
    return jnp.zeros((rows, w.shape[1]), w.dtype).at[:w.shape[0], :].set(w)


def lstm_model_forward(x, params):
    """x: (B, T, I) batch_first, matching PyTorch. Returns (B, 1) (inference)."""
    B, T, I = x.shape
    H, Hp, Ip = HIDDEN_SIZE, HP, IP
    G = 4 * Hp
    Bp = ((B + 7) // 8) * 8            # pad batch to the f32 sublane tile

    # time-major, batch- and feature-padded; slab t occupies rows [t*Bp, (t+1)*Bp).
    xt = jnp.transpose(x, (1, 0, 2)).astype(jnp.float32)            # (T, B, I)
    x2d = (jnp.zeros((T, Bp, Ip), jnp.float32)
           .at[:, :B, :I].set(xt)
           .reshape(T * Bp, Ip))

    # NOTE: padded-lane correctness relies on h0/c0 == 0 and every padded
    # weight/bias column being exactly zero (padded gate lanes then stay 0).
    w_ih0 = _pad_rows(_pack_gate_cols(params["weight_ih_l0"], H, Hp), Ip)    # (Ip, G)
    w_hh0 = _pad_rows(_pack_gate_cols(params["weight_hh_l0"], H, Hp), Hp)    # (Hp, G)
    b0 = _pack_gate_bias(params["bias_ih_l0"] + params["bias_hh_l0"], H, Hp)  # (1, G)
    # fused layer-1 weight: rows [0,Hp) contract with h1, rows [Hp,2Hp) with h2.
    w1 = jnp.concatenate(
        [_pad_rows(_pack_gate_cols(params["weight_ih_l1"], H, Hp), Hp),
         _pad_rows(_pack_gate_cols(params["weight_hh_l1"], H, Hp), Hp)],
        axis=0)                                                               # (2Hp, G)
    b1 = _pack_gate_bias(params["bias_ih_l1"] + params["bias_hh_l1"], H, Hp)  # (1, G)
    fc_w = jnp.zeros((1, Hp), jnp.float32).at[:, :H].set(
        jnp.asarray(params["fc_weight"], jnp.float32))                         # (1, Hp)
    fc_b = jnp.asarray(params["fc_bias"], jnp.float32).reshape(1, 1)           # (1, 1)

    vmem = pl.BlockSpec(memory_space=pltpu.MemorySpace.VMEM)
    out = pl.pallas_call(
        lstm_fc_kernel,
        out_shape=jax.ShapeDtypeStruct((Bp, OUTPUT_SIZE), jnp.float32),
        in_specs=[vmem] * 8,
        out_specs=vmem,
        scratch_shapes=[
            pltpu.VMEM((T, Bp, G), jnp.float32),   # batched layer-0 gate projections
        ],
    )(x2d, w_ih0, w_hh0, b0, w1, b1, fc_w, fc_b)
    return out[:B]


# -------------------- reference (pure JAX, PyTorch semantics) --------------------

def lstm_model_reference(x, params):
    H = HIDDEN_SIZE
    hp = lax.Precision.HIGHEST

    def cell(xt, h, c, w_ih, w_hh, b):
        gates = (jnp.dot(xt, w_ih.T, precision=hp)
                 + jnp.dot(h, w_hh.T, precision=hp) + b)
        i = jax.nn.sigmoid(gates[:, 0:H])
        f = jax.nn.sigmoid(gates[:, H:2 * H])
        g = jnp.tanh(gates[:, 2 * H:3 * H])
        o = jax.nn.sigmoid(gates[:, 3 * H:4 * H])
        c = f * c + i * g
        h = o * jnp.tanh(c)
        return h, c

    B, T, _ = x.shape
    h1 = c1 = h2 = c2 = jnp.zeros((B, H), jnp.float32)
    b0 = params["bias_ih_l0"] + params["bias_hh_l0"]
    b1 = params["bias_ih_l1"] + params["bias_hh_l1"]
    for t in range(T):
        h1, c1 = cell(x[:, t, :], h1, c1, params["weight_ih_l0"], params["weight_hh_l0"], b0)
        h2, c2 = cell(h1, h2, c2, params["weight_ih_l1"], params["weight_hh_l1"], b1)
    return jnp.dot(h2, params["fc_weight"].T, precision=hp) + params["fc_bias"]


def init_params(key):
    """Deterministic PyTorch-style uniform(-1/sqrt(H), 1/sqrt(H)) init."""
    H, I = HIDDEN_SIZE, INPUT_SIZE
    bound = 1.0 / jnp.sqrt(jnp.float32(H))
    names_shapes = [
        ("weight_ih_l0", (4 * H, I)), ("weight_hh_l0", (4 * H, H)),
        ("bias_ih_l0", (4 * H,)), ("bias_hh_l0", (4 * H,)),
        ("weight_ih_l1", (4 * H, H)), ("weight_hh_l1", (4 * H, H)),
        ("bias_ih_l1", (4 * H,)), ("bias_hh_l1", (4 * H,)),
        ("fc_weight", (OUTPUT_SIZE, H)), ("fc_bias", (OUTPUT_SIZE,)),
    ]
    keys = jax.random.split(key, len(names_shapes))
    return {
        name: jax.random.uniform(k, shape, jnp.float32, -bound, bound)
        for k, (name, shape) in zip(keys, names_shapes)
    }


if __name__ == "__main__":
    key = jax.random.PRNGKey(0)
    k_x, k_p = jax.random.split(key)

    batch, seq = 2, 8
    x = jax.random.normal(k_x, (batch, seq, INPUT_SIZE), jnp.float32)
    params = init_params(k_p)

    out = lstm_model_forward(x, params)
    jax.block_until_ready(out)
    assert out.shape == (batch, OUTPUT_SIZE)

    ref = lstm_model_reference(x, params)
    jax.block_until_ready(ref)
    max_err = float(jnp.max(jnp.abs(out - ref)))
    assert max_err < 1e-3, f"mismatch vs reference: {max_err}"

    print("KERNEL_OK")
</pallas_src>

<mosaic_0001>
module attributes {stable_mosaic.version = 11 : i64} {
  func.func @lstm_fc_kernel(%arg0: memref<64x8xf32, #tpu.memory_space<vmem>>, %arg1: memref<8x512xf32, #tpu.memory_space<vmem>>, %arg2: memref<128x512xf32, #tpu.memory_space<vmem>>, %arg3: memref<1x512xf32, #tpu.memory_space<vmem>>, %arg4: memref<256x512xf32, #tpu.memory_space<vmem>>, %arg5: memref<1x512xf32, #tpu.memory_space<vmem>>, %arg6: memref<1x128xf32, #tpu.memory_space<vmem>>, %arg7: memref<1x1xf32, #tpu.memory_space<vmem>>, %arg8: memref<8x1xf32, #tpu.memory_space<vmem>>, %arg9: memref<8x8x512xf32, #tpu.memory_space<vmem>>) attributes {dimension_semantics = [], scalar_prefetch = 0 : i64, scratch_operands = 1 : i64, tpu.core_type = #tpu.core_type<tc>} {
    %cst = arith.constant 0.000000e+00 : f32
    %0 = vector.broadcast %cst : f32 to vector<8x128xf32>
    %c0 = arith.constant 0 : index
    %c0_0 = arith.constant 0 : index
    %1 = vector.load %arg0[%c0, %c0_0] : memref<64x8xf32, #tpu.memory_space<vmem>>, vector<64x8xf32>
    %c0_1 = arith.constant 0 : index
    %c0_2 = arith.constant 0 : index
    %2 = vector.load %arg1[%c0_1, %c0_2] : memref<8x512xf32, #tpu.memory_space<vmem>>, vector<8x512xf32>
    %cst_3 = arith.constant dense<0.000000e+00> : vector<64x512xf32>
    %3 = tpu.matmul %1, %2, %cst_3 {dimension_numbers = #tpu.dot_dimension_numbers<[1], [0], [0], [1], [0, 0, 1, 1], [], []>} : vector<64x8xf32>, vector<8x512xf32>, vector<64x512xf32> -> vector<64x512xf32>
    %c0_4 = arith.constant 0 : index
    %c0_5 = arith.constant 0 : index
    %4 = vector.load %arg3[%c0_4, %c0_5] : memref<1x512xf32, #tpu.memory_space<vmem>>, vector<1x512xf32>
    %5 = vector.broadcast %4 : vector<1x512xf32> to vector<64x512xf32>
    %6 = arith.addf %3, %5 : vector<64x512xf32>
    %7 = vector.shape_cast %6 : vector<64x512xf32> to vector<8x8x512xf32>
    %c0_6 = arith.constant 0 : index
    %c0_7 = arith.constant 0 : index
    %c0_8 = arith.constant 0 : index
    %8 = vector.load %arg9[%c0_6, %c0_7, %c0_8] : memref<8x8x512xf32, #tpu.memory_space<vmem>>, vector<8x8x512xf32>
    tpu.vector_store %arg9[%c0_6, %c0_7, %c0_8], %7 {strides = array<i32>} : memref<8x8x512xf32, #tpu.memory_space<vmem>>, vector<8x8x512xf32>,
    %c0_9 = arith.constant 0 : index
    %c0_10 = arith.constant 0 : index
    %9 = vector.load %arg5[%c0_9, %c0_10] : memref<1x512xf32, #tpu.memory_space<vmem>>, vector<1x512xf32>
    %10 = vector.shape_cast %9 : vector<1x512xf32> to vector<1x512xf32>
    %11 = vector.broadcast %10 : vector<1x512xf32> to vector<8x512xf32>
    %c0_11 = arith.constant 0 : index
    %c0_12 = arith.constant 0 : index
    %c0_13 = arith.constant 0 : index
    %12 = vector.load %arg9[%c0_11, %c0_12, %c0_13] : memref<8x8x512xf32, #tpu.memory_space<vmem>>, vector<1x8x512xf32>
    %13 = vector.shape_cast %12 : vector<1x8x512xf32> to vector<8x512xf32>
    %c0_14 = arith.constant 0 : index
    %c0_15 = arith.constant 0 : index
    %14 = vector.load %arg2[%c0_14, %c0_15] : memref<128x512xf32, #tpu.memory_space<vmem>>, vector<128x512xf32>
    %cst_16 = arith.constant dense<0.000000e+00> : vector<8x512xf32>
    %15 = tpu.matmul %0, %14, %cst_16 {dimension_numbers = #tpu.dot_dimension_numbers<[1], [0], [0], [1], [0, 0, 1, 1], [], []>} : vector<8x128xf32>, vector<128x512xf32>, vector<8x512xf32> -> vector<8x512xf32>
    %16 = arith.addf %13, %15 : vector<8x512xf32>
    %17 = vector.extract_strided_slice %16 {offsets = [0, 0], sizes = [8, 128], strides = [1, 1]} : vector<8x512xf32> to vector<8x128xf32>
    %18 = arith.negf %17 : vector<8x128xf32>
    %19 = math.exp %18 : vector<8x128xf32>
    %cst_17 = arith.constant 1.000000e+00 : f32
    %20 = vector.broadcast %cst_17 : f32 to vector<8x128xf32>
    %21 = arith.addf %20, %19 : vector<8x128xf32>
    %22 = arith.divf %20, %21 : vector<8x128xf32>
    %23 = vector.extract_strided_slice %16 {offsets = [0, 128], sizes = [8, 128], strides = [1, 1]} : vector<8x512xf32> to vector<8x128xf32>
    %24 = arith.negf %23 : vector<8x128xf32>
    %25 = math.exp %24 : vector<8x128xf32>
    %cst_18 = arith.constant 1.000000e+00 : f32
    %26 = vector.broadcast %cst_18 : f32 to vector<8x128xf32>
    %27 = arith.addf %26, %25 : vector<8x128xf32>
    %28 = arith.divf %26, %27 : vector<8x128xf32>
    %29 = vector.extract_strided_slice %16 {offsets = [0, 256], sizes = [8, 128], strides = [1, 1]} : vector<8x512xf32> to vector<8x128xf32>
    %30 = math.tanh %29 : vector<8x128xf32>
    %31 = vector.extract_strided_slice %16 {offsets = [0, 384], sizes = [8, 128], strides = [1, 1]} : vector<8x512xf32> to vector<8x128xf32>
    %32 = arith.negf %31 : vector<8x128xf32>
    %33 = math.exp %32 : vector<8x128xf32>
    %cst_19 = arith.constant 1.000000e+00 : f32
    %34 = vector.broadcast %cst_19 : f32 to vector<8x128xf32>
    %35 = arith.addf %34, %33 : vector<8x128xf32>
    %36 = arith.divf %34, %35 : vector<8x128xf32>
    %37 = arith.mulf %28, %0 : vector<8x128xf32>
    %38 = arith.mulf %22, %30 : vector<8x128xf32>
    %39 = arith.addf %37, %38 : vector<8x128xf32>
    %40 = math.tanh %39 : vector<8x128xf32>
    %41 = arith.mulf %36, %40 : vector<8x128xf32>
    %c1_i32 = arith.constant 1 : i32
    %42 = arith.index_cast %c1_i32 : i32 to index
    %c0_20 = arith.constant 0 : index
    %c0_21 = arith.constant 0 : index
    %43 = vector.load %arg9[%42, %c0_20, %c0_21] : memref<8x8x512xf32, #tpu.memory_space<vmem>>, vector<1x8x512xf32>
    %44 = vector.shape_cast %43 : vector<1x8x512xf32> to vector<8x512xf32>
    %c0_22 = arith.constant 0 : index
    %c0_23 = arith.constant 0 : index
    %45 = vector.load %arg2[%c0_22, %c0_23] : memref<128x512xf32, #tpu.memory_space<vmem>>, vector<128x512xf32>
    %cst_24 = arith.constant dense<0.000000e+00> : vector<8x512xf32>
    %46 = tpu.matmul %41, %45, %cst_24 {dimension_numbers = #tpu.dot_dimension_numbers<[1], [0], [0], [1], [0, 0, 1, 1], [], []>} : vector<8x128xf32>, vector<128x512xf32>, vector<8x512xf32> -> vector<8x512xf32>
    %47 = arith.addf %44, %46 : vector<8x512xf32>
    %48 = vector.extract_strided_slice %47 {offsets = [0, 0], sizes = [8, 128], strides = [1, 1]} : vector<8x512xf32> to vector<8x128xf32>
    %49 = arith.negf %48 : vector<8x128xf32>
    %50 = math.exp %49 : vector<8x128xf32>
    %cst_25 = arith.constant 1.000000e+00 : f32
    %51 = vector.broadcast %cst_25 : f32 to vector<8x128xf32>
    %52 = arith.addf %51, %50 : vector<8x128xf32>
    %53 = arith.divf %51, %52 : vector<8x128xf32>
    %54 = vector.extract_strided_slice %47 {offsets = [0, 128], sizes = [8, 128], strides = [1, 1]} : vector<8x512xf32> to vector<8x128xf32>
    %55 = arith.negf %54 : vector<8x128xf32>
    %56 = math.exp %55 : vector<8x128xf32>
    %cst_26 = arith.constant 1.000000e+00 : f32
    %57 = vector.broadcast %cst_26 : f32 to vector<8x128xf32>
    %58 = arith.addf %57, %56 : vector<8x128xf32>
    %59 = arith.divf %57, %58 : vector<8x128xf32>
    %60 = vector.extract_strided_slice %47 {offsets = [0, 256], sizes = [8, 128], strides = [1, 1]} : vector<8x512xf32> to vector<8x128xf32>
    %61 = math.tanh %60 : vector<8x128xf32>
    %62 = vector.extract_strided_slice %47 {offsets = [0, 384], sizes = [8, 128], strides = [1, 1]} : vector<8x512xf32> to vector<8x128xf32>
    %63 = arith.negf %62 : vector<8x128xf32>
    %64 = math.exp %63 : vector<8x128xf32>
    %cst_27 = arith.constant 1.000000e+00 : f32
    %65 = vector.broadcast %cst_27 : f32 to vector<8x128xf32>
    %66 = arith.addf %65, %64 : vector<8x128xf32>
    %67 = arith.divf %65, %66 : vector<8x128xf32>
    %68 = arith.mulf %59, %39 : vector<8x128xf32>
    %69 = arith.mulf %53, %61 : vector<8x128xf32>
    %70 = arith.addf %68, %69 : vector<8x128xf32>
    %71 = math.tanh %70 : vector<8x128xf32>
    %72 = arith.mulf %67, %71 : vector<8x128xf32>
    %73 = tpu.concatenate %41, %0 in 1 : vector<8x128xf32>, vector<8x128xf32> -> vector<8x256xf32>
    %c0_28 = arith.constant 0 : index
    %c0_29 = arith.constant 0 : index
    %74 = vector.load %arg4[%c0_28, %c0_29] : memref<256x512xf32, #tpu.memory_space<vmem>>, vector<256x512xf32>
    %cst_30 = arith.constant dense<0.000000e+00> : vector<8x512xf32>
    %75 = tpu.matmul %73, %74, %cst_30 {dimension_numbers = #tpu.dot_dimension_numbers<[1], [0], [0], [1], [0, 0, 1, 1], [], []>} : vector<8x256xf32>, vector<256x512xf32>, vector<8x512xf32> -> vector<8x512xf32>
    %76 = arith.addf %75, %11 : vector<8x512xf32>
    %77 = vector.extract_strided_slice %76 {offsets = [0, 0], sizes = [8, 128], strides = [1, 1]} : vector<8x512xf32> to vector<8x128xf32>
    %78 = arith.negf %77 : vector<8x128xf32>
    %79 = math.exp %78 : vector<8x128xf32>
    %cst_31 = arith.constant 1.000000e+00 : f32
    %80 = vector.broadcast %cst_31 : f32 to vector<8x128xf32>
    %81 = arith.addf %80, %79 : vector<8x128xf32>
    %82 = arith.divf %80, %81 : vector<8x128xf32>
    %83 = vector.extract_strided_slice %76 {offsets = [0, 128], sizes = [8, 128], strides = [1, 1]} : vector<8x512xf32> to vector<8x128xf32>
    %84 = arith.negf %83 : vector<8x128xf32>
    %85 = math.exp %84 : vector<8x128xf32>
    %cst_32 = arith.constant 1.000000e+00 : f32
    %86 = vector.broadcast %cst_32 : f32 to vector<8x128xf32>
    %87 = arith.addf %86, %85 : vector<8x128xf32>
    %88 = arith.divf %86, %87 : vector<8x128xf32>
    %89 = vector.extract_strided_slice %76 {offsets = [0, 256], sizes = [8, 128], strides = [1, 1]} : vector<8x512xf32> to vector<8x128xf32>
    %90 = math.tanh %89 : vector<8x128xf32>
    %91 = vector.extract_strided_slice %76 {offsets = [0, 384], sizes = [8, 128], strides = [1, 1]} : vector<8x512xf32> to vector<8x128xf32>
    %92 = arith.negf %91 : vector<8x128xf32>
    %93 = math.exp %92 : vector<8x128xf32>
    %cst_33 = arith.constant 1.000000e+00 : f32
    %94 = vector.broadcast %cst_33 : f32 to vector<8x128xf32>
    %95 = arith.addf %94, %93 : vector<8x128xf32>
    %96 = arith.divf %94, %95 : vector<8x128xf32>
    %97 = arith.mulf %88, %0 : vector<8x128xf32>
    %98 = arith.mulf %82, %90 : vector<8x128xf32>
    %99 = arith.addf %97, %98 : vector<8x128xf32>
    %100 = math.tanh %99 : vector<8x128xf32>
    %101 = arith.mulf %96, %100 : vector<8x128xf32>
    %c2_i32 = arith.constant 2 : i32
    %102 = arith.index_cast %c2_i32 : i32 to index
    %c0_34 = arith.constant 0 : index
    %c0_35 = arith.constant 0 : index
    %103 = vector.load %arg9[%102, %c0_34, %c0_35] : memref<8x8x512xf32, #tpu.memory_space<vmem>>, vector<1x8x512xf32>
    %104 = vector.shape_cast %103 : vector<1x8x512xf32> to vector<8x512xf32>
    %c0_36 = arith.constant 0 : index
    %c0_37 = arith.constant 0 : index
    %105 = vector.load %arg2[%c0_36, %c0_37] : memref<128x512xf32, #tpu.memory_space<vmem>>, vector<128x512xf32>
    %cst_38 = arith.constant dense<0.000000e+00> : vector<8x512xf32>
    %106 = tpu.matmul %72, %105, %cst_38 {dimension_numbers = #tpu.dot_dimension_numbers<[1], [0], [0], [1], [0, 0, 1, 1], [], []>} : vector<8x128xf32>, vector<128x512xf32>, vector<8x512xf32> -> vector<8x512xf32>
    %107 = arith.addf %104, %106 : vector<8x512xf32>
    %108 = vector.extract_strided_slice %107 {offsets = [0, 0], sizes = [8, 128], strides = [1, 1]} : vector<8x512xf32> to vector<8x128xf32>
    %109 = arith.negf %108 : vector<8x128xf32>
    %110 = math.exp %109 : vector<8x128xf32>
    %cst_39 = arith.constant 1.000000e+00 : f32
    %111 = vector.broadcast %cst_39 : f32 to vector<8x128xf32>
    %112 = arith.addf %111, %110 : vector<8x128xf32>
    %113 = arith.divf %111, %112 : vector<8x128xf32>
    %114 = vector.extract_strided_slice %107 {offsets = [0, 128], sizes = [8, 128], strides = [1, 1]} : vector<8x512xf32> to vector<8x128xf32>
    %115 = arith.negf %114 : vector<8x128xf32>
    %116 = math.exp %115 : vector<8x128xf32>
    %cst_40 = arith.constant 1.000000e+00 : f32
    %117 = vector.broadcast %cst_40 : f32 to vector<8x128xf32>
    %118 = arith.addf %117, %116 : vector<8x128xf32>
    %119 = arith.divf %117, %118 : vector<8x128xf32>
    %120 = vector.extract_strided_slice %107 {offsets = [0, 256], sizes = [8, 128], strides = [1, 1]} : vector<8x512xf32> to vector<8x128xf32>
    %121 = math.tanh %120 : vector<8x128xf32>
    %122 = vector.extract_strided_slice %107 {offsets = [0, 384], sizes = [8, 128], strides = [1, 1]} : vector<8x512xf32> to vector<8x128xf32>
    %123 = arith.negf %122 : vector<8x128xf32>
    %124 = math.exp %123 : vector<8x128xf32>
    %cst_41 = arith.constant 1.000000e+00 : f32
    %125 = vector.broadcast %cst_41 : f32 to vector<8x128xf32>
    %126 = arith.addf %125, %124 : vector<8x128xf32>
    %127 = arith.divf %125, %126 : vector<8x128xf32>
    %128 = arith.mulf %119, %70 : vector<8x128xf32>
    %129 = arith.mulf %113, %121 : vector<8x128xf32>
    %130 = arith.addf %128, %129 : vector<8x128xf32>
    %131 = math.tanh %130 : vector<8x128xf32>
    %132 = arith.mulf %127, %131 : vector<8x128xf32>
    %133 = tpu.concatenate %72, %101 in 1 : vector<8x128xf32>, vector<8x128xf32> -> vector<8x256xf32>
    %c0_42 = arith.constant 0 : index
    %c0_43 = arith.constant 0 : index
    %134 = vector.load %arg4[%c0_42, %c0_43] : memref<256x512xf32, #tpu.memory_space<vmem>>, vector<256x512xf32>
    %cst_44 = arith.constant dense<0.000000e+00> : vector<8x512xf32>
    %135 = tpu.matmul %133, %134, %cst_44 {dimension_numbers = #tpu.dot_dimension_numbers<[1], [0], [0], [1], [0, 0, 1, 1], [], []>} : vector<8x256xf32>, vector<256x512xf32>, vector<8x512xf32> -> vector<8x512xf32>
    %136 = arith.addf %135, %11 : vector<8x512xf32>
    %137 = vector.extract_strided_slice %136 {offsets = [0, 0], sizes = [8, 128], strides = [1, 1]} : vector<8x512xf32> to vector<8x128xf32>
    %138 = arith.negf %137 : vector<8x128xf32>
    %139 = math.exp %138 : vector<8x128xf32>
    %cst_45 = arith.constant 1.000000e+00 : f32
    %140 = vector.broadcast %cst_45 : f32 to vector<8x128xf32>
    %141 = arith.addf %140, %139 : vector<8x128xf32>
    %142 = arith.divf %140, %141 : vector<8x128xf32>
    %143 = vector.extract_strided_slice %136 {offsets = [0, 128], sizes = [8, 128], strides = [1, 1]} : vector<8x512xf32> to vector<8x128xf32>
    %144 = arith.negf %143 : vector<8x128xf32>
    %145 = math.exp %144 : vector<8x128xf32>
    %cst_46 = arith.constant 1.000000e+00 : f32
    %146 = vector.broadcast %cst_46 : f32 to vector<8x128xf32>
    %147 = arith.addf %146, %145 : vector<8x128xf32>
    %148 = arith.divf %146, %147 : vector<8x128xf32>
    %149 = vector.extract_strided_slice %136 {offsets = [0, 256], sizes = [8, 128], strides = [1, 1]} : vector<8x512xf32> to vector<8x128xf32>
    %150 = math.tanh %149 : vector<8x128xf32>
    %151 = vector.extract_strided_slice %136 {offsets = [0, 384], sizes = [8, 128], strides = [1, 1]} : vector<8x512xf32> to vector<8x128xf32>
    %152 = arith.negf %151 : vector<8x128xf32>
    %153 = math.exp %152 : vector<8x128xf32>
    %cst_47 = arith.constant 1.000000e+00 : f32
    %154 = vector.broadcast %cst_47 : f32 to vector<8x128xf32>
    %155 = arith.addf %154, %153 : vector<8x128xf32>
    %156 = arith.divf %154, %155 : vector<8x128xf32>
    %157 = arith.mulf %148, %99 : vector<8x128xf32>
    %158 = arith.mulf %142, %150 : vector<8x128xf32>
    %159 = arith.addf %157, %158 : vector<8x128xf32>
    %160 = math.tanh %159 : vector<8x128xf32>
    %161 = arith.mulf %156, %160 : vector<8x128xf32>
    %c3_i32 = arith.constant 3 : i32
    %162 = arith.index_cast %c3_i32 : i32 to index
    %c0_48 = arith.constant 0 : index
    %c0_49 = arith.constant 0 : index
    %163 = vector.load %arg9[%162, %c0_48, %c0_49] : memref<8x8x512xf32, #tpu.memory_space<vmem>>, vector<1x8x512xf32>
    %164 = vector.shape_cast %163 : vector<1x8x512xf32> to vector<8x512xf32>
    %c0_50 = arith.constant 0 : index
    %c0_51 = arith.constant 0 : index
    %165 = vector.load %arg2[%c0_50, %c0_51] : memref<128x512xf32, #tpu.memory_space<vmem>>, vector<128x512xf32>
    %cst_52 = arith.constant dense<0.000000e+00> : vector<8x512xf32>
    %166 = tpu.matmul %132, %165, %cst_52 {dimension_numbers = #tpu.dot_dimension_numbers<[1], [0], [0], [1], [0, 0, 1, 1], [], []>} : vector<8x128xf32>, vector<128x512xf32>, vector<8x512xf32> -> vector<8x512xf32>
    %167 = arith.addf %164, %166 : vector<8x512xf32>
    %168 = vector.extract_strided_slice %167 {offsets = [0, 0], sizes = [8, 128], strides = [1, 1]} : vector<8x512xf32> to vector<8x128xf32>
    %169 = arith.negf %168 : vector<8x128xf32>
    %170 = math.exp %169 : vector<8x128xf32>
    %cst_53 = arith.constant 1.000000e+00 : f32
    %171 = vector.broadcast %cst_53 : f32 to vector<8x128xf32>
    %172 = arith.addf %171, %170 : vector<8x128xf32>
    %173 = arith.divf %171, %172 : vector<8x128xf32>
    %174 = vector.extract_strided_slice %167 {offsets = [0, 128], sizes = [8, 128], strides = [1, 1]} : vector<8x512xf32> to vector<8x128xf32>
    %175 = arith.negf %174 : vector<8x128xf32>
    %176 = math.exp %175 : vector<8x128xf32>
    %cst_54 = arith.constant 1.000000e+00 : f32
    %177 = vector.broadcast %cst_54 : f32 to vector<8x128xf32>
    %178 = arith.addf %177, %176 : vector<8x128xf32>
    %179 = arith.divf %177, %178 : vector<8x128xf32>
    %180 = vector.extract_strided_slice %167 {offsets = [0, 256], sizes = [8, 128], strides = [1, 1]} : vector<8x512xf32> to vector<8x128xf32>
    %181 = math.tanh %180 : vector<8x128xf32>
    %182 = vector.extract_strided_slice %167 {offsets = [0, 384], sizes = [8, 128], strides = [1, 1]} : vector<8x512xf32> to vector<8x128xf32>
    %183 = arith.negf %182 : vector<8x128xf32>
    %184 = math.exp %183 : vector<8x128xf32>
    %cst_55 = arith.constant 1.000000e+00 : f32
    %185 = vector.broadcast %cst_55 : f32 to vector<8x128xf32>
    %186 = arith.addf %185, %184 : vector<8x128xf32>
    %187 = arith.divf %185, %186 : vector<8x128xf32>
    %188 = arith.mulf %179, %130 : vector<8x128xf32>
    %189 = arith.mulf %173, %181 : vector<8x128xf32>
    %190 = arith.addf %188, %189 : vector<8x128xf32>
    %191 = math.tanh %190 : vector<8x128xf32>
    %192 = arith.mulf %187, %191 : vector<8x128xf32>
    %193 = tpu.concatenate %132, %161 in 1 : vector<8x128xf32>, vector<8x128xf32> -> vector<8x256xf32>
    %c0_56 = arith.constant 0 : index
    %c0_57 = arith.constant 0 : index
    %194 = vector.load %arg4[%c0_56, %c0_57] : memref<256x512xf32, #tpu.memory_space<vmem>>, vector<256x512xf32>
    %cst_58 = arith.constant dense<0.000000e+00> : vector<8x512xf32>
    %195 = tpu.matmul %193, %194, %cst_58 {dimension_numbers = #tpu.dot_dimension_numbers<[1], [0], [0], [1], [0, 0, 1, 1], [], []>} : vector<8x256xf32>, vector<256x512xf32>, vector<8x512xf32> -> vector<8x512xf32>
    %196 = arith.addf %195, %11 : vector<8x512xf32>
    %197 = vector.extract_strided_slice %196 {offsets = [0, 0], sizes = [8, 128], strides = [1, 1]} : vector<8x512xf32> to vector<8x128xf32>
    %198 = arith.negf %197 : vector<8x128xf32>
    %199 = math.exp %198 : vector<8x128xf32>
    %cst_59 = arith.constant 1.000000e+00 : f32
    %200 = vector.broadcast %cst_59 : f32 to vector<8x128xf32>
    %201 = arith.addf %200, %199 : vector<8x128xf32>
    %202 = arith.divf %200, %201 : vector<8x128xf32>
    %203 = vector.extract_strided_slice %196 {offsets = [0, 128], sizes = [8, 128], strides = [1, 1]} : vector<8x512xf32> to vector<8x128xf32>
    %204 = arith.negf %203 : vector<8x128xf32>
    %205 = math.exp %204 : vector<8x128xf32>
    %cst_60 = arith.constant 1.000000e+00 : f32
    %206 = vector.broadcast %cst_60 : f32 to vector<8x128xf32>
    %207 = arith.addf %206, %205 : vector<8x128xf32>
    %208 = arith.divf %206, %207 : vector<8x128xf32>
    %209 = vector.extract_strided_slice %196 {offsets = [0, 256], sizes = [8, 128], strides = [1, 1]} : vector<8x512xf32> to vector<8x128xf32>
    %210 = math.tanh %209 : vector<8x128xf32>
    %211 = vector.extract_strided_slice %196 {offsets = [0, 384], sizes = [8, 128], strides = [1, 1]} : vector<8x512xf32> to vector<8x128xf32>
    %212 = arith.negf %211 : vector<8x128xf32>
    %213 = math.exp %212 : vector<8x128xf32>
    %cst_61 = arith.constant 1.000000e+00 : f32
    %214 = vector.broadcast %cst_61 : f32 to vector<8x128xf32>
    %215 = arith.addf %214, %213 : vector<8x128xf32>
    %216 = arith.divf %214, %215 : vector<8x128xf32>
    %217 = arith.mulf %208, %159 : vector<8x128xf32>
    %218 = arith.mulf %202, %210 : vector<8x128xf32>
    %219 = arith.addf %217, %218 : vector<8x128xf32>
    %220 = math.tanh %219 : vector<8x128xf32>
    %221 = arith.mulf %216, %220 : vector<8x128xf32>
    %c4_i32 = arith.constant 4 : i32
    %222 = arith.index_cast %c4_i32 : i32 to index
    %c0_62 = arith.constant 0 : index
    %c0_63 = arith.constant 0 : index
    %223 = vector.load %arg9[%222, %c0_62, %c0_63] : memref<8x8x512xf32, #tpu.memory_space<vmem>>, vector<1x8x512xf32>
    %224 = vector.shape_cast %223 : vector<1x8x512xf32> to vector<8x512xf32>
    %c0_64 = arith.constant 0 : index
    %c0_65 = arith.constant 0 : index
    %225 = vector.load %arg2[%c0_64, %c0_65] : memref<128x512xf32, #tpu.memory_space<vmem>>, vector<128x512xf32>
    %cst_66 = arith.constant dense<0.000000e+00> : vector<8x512xf32>
    %226 = tpu.matmul %192, %225, %cst_66 {dimension_numbers = #tpu.dot_dimension_numbers<[1], [0], [0], [1], [0, 0, 1, 1], [], []>} : vector<8x128xf32>, vector<128x512xf32>, vector<8x512xf32> -> vector<8x512xf32>
    %227 = arith.addf %224, %226 : vector<8x512xf32>
    %228 = vector.extract_strided_slice %227 {offsets = [0, 0], sizes = [8, 128], strides = [1, 1]} : vector<8x512xf32> to vector<8x128xf32>
    %229 = arith.negf %228 : vector<8x128xf32>
    %230 = math.exp %229 : vector<8x128xf32>
    %cst_67 = arith.constant 1.000000e+00 : f32
    %231 = vector.broadcast %cst_67 : f32 to vector<8x128xf32>
    %232 = arith.addf %231, %230 : vector<8x128xf32>
    %233 = arith.divf %231, %232 : vector<8x128xf32>
    %234 = vector.extract_strided_slice %227 {offsets = [0, 128], sizes = [8, 128], strides = [1, 1]} : vector<8x512xf32> to vector<8x128xf32>
    %235 = arith.negf %234 : vector<8x128xf32>
    %236 = math.exp %235 : vector<8x128xf32>
    %cst_68 = arith.constant 1.000000e+00 : f32
    %237 = vector.broadcast %cst_68 : f32 to vector<8x128xf32>
    %238 = arith.addf %237, %236 : vector<8x128xf32>
    %239 = arith.divf %237, %238 : vector<8x128xf32>
    %240 = vector.extract_strided_slice %227 {offsets = [0, 256], sizes = [8, 128], strides = [1, 1]} : vector<8x512xf32> to vector<8x128xf32>
    %241 = math.tanh %240 : vector<8x128xf32>
    %242 = vector.extract_strided_slice %227 {offsets = [0, 384], sizes = [8, 128], strides = [1, 1]} : vector<8x512xf32> to vector<8x128xf32>
    %243 = arith.negf %242 : vector<8x128xf32>
    %244 = math.exp %243 : vector<8x128xf32>
    %cst_69 = arith.constant 1.000000e+00 : f32
    %245 = vector.broadcast %cst_69 : f32 to vector<8x128xf32>
    %246 = arith.addf %245, %244 : vector<8x128xf32>
    %247 = arith.divf %245, %246 : vector<8x128xf32>
    %248 = arith.mulf %239, %190 : vector<8x128xf32>
    %249 = arith.mulf %233, %241 : vector<8x128xf32>
    %250 = arith.addf %248, %249 : vector<8x128xf32>
    %251 = math.tanh %250 : vector<8x128xf32>
    %252 = arith.mulf %247, %251 : vector<8x128xf32>
    %253 = tpu.concatenate %192, %221 in 1 : vector<8x128xf32>, vector<8x128xf32> -> vector<8x256xf32>
    %c0_70 = arith.constant 0 : index
    %c0_71 = arith.constant 0 : index
    %254 = vector.load %arg4[%c0_70, %c0_71] : memref<256x512xf32, #tpu.memory_space<vmem>>, vector<256x512xf32>
    %cst_72 = arith.constant dense<0.000000e+00> : vector<8x512xf32>
    %255 = tpu.matmul %253, %254, %cst_72 {dimension_numbers = #tpu.dot_dimension_numbers<[1], [0], [0], [1], [0, 0, 1, 1], [], []>} : vector<8x256xf32>, vector<256x512xf32>, vector<8x512xf32> -> vector<8x512xf32>
    %256 = arith.addf %255, %11 : vector<8x512xf32>
    %257 = vector.extract_strided_slice %256 {offsets = [0, 0], sizes = [8, 128], strides = [1, 1]} : vector<8x512xf32> to vector<8x128xf32>
    %258 = arith.negf %257 : vector<8x128xf32>
    %259 = math.exp %258 : vector<8x128xf32>
    %cst_73 = arith.constant 1.000000e+00 : f32
    %260 = vector.broadcast %cst_73 : f32 to vector<8x128xf32>
    %261 = arith.addf %260, %259 : vector<8x128xf32>
    %262 = arith.divf %260, %261 : vector<8x128xf32>
    %263 = vector.extract_strided_slice %256 {offsets = [0, 128], sizes = [8, 128], strides = [1, 1]} : vector<8x512xf32> to vector<8x128xf32>
    %264 = arith.negf %263 : vector<8x128xf32>
    %265 = math.exp %264 : vector<8x128xf32>
    %cst_74 = arith.constant 1.000000e+00 : f32
    %266 = vector.broadcast %cst_74 : f32 to vector<8x128xf32>
    %267 = arith.addf %266, %265 : vector<8x128xf32>
    %268 = arith.divf %266, %267 : vector<8x128xf32>
    %269 = vector.extract_strided_slice %256 {offsets = [0, 256], sizes = [8, 128], strides = [1, 1]} : vector<8x512xf32> to vector<8x128xf32>
    %270 = math.tanh %269 : vector<8x128xf32>
    %271 = vector.extract_strided_slice %256 {offsets = [0, 384], sizes = [8, 128], strides = [1, 1]} : vector<8x512xf32> to vector<8x128xf32>
    %272 = arith.negf %271 : vector<8x128xf32>
    %273 = math.exp %272 : vector<8x128xf32>
    %cst_75 = arith.constant 1.000000e+00 : f32
    %274 = vector.broadcast %cst_75 : f32 to vector<8x128xf32>
    %275 = arith.addf %274, %273 : vector<8x128xf32>
    %276 = arith.divf %274, %275 : vector<8x128xf32>
    %277 = arith.mulf %268, %219 : vector<8x128xf32>
    %278 = arith.mulf %262, %270 : vector<8x128xf32>
    %279 = arith.addf %277, %278 : vector<8x128xf32>
    %280 = math.tanh %279 : vector<8x128xf32>
    %281 = arith.mulf %276, %280 : vector<8x128xf32>
    %c5_i32 = arith.constant 5 : i32
    %282 = arith.index_cast %c5_i32 : i32 to index
    %c0_76 = arith.constant 0 : index
    %c0_77 = arith.constant 0 : index
    %283 = vector.load %arg9[%282, %c0_76, %c0_77] : memref<8x8x512xf32, #tpu.memory_space<vmem>>, vector<1x8x512xf32>
    %284 = vector.shape_cast %283 : vector<1x8x512xf32> to vector<8x512xf32>
    %c0_78 = arith.constant 0 : index
    %c0_79 = arith.constant 0 : index
    %285 = vector.load %arg2[%c0_78, %c0_79] : memref<128x512xf32, #tpu.memory_space<vmem>>, vector<128x512xf32>
    %cst_80 = arith.constant dense<0.000000e+00> : vector<8x512xf32>
    %286 = tpu.matmul %252, %285, %cst_80 {dimension_numbers = #tpu.dot_dimension_numbers<[1], [0], [0], [1], [0, 0, 1, 1], [], []>} : vector<8x128xf32>, vector<128x512xf32>, vector<8x512xf32> -> vector<8x512xf32>
    %287 = arith.addf %284, %286 : vector<8x512xf32>
    %288 = vector.extract_strided_slice %287 {offsets = [0, 0], sizes = [8, 128], strides = [1, 1]} : vector<8x512xf32> to vector<8x128xf32>
    %289 = arith.negf %288 : vector<8x128xf32>
    %290 = math.exp %289 : vector<8x128xf32>
    %cst_81 = arith.constant 1.000000e+00 : f32
    %291 = vector.broadcast %cst_81 : f32 to vector<8x128xf32>
    %292 = arith.addf %291, %290 : vector<8x128xf32>
    %293 = arith.divf %291, %292 : vector<8x128xf32>
    %294 = vector.extract_strided_slice %287 {offsets = [0, 128], sizes = [8, 128], strides = [1, 1]} : vector<8x512xf32> to vector<8x128xf32>
    %295 = arith.negf %294 : vector<8x128xf32>
    %296 = math.exp %295 : vector<8x128xf32>
    %cst_82 = arith.constant 1.000000e+00 : f32
    %297 = vector.broadcast %cst_82 : f32 to vector<8x128xf32>
    %298 = arith.addf %297, %296 : vector<8x128xf32>
    %299 = arith.divf %297, %298 : vector<8x128xf32>
    %300 = vector.extract_strided_slice %287 {offsets = [0, 256], sizes = [8, 128], strides = [1, 1]} : vector<8x512xf32> to vector<8x128xf32>
    %301 = math.tanh %300 : vector<8x128xf32>
    %302 = vector.extract_strided_slice %287 {offsets = [0, 384], sizes = [8, 128], strides = [1, 1]} : vector<8x512xf32> to vector<8x128xf32>
    %303 = arith.negf %302 : vector<8x128xf32>
    %304 = math.exp %303 : vector<8x128xf32>
    %cst_83 = arith.constant 1.000000e+00 : f32
    %305 = vector.broadcast %cst_83 : f32 to vector<8x128xf32>
    %306 = arith.addf %305, %304 : vector<8x128xf32>
    %307 = arith.divf %305, %306 : vector<8x128xf32>
    %308 = arith.mulf %299, %250 : vector<8x128xf32>
    %309 = arith.mulf %293, %301 : vector<8x128xf32>
    %310 = arith.addf %308, %309 : vector<8x128xf32>
    %311 = math.tanh %310 : vector<8x128xf32>
    %312 = arith.mulf %307, %311 : vector<8x128xf32>
    %313 = tpu.concatenate %252, %281 in 1 : vector<8x128xf32>, vector<8x128xf32> -> vector<8x256xf32>
    %c0_84 = arith.constant 0 : index
    %c0_85 = arith.constant 0 : index
    %314 = vector.load %arg4[%c0_84, %c0_85] : memref<256x512xf32, #tpu.memory_space<vmem>>, vector<256x512xf32>
    %cst_86 = arith.constant dense<0.000000e+00> : vector<8x512xf32>
    %315 = tpu.matmul %313, %314, %cst_86 {dimension_numbers = #tpu.dot_dimension_numbers<[1], [0], [0], [1], [0, 0, 1, 1], [], []>} : vector<8x256xf32>, vector<256x512xf32>, vector<8x512xf32> -> vector<8x512xf32>
    %316 = arith.addf %315, %11 : vector<8x512xf32>
    %317 = vector.extract_strided_slice %316 {offsets = [0, 0], sizes = [8, 128], strides = [1, 1]} : vector<8x512xf32> to vector<8x128xf32>
    %318 = arith.negf %317 : vector<8x128xf32>
    %319 = math.exp %318 : vector<8x128xf32>
    %cst_87 = arith.constant 1.000000e+00 : f32
    %320 = vector.broadcast %cst_87 : f32 to vector<8x128xf32>
    %321 = arith.addf %320, %319 : vector<8x128xf32>
    %322 = arith.divf %320, %321 : vector<8x128xf32>
    %323 = vector.extract_strided_slice %316 {offsets = [0, 128], sizes = [8, 128], strides = [1, 1]} : vector<8x512xf32> to vector<8x128xf32>
    %324 = arith.negf %323 : vector<8x128xf32>
    %325 = math.exp %324 : vector<8x128xf32>
    %cst_88 = arith.constant 1.000000e+00 : f32
    %326 = vector.broadcast %cst_88 : f32 to vector<8x128xf32>
    %327 = arith.addf %326, %325 : vector<8x128xf32>
    %328 = arith.divf %326, %327 : vector<8x128xf32>
    %329 = vector.extract_strided_slice %316 {offsets = [0, 256], sizes = [8, 128], strides = [1, 1]} : vector<8x512xf32> to vector<8x128xf32>
    %330 = math.tanh %329 : vector<8x128xf32>
    %331 = vector.extract_strided_slice %316 {offsets = [0, 384], sizes = [8, 128], strides = [1, 1]} : vector<8x512xf32> to vector<8x128xf32>
    %332 = arith.negf %331 : vector<8x128xf32>
    %333 = math.exp %332 : vector<8x128xf32>
    %cst_89 = arith.constant 1.000000e+00 : f32
    %334 = vector.broadcast %cst_89 : f32 to vector<8x128xf32>
    %335 = arith.addf %334, %333 : vector<8x128xf32>
    %336 = arith.divf %334, %335 : vector<8x128xf32>
    %337 = arith.mulf %328, %279 : vector<8x128xf32>
    %338 = arith.mulf %322, %330 : vector<8x128xf32>
    %339 = arith.addf %337, %338 : vector<8x128xf32>
    %340 = math.tanh %339 : vector<8x128xf32>
    %341 = arith.mulf %336, %340 : vector<8x128xf32>
    %c6_i32 = arith.constant 6 : i32
    %342 = arith.index_cast %c6_i32 : i32 to index
    %c0_90 = arith.constant 0 : index
    %c0_91 = arith.constant 0 : index
    %343 = vector.load %arg9[%342, %c0_90, %c0_91] : memref<8x8x512xf32, #tpu.memory_space<vmem>>, vector<1x8x512xf32>
    %344 = vector.shape_cast %343 : vector<1x8x512xf32> to vector<8x512xf32>
    %c0_92 = arith.constant 0 : index
    %c0_93 = arith.constant 0 : index
    %345 = vector.load %arg2[%c0_92, %c0_93] : memref<128x512xf32, #tpu.memory_space<vmem>>, vector<128x512xf32>
    %cst_94 = arith.constant dense<0.000000e+00> : vector<8x512xf32>
    %346 = tpu.matmul %312, %345, %cst_94 {dimension_numbers = #tpu.dot_dimension_numbers<[1], [0], [0], [1], [0, 0, 1, 1], [], []>} : vector<8x128xf32>, vector<128x512xf32>, vector<8x512xf32> -> vector<8x512xf32>
    %347 = arith.addf %344, %346 : vector<8x512xf32>
    %348 = vector.extract_strided_slice %347 {offsets = [0, 0], sizes = [8, 128], strides = [1, 1]} : vector<8x512xf32> to vector<8x128xf32>
    %349 = arith.negf %348 : vector<8x128xf32>
    %350 = math.exp %349 : vector<8x128xf32>
    %cst_95 = arith.constant 1.000000e+00 : f32
    %351 = vector.broadcast %cst_95 : f32 to vector<8x128xf32>
    %352 = arith.addf %351, %350 : vector<8x128xf32>
    %353 = arith.divf %351, %352 : vector<8x128xf32>
    %354 = vector.extract_strided_slice %347 {offsets = [0, 128], sizes = [8, 128], strides = [1, 1]} : vector<8x512xf32> to vector<8x128xf32>
    %355 = arith.negf %354 : vector<8x128xf32>
    %356 = math.exp %355 : vector<8x128xf32>
    %cst_96 = arith.constant 1.000000e+00 : f32
    %357 = vector.broadcast %cst_96 : f32 to vector<8x128xf32>
    %358 = arith.addf %357, %356 : vector<8x128xf32>
    %359 = arith.divf %357, %358 : vector<8x128xf32>
    %360 = vector.extract_strided_slice %347 {offsets = [0, 256], sizes = [8, 128], strides = [1, 1]} : vector<8x512xf32> to vector<8x128xf32>
    %361 = math.tanh %360 : vector<8x128xf32>
    %362 = vector.extract_strided_slice %347 {offsets = [0, 384], sizes = [8, 128], strides = [1, 1]} : vector<8x512xf32> to vector<8x128xf32>
    %363 = arith.negf %362 : vector<8x128xf32>
    %364 = math.exp %363 : vector<8x128xf32>
    %cst_97 = arith.constant 1.000000e+00 : f32
    %365 = vector.broadcast %cst_97 : f32 to vector<8x128xf32>
    %366 = arith.addf %365, %364 : vector<8x128xf32>
    %367 = arith.divf %365, %366 : vector<8x128xf32>
    %368 = arith.mulf %359, %310 : vector<8x128xf32>
    %369 = arith.mulf %353, %361 : vector<8x128xf32>
    %370 = arith.addf %368, %369 : vector<8x128xf32>
    %371 = math.tanh %370 : vector<8x128xf32>
    %372 = arith.mulf %367, %371 : vector<8x128xf32>
    %373 = tpu.concatenate %312, %341 in 1 : vector<8x128xf32>, vector<8x128xf32> -> vector<8x256xf32>
    %c0_98 = arith.constant 0 : index
    %c0_99 = arith.constant 0 : index
    %374 = vector.load %arg4[%c0_98, %c0_99] : memref<256x512xf32, #tpu.memory_space<vmem>>, vector<256x512xf32>
    %cst_100 = arith.constant dense<0.000000e+00> : vector<8x512xf32>
    %375 = tpu.matmul %373, %374, %cst_100 {dimension_numbers = #tpu.dot_dimension_numbers<[1], [0], [0], [1], [0, 0, 1, 1], [], []>} : vector<8x256xf32>, vector<256x512xf32>, vector<8x512xf32> -> vector<8x512xf32>
    %376 = arith.addf %375, %11 : vector<8x512xf32>
    %377 = vector.extract_strided_slice %376 {offsets = [0, 0], sizes = [8, 128], strides = [1, 1]} : vector<8x512xf32> to vector<8x128xf32>
    %378 = arith.negf %377 : vector<8x128xf32>
    %379 = math.exp %378 : vector<8x128xf32>
    %cst_101 = arith.constant 1.000000e+00 : f32
    %380 = vector.broadcast %cst_101 : f32 to vector<8x128xf32>
    %381 = arith.addf %380, %379 : vector<8x128xf32>
    %382 = arith.divf %380, %381 : vector<8x128xf32>
    %383 = vector.extract_strided_slice %376 {offsets = [0, 128], sizes = [8, 128], strides = [1, 1]} : vector<8x512xf32> to vector<8x128xf32>
    %384 = arith.negf %383 : vector<8x128xf32>
    %385 = math.exp %384 : vector<8x128xf32>
    %cst_102 = arith.constant 1.000000e+00 : f32
    %386 = vector.broadcast %cst_102 : f32 to vector<8x128xf32>
    %387 = arith.addf %386, %385 : vector<8x128xf32>
    %388 = arith.divf %386, %387 : vector<8x128xf32>
    %389 = vector.extract_strided_slice %376 {offsets = [0, 256], sizes = [8, 128], strides = [1, 1]} : vector<8x512xf32> to vector<8x128xf32>
    %390 = math.tanh %389 : vector<8x128xf32>
    %391 = vector.extract_strided_slice %376 {offsets = [0, 384], sizes = [8, 128], strides = [1, 1]} : vector<8x512xf32> to vector<8x128xf32>
    %392 = arith.negf %391 : vector<8x128xf32>
    %393 = math.exp %392 : vector<8x128xf32>
    %cst_103 = arith.constant 1.000000e+00 : f32
    %394 = vector.broadcast %cst_103 : f32 to vector<8x128xf32>
    %395 = arith.addf %394, %393 : vector<8x128xf32>
    %396 = arith.divf %394, %395 : vector<8x128xf32>
    %397 = arith.mulf %388, %339 : vector<8x128xf32>
    %398 = arith.mulf %382, %390 : vector<8x128xf32>
    %399 = arith.addf %397, %398 : vector<8x128xf32>
    %400 = math.tanh %399 : vector<8x128xf32>
    %401 = arith.mulf %396, %400 : vector<8x128xf32>
    %c7_i32 = arith.constant 7 : i32
    %402 = arith.index_cast %c7_i32 : i32 to index
    %c0_104 = arith.constant 0 : index
    %c0_105 = arith.constant 0 : index
    %403 = vector.load %arg9[%402, %c0_104, %c0_105] : memref<8x8x512xf32, #tpu.memory_space<vmem>>, vector<1x8x512xf32>
    %404 = vector.shape_cast %403 : vector<1x8x512xf32> to vector<8x512xf32>
    %c0_106 = arith.constant 0 : index
    %c0_107 = arith.constant 0 : index
    %405 = vector.load %arg2[%c0_106, %c0_107] : memref<128x512xf32, #tpu.memory_space<vmem>>, vector<128x512xf32>
    %cst_108 = arith.constant dense<0.000000e+00> : vector<8x512xf32>
    %406 = tpu.matmul %372, %405, %cst_108 {dimension_numbers = #tpu.dot_dimension_numbers<[1], [0], [0], [1], [0, 0, 1, 1], [], []>} : vector<8x128xf32>, vector<128x512xf32>, vector<8x512xf32> -> vector<8x512xf32>
    %407 = arith.addf %404, %406 : vector<8x512xf32>
    %408 = vector.extract_strided_slice %407 {offsets = [0, 0], sizes = [8, 128], strides = [1, 1]} : vector<8x512xf32> to vector<8x128xf32>
    %409 = arith.negf %408 : vector<8x128xf32>
    %410 = math.exp %409 : vector<8x128xf32>
    %cst_109 = arith.constant 1.000000e+00 : f32
    %411 = vector.broadcast %cst_109 : f32 to vector<8x128xf32>
    %412 = arith.addf %411, %410 : vector<8x128xf32>
    %413 = arith.divf %411, %412 : vector<8x128xf32>
    %414 = vector.extract_strided_slice %407 {offsets = [0, 128], sizes = [8, 128], strides = [1, 1]} : vector<8x512xf32> to vector<8x128xf32>
    %415 = arith.negf %414 : vector<8x128xf32>
    %416 = math.exp %415 : vector<8x128xf32>
    %cst_110 = arith.constant 1.000000e+00 : f32
    %417 = vector.broadcast %cst_110 : f32 to vector<8x128xf32>
    %418 = arith.addf %417, %416 : vector<8x128xf32>
    %419 = arith.divf %417, %418 : vector<8x128xf32>
    %420 = vector.extract_strided_slice %407 {offsets = [0, 256], sizes = [8, 128], strides = [1, 1]} : vector<8x512xf32> to vector<8x128xf32>
    %421 = math.tanh %420 : vector<8x128xf32>
    %422 = vector.extract_strided_slice %407 {offsets = [0, 384], sizes = [8, 128], strides = [1, 1]} : vector<8x512xf32> to vector<8x128xf32>
    %423 = arith.negf %422 : vector<8x128xf32>
    %424 = math.exp %423 : vector<8x128xf32>
    %cst_111 = arith.constant 1.000000e+00 : f32
    %425 = vector.broadcast %cst_111 : f32 to vector<8x128xf32>
    %426 = arith.addf %425, %424 : vector<8x128xf32>
    %427 = arith.divf %425, %426 : vector<8x128xf32>
    %428 = arith.mulf %419, %370 : vector<8x128xf32>
    %429 = arith.mulf %413, %421 : vector<8x128xf32>
    %430 = arith.addf %428, %429 : vector<8x128xf32>
    %431 = math.tanh %430 : vector<8x128xf32>
    %432 = arith.mulf %427, %431 : vector<8x128xf32>
    %433 = tpu.concatenate %372, %401 in 1 : vector<8x128xf32>, vector<8x128xf32> -> vector<8x256xf32>
    %c0_112 = arith.constant 0 : index
    %c0_113 = arith.constant 0 : index
    %434 = vector.load %arg4[%c0_112, %c0_113] : memref<256x512xf32, #tpu.memory_space<vmem>>, vector<256x512xf32>
    %cst_114 = arith.constant dense<0.000000e+00> : vector<8x512xf32>
    %435 = tpu.matmul %433, %434, %cst_114 {dimension_numbers = #tpu.dot_dimension_numbers<[1], [0], [0], [1], [0, 0, 1, 1], [], []>} : vector<8x256xf32>, vector<256x512xf32>, vector<8x512xf32> -> vector<8x512xf32>
    %436 = arith.addf %435, %11 : vector<8x512xf32>
    %437 = vector.extract_strided_slice %436 {offsets = [0, 0], sizes = [8, 128], strides = [1, 1]} : vector<8x512xf32> to vector<8x128xf32>
    %438 = arith.negf %437 : vector<8x128xf32>
    %439 = math.exp %438 : vector<8x128xf32>
    %cst_115 = arith.constant 1.000000e+00 : f32
    %440 = vector.broadcast %cst_115 : f32 to vector<8x128xf32>
    %441 = arith.addf %440, %439 : vector<8x128xf32>
    %442 = arith.divf %440, %441 : vector<8x128xf32>
    %443 = vector.extract_strided_slice %436 {offsets = [0, 128], sizes = [8, 128], strides = [1, 1]} : vector<8x512xf32> to vector<8x128xf32>
    %444 = arith.negf %443 : vector<8x128xf32>
    %445 = math.exp %444 : vector<8x128xf32>
    %cst_116 = arith.constant 1.000000e+00 : f32
    %446 = vector.broadcast %cst_116 : f32 to vector<8x128xf32>
    %447 = arith.addf %446, %445 : vector<8x128xf32>
    %448 = arith.divf %446, %447 : vector<8x128xf32>
    %449 = vector.extract_strided_slice %436 {offsets = [0, 256], sizes = [8, 128], strides = [1, 1]} : vector<8x512xf32> to vector<8x128xf32>
    %450 = math.tanh %449 : vector<8x128xf32>
    %451 = vector.extract_strided_slice %436 {offsets = [0, 384], sizes = [8, 128], strides = [1, 1]} : vector<8x512xf32> to vector<8x128xf32>
    %452 = arith.negf %451 : vector<8x128xf32>
    %453 = math.exp %452 : vector<8x128xf32>
    %cst_117 = arith.constant 1.000000e+00 : f32
    %454 = vector.broadcast %cst_117 : f32 to vector<8x128xf32>
    %455 = arith.addf %454, %453 : vector<8x128xf32>
    %456 = arith.divf %454, %455 : vector<8x128xf32>
    %457 = arith.mulf %448, %399 : vector<8x128xf32>
    %458 = arith.mulf %442, %450 : vector<8x128xf32>
    %459 = arith.addf %457, %458 : vector<8x128xf32>
    %460 = math.tanh %459 : vector<8x128xf32>
    %461 = arith.mulf %456, %460 : vector<8x128xf32>
    %c7_i32_118 = arith.constant 7 : i32
    %462 = tpu.concatenate %432, %461 in 1 : vector<8x128xf32>, vector<8x128xf32> -> vector<8x256xf32>
    %c0_119 = arith.constant 0 : index
    %c0_120 = arith.constant 0 : index
    %463 = vector.load %arg4[%c0_119, %c0_120] : memref<256x512xf32, #tpu.memory_space<vmem>>, vector<256x512xf32>
    %cst_121 = arith.constant dense<0.000000e+00> : vector<8x512xf32>
    %464 = tpu.matmul %462, %463, %cst_121 {dimension_numbers = #tpu.dot_dimension_numbers<[1], [0], [0], [1], [0, 0, 1, 1], [], []>} : vector<8x256xf32>, vector<256x512xf32>, vector<8x512xf32> -> vector<8x512xf32>
    %465 = arith.addf %464, %11 : vector<8x512xf32>
    %466 = vector.extract_strided_slice %465 {offsets = [0, 0], sizes = [8, 128], strides = [1, 1]} : vector<8x512xf32> to vector<8x128xf32>
    %467 = arith.negf %466 : vector<8x128xf32>
    %468 = math.exp %467 : vector<8x128xf32>
    %cst_122 = arith.constant 1.000000e+00 : f32
    %469 = vector.broadcast %cst_122 : f32 to vector<8x128xf32>
    %470 = arith.addf %469, %468 : vector<8x128xf32>
    %471 = arith.divf %469, %470 : vector<8x128xf32>
    %472 = vector.extract_strided_slice %465 {offsets = [0, 128], sizes = [8, 128], strides = [1, 1]} : vector<8x512xf32> to vector<8x128xf32>
    %473 = arith.negf %472 : vector<8x128xf32>
    %474 = math.exp %473 : vector<8x128xf32>
    %cst_123 = arith.constant 1.000000e+00 : f32
    %475 = vector.broadcast %cst_123 : f32 to vector<8x128xf32>
    %476 = arith.addf %475, %474 : vector<8x128xf32>
    %477 = arith.divf %475, %476 : vector<8x128xf32>
    %478 = vector.extract_strided_slice %465 {offsets = [0, 256], sizes = [8, 128], strides = [1, 1]} : vector<8x512xf32> to vector<8x128xf32>
    %479 = math.tanh %478 : vector<8x128xf32>
    %480 = vector.extract_strided_slice %465 {offsets = [0, 384], sizes = [8, 128], strides = [1, 1]} : vector<8x512xf32> to vector<8x128xf32>
    %481 = arith.negf %480 : vector<8x128xf32>
    %482 = math.exp %481 : vector<8x128xf32>
    %cst_124 = arith.constant 1.000000e+00 : f32
    %483 = vector.broadcast %cst_124 : f32 to vector<8x128xf32>
    %484 = arith.addf %483, %482 : vector<8x128xf32>
    %485 = arith.divf %483, %484 : vector<8x128xf32>
    %486 = arith.mulf %477, %459 : vector<8x128xf32>
    %487 = arith.mulf %471, %479 : vector<8x128xf32>
    %488 = arith.addf %486, %487 : vector<8x128xf32>
    %489 = math.tanh %488 : vector<8x128xf32>
    %490 = arith.mulf %485, %489 : vector<8x128xf32>
    %c0_125 = arith.constant 0 : index
    %c0_126 = arith.constant 0 : index
    %491 = vector.load %arg6[%c0_125, %c0_126] : memref<1x128xf32, #tpu.memory_space<vmem>>, vector<1x128xf32>
    %492 = vector.broadcast %491 : vector<1x128xf32> to vector<8x128xf32>
    %493 = arith.mulf %490, %492 : vector<8x128xf32>
    %cst_127 = arith.constant dense<0.000000e+00> : vector<8xf32>
    %494 = vector.multi_reduction <add>, %493, %cst_127 [1] : vector<8x128xf32> to vector<8xf32>
    %495 = vector.shape_cast %494 : vector<8xf32> to vector<8x1xf32>
    %c0_128 = arith.constant 0 : index
    %c0_129 = arith.constant 0 : index
    %496 = vector.load %arg7[%c0_128, %c0_129] : memref<1x1xf32, #tpu.memory_space<vmem>>, vector<1x1xf32>
    %497 = vector.broadcast %496 : vector<1x1xf32> to vector<8x1xf32>
    %498 = arith.addf %495, %497 : vector<8x1xf32>
    %c0_130 = arith.constant 0 : index
    %c0_131 = arith.constant 0 : index
    %499 = vector.load %arg8[%c0_130, %c0_131] : memref<8x1xf32, #tpu.memory_space<vmem>>, vector<8x1xf32>
    tpu.vector_store %arg8[%c0_130, %c0_131], %498 {strides = array<i32>} : memref<8x1xf32, #tpu.memory_space<vmem>>, vector<8x1xf32>,
    return
  }
}

</mosaic_0001>

<bundles_post_ra>
// kernel: tpu_custom_call.1
= control target key start
LH: loop header
LB: loop body
LE: loop exit
PB: predicated region body
PF: predicated region fallthrough
CT: control target
= control target key end

     0   :  { %s6651_s0 = inlined_call_operand.vmem [shape: f32[64,8], index: 0, kind: input, shape index: {}]   ;;  %s6652_s1 = inlined_call_operand.vmem [shape: f32[8,512], index: 1, kind: input, shape index: {}]   ;;  %s6653_s2 = inlined_call_operand.hbm [shape: f32[128,512], index: 2, kind: input, shape index: {}]   ;;  %s6654_s3 = inlined_call_operand.vmem [shape: f32[1,512], index: 3, kind: input, shape index: {}]   ;;  %s6655_s4 = inlined_call_operand.hbm [shape: f32[256,512], index: 4, kind: input, shape index: {}]   ;;  %s6656_s5 = inlined_call_operand.vmem [shape: f32[1,512], index: 5, kind: input, shape index: {}]   ;;  %s6657_s6 = inlined_call_operand.vmem [shape: f32[1,128], index: 6, kind: input, shape index: {}]   ;;  %s6658_s7 = inlined_call_operand.<no memory space> [shape: f32[1,1], index: 7, kind: input, shape index: {}]   ;;  %s6659_s8 = inlined_call_operand.vmem [shape: f32[8,1], index: 8, kind: output, shape index: {}]  }
   0x1   :  { %v13_v0 = vstv %s6658_s7 }
   0x2   :  { %14 = vst [vmem:[#allocation3] sm:$0x1] %v13_v0 }
   0x3   :  { %15 = vsyncpa [#allocation5], 0 }
   0x4   :  { %16 = vsyncpa [#allocation7], 0  ;;  %s5318_s29 = smov [#allocation4]   ;;  %s5270_s11 = scalar_lea.hbm %s6653_s2, 8192 }
   0x5   :  { %s26_s30 = sshll.u32 %s5318_s29, 4  ;;  %p5271_p0 = scmp.ne.s32.totalorder %s6653_s2, %s5270_s11  ;;  %s27_s30 = int_to_ptr.vmem [resolvable:$true] %s26_s30 }
   0x6   :  { %p5274_p1 = scmp.lt.u32.totalorder %s5270_s11, %s6653_s2 }
   0x8   :  { %p5276_p2 = pnand %p5274_p1, %p5271_p0 }
   0xa   :  { %5279 = shalt.err (!%p5276_p2)
}
   0xb   :  { %s5280_s7 = scalar_lea.vmem %s27_s30, 8192  ;;  %p5285_p4 = scmp.lt.s32.totalorder %s27_s30, %s27_s30 }
   0xc   :  { %p5281_p3 = scmp.ne.s32.totalorder %s27_s30, %s5280_s7  ;;  %p5286_p5 = scmp.lt.s32.totalorder %s5280_s7, %s5280_s7 }
   0xe   :  { %p5287_p6 = por %p5286_p5, %p5285_p4 }
  0x10   :  { %p5288_p7 = pnand %p5287_p6, %p5281_p3 }
  0x12   :  { %5291 = shalt.err (!%p5288_p7)
}
  0x13   :  { %s5319_s16 = smov 512   ;;  %s5320_s17 = smov 32  }
  0x14   :  { %32 = dma.hbm_to_vmem [thread:$0]  %s6653_s2, 8192, %s27_s30, [#allocation5], %s5319_s16, %s5319_s16, %s5320_s17  }
  0x15   :  { %s5321_s20 = smov [#allocation6]   ;;  %s5292_s24 = scalar_lea.hbm %s6655_s4, 16384 }
  0x16   :  { %s40_s21 = sshll.u32 %s5321_s20, 4  ;;  %p5293_p8 = scmp.ne.s32.totalorder %s6655_s4, %s5292_s24  ;;  %s41_s21 = int_to_ptr.vmem [resolvable:$true] %s40_s21 }
  0x17   :  { %p5296_p9 = scmp.lt.u32.totalorder %s5292_s24, %s6655_s4 }
  0x19   :  { %p5298_p10 = pnand %p5296_p9, %p5293_p8 }
  0x1b   :  { %5301 = shalt.err (!%p5298_p10)
}
  0x1c   :  { %s5302_s29 = scalar_lea.vmem %s41_s21, 16384  ;;  %p5307_p12 = scmp.lt.s32.totalorder %s41_s21, %s41_s21 }
  0x1d   :  { %p5303_p11 = scmp.ne.s32.totalorder %s41_s21, %s5302_s29  ;;  %p5308_p13 = scmp.lt.s32.totalorder %s5302_s29, %s5302_s29 }
  0x1f   :  { %p5309_p0 = por %p5308_p13, %p5307_p12 }
  0x21   :  { %p5310_p1 = pnand %p5309_p0, %p5303_p11 }
  0x23   :  { %5313 = shalt.err (!%p5310_p1)
}
  0x24   :  { %46 = dma.hbm_to_vmem [thread:$0]  %s6655_s4, 16384, %s41_s21, [#allocation7], %s5319_s16, %s5319_s16, %s5320_s17  }
  0x25   :  { %5314 = dma.done.wait [#allocation5], 8192  }
  0x26   :  { %5315 = vsyncadd [#allocation5], 4294959104 }
  0x27   :  { %5316 = dma.done.wait [#allocation7], 16384  }
  0x28   :  { %5317 = vsyncadd [#allocation7], 4294950912  ;;  %v6664_v1 = vmov 0.0   ;;  %v68_v2 = vld [vmem:[%s6652_s1 + $0x8] sm:$0xff]  ;;  %v70_v3 = vld [vmem:[%s6652_s1 + $0x18] sm:$0xff]  ;;  %vm93_vm0 = vcmask 64512  }
  0x29   :  { %182 = vmatprep.mubr.f32.mxu0 %v6664_v1  ;;  %295 = vmatprep.mubr.f32.mxu1 %v6664_v1  ;;  %v67_v4 = vld [vmem:[%s6652_s1] sm:$0xff]  ;;  %v69_v5 = vld [vmem:[%s6652_s1 + $0x10] sm:$0xff]  ;;  %v60_v18 = vld [vmem:[%s6651_s0 + $0x8] sm:$0xff]  ;;  %vm3335_vm1 = vcmask 7168  }
  0x2a   :  { %118 = vmatprep.subr.mxu0 %v68_v2  ;;  %231 = vmatprep.subr.mxu1 %v70_v3  ;;  %v59_v6 = vld [vmem:[%s6651_s0] sm:$0xff]  ;;  %v403_v7 = vld [vmem:[#allocation4 + $0x8] sm:$0xff]  ;;  %v404_v15 = vld [vmem:[#allocation4 + $0x10] sm:$0xff] }
  0x2b   :  { %119 = vmatpush1.msra.mxu0 %v67_v4  ;;  %232 = vmatpush1.msra.mxu1 %v69_v5  ;;  %v407_v8 = vld [vmem:[#allocation4 + $0x28] sm:$0xff]  ;;  %v405_v9 = vld [vmem:[#allocation4 + $0x18] sm:$0xff]  ;;  %v402_v13 = vld [vmem:[#allocation4] sm:$0xff] }
  0x2c   :  { %v409_v10 = vld [vmem:[#allocation4 + $0x38] sm:$0xff]  ;;  %3343 = vmatmul.mubr.msk.f32.vlgmr.msra.gmra.mrb[0].mxu0 %vm93_vm0, %v59_v6  ;;  %3351 = vmatmul.mubr.msk.f32.vlgmr.msra.gmra.mrb[0].mxu1 %vm93_vm0, %v59_v6  ;;  %v5414_v11 = vpack.c.bf16 %v407_v8, %v403_v7  ;;  %v406_v14 = vld [vmem:[#allocation4 + $0x20] sm:$0xff]  ;;  %v408_v17 = vld [vmem:[#allocation4 + $0x30] sm:$0xff] }
  0x2d   :  { %v5416_v12 = vpack.c.bf16 %v409_v10, %v405_v9  ;;  %v5418_v16 = vpack.c.bf16 %v406_v14, %v402_v13  ;;  %188 = vmatprep.mubr.f32.mxu0 %v6664_v1  ;;  %301 = vmatprep.mubr.f32.mxu1 %v6664_v1  ;;  %v411_v19 = vld [vmem:[#allocation4 + $0x48] sm:$0xff]  ;;  %v5427_v20 = vpack.c.bf16 %v408_v17, %v404_v15  ;;  %v413_v22 = vld [vmem:[#allocation4 + $0x58] sm:$0xff]  ;;  %v410_v26 = vld [vmem:[#allocation4 + $0x40] sm:$0xff] }
  0x2e   :  { %6889 = vst [vmem:[#allocation10_spill] sm:$0xff] %v5414_v11  ;;  %3410 = vmatprep.subr.bf16.mxu0 %v5414_v11  ;;  %v415_v21 = vld [vmem:[#allocation4 + $0x68] sm:$0xff]  ;;  %v417_v23 = vld [vmem:[#allocation4 + $0x78] sm:$0xff]  ;;  %v414_v27 = vld [vmem:[#allocation4 + $0x60] sm:$0xff] }
  0x2f   :  { %6890 = vst [vmem:[#allocation11_spill] sm:$0xff] %v5416_v12  ;;  %6891 = vst [vmem:[#allocation12_spill] sm:$0xff] %v5418_v16  ;;  %3442 = vmatprep.subr.bf16.mxu1 %v5416_v12  ;;  %3412 = vmatpush1.bf16.msra.mxu0 %v5418_v16  ;;  %v5430_v24 = vpack.c.bf16 %v415_v21, %v411_v19  ;;  %v5432_v25 = vpack.c.bf16 %v417_v23, %v413_v22  ;;  %v412_v28 = vld [vmem:[#allocation4 + $0x50] sm:$0xff]  ;;  %v419_v32 = vld [vmem:[#allocation4 + $0x88] sm:$0xff] }
  0x30   :  { %6892 = vst [vmem:[#allocation13_spill] sm:$0xff] %v5427_v20  ;;  %3444 = vmatpush1.bf16.msra.mxu1 %v5427_v20  ;;  %3344 = vmatmul.mubr.msk.f32.gmra.mrb[2].mxu0 %vm93_vm0, %v60_v18  ;;  %v5436_v29 = vpack.c.bf16 %v414_v27, %v410_v26  ;;  %v416_v30 = vld [vmem:[#allocation4 + $0x70] sm:$0xff]  ;;  %v423_v34 = vld [vmem:[#allocation4 + $0xa8] sm:$0xff]  ;;  %v421_v35 = vld [vmem:[#allocation4 + $0x98] sm:$0xff] }
  0x31   :  { %6893 = vst [vmem:[#allocation14_spill] sm:$0xff] %v5430_v24  ;;  %6894 = vst [vmem:[#allocation15_spill] sm:$0xff] %v5432_v25  ;;  %v61_v31 = vld [vmem:[%s6651_s0 + $0x10] sm:$0xff]  ;;  %3352 = vmatmul.mubr.msk.f32.gmra.mrb[2].mxu1 %vm93_vm0, %v60_v18  ;;  %3414 = vmatprep.subr.bf16.mxu0 %v5430_v24  ;;  %v5443_v33 = vpack.c.bf16 %v416_v30, %v412_v28  ;;  %v425_v36 = vld [vmem:[#allocation4 + $0xb8] sm:$0xff]  ;;  %v5447_v37 = vpack.c.bf16 %v423_v34, %v419_v32 }
  0x32   :  { %6895 = vst [vmem:[#allocation16_spill] sm:$0xff] %v5436_v29  ;;  %3446 = vmatprep.subr.bf16.mxu1 %v5432_v25  ;;  %194 = vmatprep.mubr.f32.mxu0 %v6664_v1  ;;  %v5449_v38 = vpack.c.bf16 %v425_v36, %v421_v35  ;;  %v418_v39 = vld [vmem:[#allocation4 + $0x80] sm:$0xff]  ;;  %v420_v41 = vld [vmem:[#allocation4 + $0x90] sm:$0xff]  ;;  %v427_v45 = vld [vmem:[#allocation4 + $0xc8] sm:$0xff] }
  0x33   :  { %6896 = vst [vmem:[#allocation17_spill] sm:$0xff] %v5443_v33  ;;  %6897 = vst [vmem:[#allocation18_spill] sm:$0xff] %v5447_v37  ;;  %v422_v40 = vld [vmem:[#allocation4 + $0xa0] sm:$0xff]  ;;  %3416 = vmatpush1.bf16.msra.mxu0 %v5436_v29  ;;  %307 = vmatprep.mubr.f32.mxu1 %v6664_v1  ;;  %v424_v43 = vld [vmem:[#allocation4 + $0xb0] sm:$0xff] }
  0x34   :  { %6898 = vst [vmem:[#allocation19_spill] sm:$0xff] %v5449_v38  ;;  %v5453_v42 = vpack.c.bf16 %v422_v40, %v418_v39  ;;  %v62_v44 = vld [vmem:[%s6651_s0 + $0x18] sm:$0xff]  ;;  %3448 = vmatpush1.bf16.msra.mxu1 %v5443_v33  ;;  %3345 = vmatmul.mubr.msk.f32.gmra.mrb[4].mxu0 %vm93_vm0, %v61_v31  ;;  %v5460_v46 = vpack.c.bf16 %v424_v43, %v420_v41  ;;  %v431_v47 = vld [vmem:[#allocation4 + $0xe8] sm:$0xff]  ;;  %v426_v51 = vld [vmem:[#allocation4 + $0xc0] sm:$0xff] }
  0x35   :  { %v429_v48 = vld [vmem:[#allocation4 + $0xd8] sm:$0xff]  ;;  %3353 = vmatmul.mubr.msk.f32.gmra.mrb[4].mxu1 %vm93_vm0, %v61_v31  ;;  %3418 = vmatprep.subr.bf16.mxu0 %v5447_v37  ;;  %v5464_v50 = vpack.c.bf16 %v431_v47, %v427_v45  ;;  %v430_v52 = vld [vmem:[#allocation4 + $0xe0] sm:$0xff]  ;;  %v428_v53 = vld [vmem:[#allocation4 + $0xd0] sm:$0xff] }
  0x36   :  { %6899 = vst [vmem:[#allocation20_spill] sm:$0xff] %v5453_v42  ;;  %6900 = vst [vmem:[#allocation21_spill] sm:$0xff] %v5460_v46  ;;  %v433_v49 = vld [vmem:[#allocation4 + $0xf8] sm:$0xff]  ;;  %3450 = vmatprep.subr.bf16.mxu1 %v5449_v38  ;;  %200 = vmatprep.mubr.f32.mxu0 %v6664_v1  ;;  %v432_v55 = vld [vmem:[#allocation4 + $0xf0] sm:$0xff]  ;;  %v5472_v57 = vpack.c.bf16 %v430_v52, %v426_v51 }
  0x37   :  { %6901 = vst [vmem:[#allocation22_spill] sm:$0xff] %v5464_v50  ;;  %v5468_v54 = vpack.c.bf16 %v433_v49, %v429_v48  ;;  %v435_v56 = vld [vmem:[#allocation4 + $0x108] sm:$0xff]  ;;  %3420 = vmatpush1.bf16.msra.mxu0 %v5453_v42  ;;  %313 = vmatprep.mubr.f32.mxu1 %v6664_v1  ;;  %v437_v59 = vld [vmem:[#allocation4 + $0x118] sm:$0xff]  ;;  %v5476_v61 = vpack.c.bf16 %v432_v55, %v428_v53  ;;  %v434_v62 = vld [vmem:[#allocation4 + $0x100] sm:$0xff] }
  0x38   :  { %6903 = vst [vmem:[#allocation24_spill] sm:$0xff] %v5472_v57  ;;  %v439_v58 = vld [vmem:[#allocation4 + $0x128] sm:$0xff]  ;;  %v441_v60 = vld [vmem:[#allocation4 + $0x138] sm:$0xff]  ;;  %3452 = vmatpush1.bf16.msra.mxu1 %v5460_v46  ;;  %3346 = vmatmul.mubr.msk.f32.gmra.mrb[6].mxu0 %vm93_vm0, %v62_v44  ;;  %v438_v63 = vld [vmem:[#allocation4 + $0x120] sm:$0xff] }
  0x39   :  { %6902 = vst [vmem:[#allocation23_spill] sm:$0xff] %v5468_v54  ;;  %6904 = vst [vmem:[#allocation25_spill] sm:$0xff] %v5476_v61  ;;  %3354 = vmatmul.mubr.msk.f32.gmra.mrb[6].mxu1 %vm93_vm0, %v62_v44  ;;  %3422 = vmatprep.subr.bf16.mxu0 %v5464_v50  ;;  %v63_v0 = vld [vmem:[%s6651_s0 + $0x20] sm:$0xff]  ;;  %v5483_v2 = vpack.c.bf16 %v439_v58, %v435_v56  ;;  %v436_v3 = vld [vmem:[#allocation4 + $0x110] sm:$0xff]  ;;  %v5487_v5 = vpack.c.bf16 %v441_v60, %v437_v59 }
  0x3a   :  { %v440_v4 = vld [vmem:[#allocation4 + $0x130] sm:$0xff]  ;;  %3454 = vmatprep.subr.bf16.mxu1 %v5468_v54  ;;  %206 = vmatprep.mubr.f32.mxu0 %v6664_v1  ;;  %v443_v6 = vld [vmem:[#allocation4 + $0x148] sm:$0xff]  ;;  %v5491_v8 = vpack.c.bf16 %v438_v63, %v434_v62  ;;  %v445_v9 = vld [vmem:[#allocation4 + $0x158] sm:$0xff] }
  0x3b   :  { %6905 = vst [vmem:[#allocation26_spill] sm:$0xff] %v5483_v2  ;;  %6906 = vst [vmem:[#allocation27_spill] sm:$0xff] %v5487_v5  ;;  %v447_v7 = vld [vmem:[#allocation4 + $0x168] sm:$0xff]  ;;  %3424 = vmatpush1.bf16.msra.mxu0 %v5472_v57  ;;  %319 = vmatprep.mubr.f32.mxu1 %v6664_v1  ;;  %v449_v10 = vld [vmem:[#allocation4 + $0x178] sm:$0xff]  ;;  %v5495_v13 = vpack.c.bf16 %v440_v4, %v436_v3 }
  0x3c   :  { %6907 = vst [vmem:[#allocation28_spill] sm:$0xff] %v5491_v8  ;;  %3456 = vmatpush1.bf16.msra.mxu1 %v5476_v61  ;;  %3347 = vmatmul.mubr.msk.f32.gmra.mrb[8].mxu0 %vm93_vm0, %v63_v0  ;;  %v442_v14 = vld [vmem:[#allocation4 + $0x140] sm:$0xff]  ;;  %v5502_v18 = vpack.c.bf16 %v447_v7, %v443_v6  ;;  %v444_v19 = vld [vmem:[#allocation4 + $0x150] sm:$0xff]  ;;  %v5506_v22 = vpack.c.bf16 %v449_v10, %v445_v9  ;;  %v451_v23 = vld [vmem:[#allocation4 + $0x188] sm:$0xff]  ;;  %v73_v9 = vlaneseq }
  0x3d   :  { %6908 = vst [vmem:[#allocation29_spill] sm:$0xff] %v5495_v13  ;;  %v446_v15 = vld [vmem:[#allocation4 + $0x160] sm:$0xff]  ;;  %3355 = vmatmul.mubr.msk.f32.gmra.mrb[8].mxu1 %vm93_vm0, %v63_v0  ;;  %3426 = vmatprep.subr.bf16.mxu0 %v5483_v2  ;;  %v448_v21 = vld [vmem:[#allocation4 + $0x170] sm:$0xff]  ;;  %v455_v26 = vld [vmem:[#allocation4 + $0x1a8] sm:$0xff] }
  0x3e   :  { %v64_v17 = vld [vmem:[%s6651_s0 + $0x28] sm:$0xff]  ;;  %6909 = vst [vmem:[#allocation30_spill] sm:$0xff] %v5502_v18  ;;  %3458 = vmatprep.subr.bf16.mxu1 %v5487_v5  ;;  %212 = vmatprep.mubr.f32.mxu0 %v6664_v1  ;;  %6910 = vst [vmem:[#allocation31_spill] sm:$0xff] %v5506_v22  ;;  %v5510_v27 = vpack.c.bf16 %v446_v15, %v442_v14  ;;  %v453_v28 = vld [vmem:[#allocation4 + $0x198] sm:$0xff]  ;;  %v5514_v31 = vpack.c.bf16 %v448_v21, %v444_v19  ;;  %v5603_v10 = vshrl.u32 %v73_v9, 7 }
  0x3f   :  { %3428 = vmatpush1.bf16.msra.mxu0 %v5491_v8  ;;  %325 = vmatprep.mubr.f32.mxu1 %v6664_v1  ;;  %v457_v30 = vld [vmem:[#allocation4 + $0x1b8] sm:$0xff]  ;;  %v450_v32 = vld [vmem:[#allocation4 + $0x180] sm:$0xff]  ;;  %v65_v35 = vld [vmem:[%s6651_s0 + $0x30] sm:$0xff]  ;;  %v5521_v36 = vpack.c.bf16 %v455_v26, %v451_v23 }
  0x40   :  { %6911 = vst [vmem:[#allocation32_spill] sm:$0xff] %v5510_v27  ;;  %3460 = vmatpush1.bf16.msra.mxu1 %v5495_v13  ;;  %3348 = vmatmul.mubr.msk.f32.gmra.mrb[10].mxu0 %vm93_vm0, %v64_v17  ;;  %6912 = vst [vmem:[#allocation33_spill] sm:$0xff] %v5514_v31  ;;  %v454_v34 = vld [vmem:[#allocation4 + $0x1a0] sm:$0xff]  ;;  %v452_v39 = vld [vmem:[#allocation4 + $0x190] sm:$0xff]  ;;  %v5525_v41 = vpack.c.bf16 %v457_v30, %v453_v28  ;;  %v6663_v14 = vsub.s32 0, %v5603_v10  ;;  %v6661_v26 = vsub.s32 3, %v5603_v10 }
  0x41   :  { %3356 = vmatmul.mubr.msk.f32.gmra.mrb[10].mxu1 %vm93_vm0, %v64_v17  ;;  %3430 = vmatprep.subr.bf16.mxu0 %v5502_v18  ;;  %6913 = vst [vmem:[#allocation34_spill] sm:$0xff] %v5521_v36  ;;  %v456_v40 = vld [vmem:[#allocation4 + $0x1b0] sm:$0xff]  ;;  %v459_v43 = vld [vmem:[#allocation4 + $0x1c8] sm:$0xff]  ;;  %v5529_v45 = vpack.c.bf16 %v454_v34, %v450_v32  ;;  %v461_v47 = vld [vmem:[#allocation4 + $0x1d8] sm:$0xff]  ;;  %v6662_v17 = vsub.s32 1, %v5603_v10 }
  0x42   :  { %3462 = vmatprep.subr.bf16.mxu1 %v5506_v22  ;;  %218 = vmatprep.mubr.f32.mxu0 %v6664_v1  ;;  %6914 = vst [vmem:[#allocation35_spill] sm:$0xff] %v5525_v41  ;;  %v463_v44 = vld [vmem:[#allocation4 + $0x1e8] sm:$0xff]  ;;  %v465_v48 = vld [vmem:[#allocation4 + $0x1f8] sm:$0xff]  ;;  %v5533_v49 = vpack.c.bf16 %v456_v40, %v452_v39  ;;  %v458_v51 = vld [vmem:[#allocation4 + $0x1c0] sm:$0xff] }
  0x43   :  { %3432 = vmatpush1.bf16.msra.mxu0 %v5510_v27  ;;  %331 = vmatprep.mubr.f32.mxu1 %v6664_v1  ;;  %6915 = vst [vmem:[#allocation36_spill] sm:$0xff] %v5529_v45  ;;  %v462_v52 = vld [vmem:[#allocation4 + $0x1e0] sm:$0xff]  ;;  %v66_v53 = vld [vmem:[%s6651_s0 + $0x38] sm:$0xff]  ;;  %v5540_v55 = vpack.c.bf16 %v463_v44, %v459_v43  ;;  %v5544_v59 = vpack.c.bf16 %v465_v48, %v461_v47  ;;  %v812_v63 = vld [vmem:[#allocation6 + $0x8] sm:$0xff]  ;;  %v6660_v44 = vsub.s32 2, %v5603_v10 }
  0x44   :  { %3464 = vmatpush1.bf16.msra.mxu1 %v5514_v31  ;;  %3349 = vmatmul.mubr.msk.f32.gmra.mrb[12].mxu0 %vm93_vm0, %v65_v35  ;;  %6916 = vst [vmem:[#allocation37_spill] sm:$0xff] %v5533_v49  ;;  %v460_v56 = vld [vmem:[#allocation4 + $0x1d0] sm:$0xff]  ;;  %v5548_v60 = vpack.c.bf16 %v462_v52, %v458_v51  ;;  %v816_v0 = vld [vmem:[#allocation6 + $0x28] sm:$0xff]  ;;  %v814_v3 = vld [vmem:[#allocation6 + $0x18] sm:$0xff] }
  0x45   :  { %3357 = vmatmul.mubr.msk.f32.gmra.mrb[12].mxu1 %vm93_vm0, %v65_v35  ;;  %3434 = vmatprep.subr.bf16.mxu0 %v5521_v36  ;;  %6917 = vst [vmem:[#allocation38_spill] sm:$0xff] %v5540_v55  ;;  %v464_v58 = vld [vmem:[#allocation4 + $0x1f0] sm:$0xff]  ;;  %6918 = vst [vmem:[#allocation39_spill] sm:$0xff] %v5544_v59  ;;  %v5597_v4 = vpack.c.bf16 %v816_v0, %v812_v63  ;;  %v818_v6 = vld [vmem:[#allocation6 + $0x38] sm:$0xff] }
  0x46   :  { %3466 = vmatprep.subr.bf16.mxu1 %v5525_v41  ;;  %224 = vmatprep.mubr.f32.mxu0 %v6664_v1  ;;  %6919 = vst [vmem:[#allocation40_spill] sm:$0xff] %v5548_v60  ;;  %v5552_v62 = vpack.c.bf16 %v464_v58, %v460_v56  ;;  %v5599_v7 = vpack.c.bf16 %v818_v6, %v814_v3  ;;  %6923 = vst [vmem:[#allocation44_spill] sm:$0xff] %v5603_v10  ;;  %v71_v15 = vld [vmem:[%s6654_s3] sm:$0xf] }
  0x47   :  { %3436 = vmatpush1.bf16.msra.mxu0 %v5529_v45  ;;  %337 = vmatprep.mubr.f32.mxu1 %v6664_v1  ;;  %6921 = vst [vmem:[#allocation42_spill] sm:$0xff] %v5597_v4  ;;  %v5612_v19 = vrot.slane %v71_v15, %v6663_v14  ;;  %v5616_v21 = vrot.slane %v71_v15, %v6662_v17  ;;  %v830_v17 = vld [vmem:[#allocation6 + $0x98] sm:$0xff] }
  0x48   :  { %3468 = vmatpush1.bf16.msra.mxu1 %v5533_v49  ;;  %3350 = vmatmul.mubr.msk.f32.gmra.mrb[14].mxu0 %vm93_vm0, %v66_v53  ;;  %6920 = vst [vmem:[#allocation41_spill] sm:$0xff] %v5552_v62  ;;  %6922 = vst [vmem:[#allocation43_spill] sm:$0xff] %v5599_v7  ;;  %v5623_v43 = vrot.slane %v71_v15, %v6661_v26  ;;  %v5629_v48 = vrot.slane %v71_v15, %v6660_v44  ;;  %v828_v44 = vld [vmem:[#allocation6 + $0x88] sm:$0xff]  ;;  %v834_v14 = vld [vmem:[#allocation6 + $0xb8] sm:$0xff] }
  0x49   :  { %3358 = vmatmul.mubr.msk.f32.gmra.mrb[14].mxu1 %vm93_vm0, %v66_v53  ;;  %3438 = vmatprep.subr.bf16.mxu0 %v5540_v55  ;;  %6924 = vst [vmem:[#allocation45_spill] sm:$0xff] %v5612_v19  ;;  %6925 = vst [vmem:[#allocation46_spill] sm:$0xff] %v5616_v21  ;;  %v832_v26 = vld [vmem:[#allocation6 + $0xa8] sm:$0xff]  ;;  %v842_v10 = vld [vmem:[#allocation6 + $0xf8] sm:$0xff] }
  0x4a   :  { %3470 = vmatprep.subr.bf16.mxu1 %v5544_v59  ;;  %530 = vmatprep.mubr.f32.mxu0 %v6664_v1  ;;  %6926 = vst [vmem:[#allocation47_spill] sm:$0xff] %v5623_v43  ;;  %6927 = vst [vmem:[#allocation48_spill] sm:$0xff] %v5629_v48 }
  0x4b   :  { %3440 = vmatpush1.bf16.msra.mxu0 %v5548_v60  ;;  %601 = vmatprep.mubr.f32.mxu1 %v6664_v1 }
  0x4c   :  { %3472 = vmatpush1.bf16.msra.mxu1 %v5552_v62  ;;  %3474 = vmatprep.subr.bf16.mxu0 %v5414_v11 }
  0x4d   :  { %3506 = vmatprep.subr.bf16.mxu1 %v5416_v12 }
  0x4e   :  { %531 = vmatmul.mubr.f32.vlgmr.msra.gmra.mrb[0].mxu0 %v6664_v1 }
  0x4f   :  { %602 = vmatmul.mubr.f32.vlgmr.msra.gmra.mrb[0].mxu1 %v6664_v1  ;;  %3476 = vmatpush1.bf16.msra.mxu0 %v5418_v16 }
  0x50   :  { %3508 = vmatpush1.bf16.msra.mxu1 %v5427_v20  ;;  %3478 = vmatprep.subr.bf16.mxu0 %v5430_v24 }
  0x51   :  { %3510 = vmatprep.subr.bf16.mxu1 %v5432_v25  ;;  %705 = vmatprep.mubr.f32.mxu0 %v6664_v1 }
  0x52   :  { %776 = vmatprep.mubr.f32.mxu1 %v6664_v1  ;;  %v838_v1 = vld [vmem:[#allocation6 + $0xd8] sm:$0xff] }
  0x53   :  { %3480 = vmatpush1.bf16.msra.mxu0 %v5436_v29 }
  0x54   :  { %3512 = vmatpush1.bf16.msra.mxu1 %v5443_v33  ;;  %3482 = vmatprep.subr.bf16.mxu0 %v5447_v37 }
  0x55   :  { %3514 = vmatprep.subr.bf16.mxu1 %v5449_v38 }
  0x57   :  { %3484 = vmatpush1.bf16.msra.mxu0 %v5453_v42 }
  0x58   :  { %3516 = vmatpush1.bf16.msra.mxu1 %v5460_v46  ;;  %3486 = vmatprep.subr.bf16.mxu0 %v5464_v50 }
  0x59   :  { %3518 = vmatprep.subr.bf16.mxu1 %v5468_v54 }
  0x5b   :  { %3488 = vmatpush1.bf16.msra.mxu0 %v5472_v57 }
  0x5c   :  { %3520 = vmatpush1.bf16.msra.mxu1 %v5476_v61  ;;  %3490 = vmatprep.subr.bf16.mxu0 %v5483_v2 }
  0x5d   :  { %3522 = vmatprep.subr.bf16.mxu1 %v5487_v5 }
  0x5f   :  { %3492 = vmatpush1.bf16.msra.mxu0 %v5491_v8 }
  0x60   :  { %3524 = vmatpush1.bf16.msra.mxu1 %v5495_v13  ;;  %3494 = vmatprep.subr.bf16.mxu0 %v5502_v18 }
  0x61   :  { %3526 = vmatprep.subr.bf16.mxu1 %v5506_v22 }
  0x63   :  { %3496 = vmatpush1.bf16.msra.mxu0 %v5510_v27 }
  0x64   :  { %3528 = vmatpush1.bf16.msra.mxu1 %v5514_v31  ;;  %3498 = vmatprep.subr.bf16.mxu0 %v5521_v36 }
  0x65   :  { %3530 = vmatprep.subr.bf16.mxu1 %v5525_v41 }
  0x67   :  { %3500 = vmatpush1.bf16.msra.mxu0 %v5529_v45 }
  0x68   :  { %3532 = vmatpush1.bf16.msra.mxu1 %v5533_v49  ;;  %3502 = vmatprep.subr.bf16.mxu0 %v5540_v55 }
  0x69   :  { %3534 = vmatprep.subr.bf16.mxu1 %v5544_v59 }
  0x6b   :  { %3504 = vmatpush1.bf16.msra.mxu0 %v5548_v60 }
  0x6c   :  { %3536 = vmatpush1.bf16.msra.mxu1 %v5552_v62  ;;  %3538 = vmatprep.subr.bf16.mxu0 %v5597_v4 }
  0x6d   :  { %3602 = vmatprep.subr.bf16.mxu1 %v5599_v7 }
 0x121   :  { %v532_v23 = vpop.f32.mrb[0].mxu0 }
 0x122   :  { %v4945_v28 = vadd.f32 %v532_v23, %v5612_v19  ;;  %v603_v30 = vpop.f32.mrb[0].mxu1  ;;  %v534_v32 = vpop.f32.mrb[1].mxu0 }
 0x123   :  { %v4946_v34 = vadd.f32 %v534_v32, %v5616_v21  ;;  %v605_v35 = vpop.f32.mrb[1].mxu1  ;;  %v4961_v52 = vadd.f32 %v603_v30, %v5629_v48  ;;  %v811_v30 = vld [vmem:[#allocation6] sm:$0xff] }
 0x124   :  { %v3359_v39 = vmul.f32 -1.442695, %v4945_v28  ;;  %v4962_v47 = vadd.f32 %v605_v35, %v5623_v43  ;;  %v813_v35 = vld [vmem:[#allocation6 + $0x10] sm:$0xff] }
 0x125   :  { %v3360_v40 = vmul.f32 -1.442695, %v4946_v34  ;;  %v815_v34 = vld [vmem:[#allocation6 + $0x20] sm:$0xff] }
 0x126   :  { %5014 = vpow2.f32 %v3359_v39  ;;  %v3361_v51 = vmul.f32 -1.442695, %v4962_v47  ;;  %v817_v39 = vld [vmem:[#allocation6 + $0x30] sm:$0xff]  ;;  %v824_v47 = vld [vmem:[#allocation6 + $0x68] sm:$0xff] }
 0x127   :  { %5016 = vpow2.f32 %v3360_v40  ;;  %v820_v40 = vld [vmem:[#allocation6 + $0x48] sm:$0xff] }
 0x128   :  { %5018 = vpow2.f32 %v3361_v51  ;;  %v822_v51 = vld [vmem:[#allocation6 + $0x58] sm:$0xff] }
 0x129   :  { %5020 = vtanh.f32 %v4961_v52  ;;  %v826_v52 = vld [vmem:[#allocation6 + $0x78] sm:$0xff] }
 0x130   :  { %v5015_v53 = vpop.eup %5014 }
 0x131   :  { %v5017_v56 = vpop.eup %5016  ;;  %v615_v58 = vadd.f32 1.0, %v5015_v53 }
 0x132   :  { %v621_v63 = vadd.f32 1.0, %v5017_v56  ;;  %v5019_v0 = vpop.eup %5018 }
 0x133   :  { %5022 = vrcp.f32 %v615_v58  ;;  %v5021_v3 = vpop.eup %5020  ;;  %v628_v28 = vadd.f32 1.0, %v5019_v0  ;;  %v5635_v58 = vpack.c.bf16 %v815_v34, %v811_v30  ;;  %v819_v0 = vld [vmem:[#allocation6 + $0x40] sm:$0xff] }
 0x134   :  { %5024 = vrcp.f32 %v621_v63  ;;  %v5637_v63 = vpack.c.bf16 %v817_v39, %v813_v35  ;;  %v827_v35 = vld [vmem:[#allocation6 + $0x80] sm:$0xff] }
 0x135   :  { %5026 = vrcp.f32 %v628_v28  ;;  %6928 = vst [vmem:[#allocation49_spill] sm:$0xff] %v5635_v58  ;;  %v821_v28 = vld [vmem:[#allocation6 + $0x50] sm:$0xff]  ;;  %v831_v39 = vld [vmem:[#allocation6 + $0xa0] sm:$0xff] }
 0x136   :  { %6929 = vst [vmem:[#allocation50_spill] sm:$0xff] %v5637_v63 }
 0x13d   :  { %v5023_v6 = vpop.eup %5022 }
 0x13e   :  { %v5025_v9 = vpop.eup %5024  ;;  %v632_v23 = vmul.f32 %v5023_v6, %v5021_v3  ;;  %v823_v3 = vld [vmem:[#allocation6 + $0x60] sm:$0xff] }
 0x13f   :  { %v631_v32 = vmul.f32 0.0, %v5025_v9  ;;  %v5027_v53 = vpop.eup %5026  ;;  %v5641_v9 = vpack.c.bf16 %v824_v47, %v820_v40  ;;  %v5649_v30 = vpack.c.bf16 %v823_v3, %v819_v0  ;;  %v5655_v40 = vpack.c.bf16 %v832_v26, %v828_v44 }
 0x140   :  { %v5657_v47 = vpack.c.bf16 %v834_v14, %v830_v17  ;;  %v6936_v0 = vmov 0.0   ;;  %v5663_v3 = vpack.c.bf16 %v831_v39, %v827_v35  ;;  %v835_v14 = vld [vmem:[#allocation6 + $0xc0] sm:$0xff] }
 0x141   :  { %v5632_v15 = vadd.f32 %v632_v23, %v631_v32  ;;  %6930 = vst [vmem:[#allocation51_spill] sm:$0xff] %v5641_v9  ;;  %v5643_v23 = vpack.c.bf16 %v826_v52, %v822_v51  ;;  %v825_v32 = vld [vmem:[#allocation6 + $0x70] sm:$0xff]  ;;  %6932 = vst [vmem:[#allocation53_spill] sm:$0xff] %v5649_v30  ;;  %v839_v17 = vld [vmem:[#allocation6 + $0xe0] sm:$0xff] }
 0x142   :  { %v5651_v34 = vpack.c.bf16 %v825_v32, %v821_v28  ;;  %6934 = vst [vmem:[#allocation55_spill] sm:$0xff] %v5655_v40  ;;  %6935 = vst [vmem:[#allocation56_spill] sm:$0xff] %v5657_v47  ;;  %v829_v51 = vld [vmem:[#allocation6 + $0x90] sm:$0xff]  ;;  %v5671_v28 = vpack.c.bf16 %v842_v10, %v838_v1  ;;  %v5675_v35 = vpack.c.bf16 %v839_v17, %v835_v14  ;;  %v851_v17 = vld [vmem:[#allocation6 + $0x140] sm:$0xff] }
 0x143   :  { %5028 = vtanh.f32 %v5632_v15  ;;  %6931 = vst [vmem:[#allocation52_spill] sm:$0xff] %v5643_v23  ;;  %v833_v52 = vld [vmem:[#allocation6 + $0xb0] sm:$0xff]  ;;  %6937 = vst [vmem:[#allocation57_spill] sm:$0xff] %v5663_v3 }
 0x144   :  { %6933 = vst [vmem:[#allocation54_spill] sm:$0xff] %v5651_v34  ;;  %v5665_v26 = vpack.c.bf16 %v833_v52, %v829_v51  ;;  %6940 = vst [vmem:[#allocation60_spill] sm:$0xff] %v5671_v28  ;;  %v837_v32 = vld [vmem:[#allocation6 + $0xd0] sm:$0xff]  ;;  %v843_v51 = vld [vmem:[#allocation6 + $0x100] sm:$0xff] }
 0x145   :  { %6941 = vst [vmem:[#allocation61_spill] sm:$0xff] %v5675_v35  ;;  %v847_v52 = vld [vmem:[#allocation6 + $0x120] sm:$0xff] }
 0x146   :  { %6938 = vst [vmem:[#allocation58_spill] sm:$0xff] %v5665_v26 }
 0x14d   :  { %v5029_v56 = vpop.eup %5028 }
 0x14e   :  { %v5639_v6 = vmul.f32 %v5029_v56, %v5027_v53  ;;  %v836_v53 = vld [vmem:[#allocation6 + $0xc8] sm:$0xff] }
 0x14f   :  { %v840_v56 = vld [vmem:[#allocation6 + $0xe8] sm:$0xff] }
 0x150   :  { %706 = vmatmul.mubr.f32.vlgmr.msra.gmra.mrb[2].mxu0 %v5639_v6  ;;  %777 = vmatmul.mubr.f32.vlgmr.msra.gmra.mrb[2].mxu1 %v5639_v6  ;;  %v5669_v44 = vpack.c.bf16 %v840_v56, %v836_v53  ;;  %v845_v53 = vld [vmem:[#allocation6 + $0x110] sm:$0xff] }
 0x151   :  { %3540 = vmatpush1.bf16.msra.mxu0 %v5635_v58  ;;  %3604 = vmatpush1.bf16.msra.mxu1 %v5637_v63  ;;  %v846_v63 = vld [vmem:[#allocation6 + $0x118] sm:$0xff]  ;;  %v849_v56 = vld [vmem:[#allocation6 + $0x130] sm:$0xff] }
 0x152   :  { %3542 = vmatprep.subr.bf16.mxu0 %v5641_v9  ;;  %3606 = vmatprep.subr.bf16.mxu1 %v5643_v23  ;;  %6939 = vst [vmem:[#allocation59_spill] sm:$0xff] %v5669_v44  ;;  %v841_v23 = vld [vmem:[#allocation6 + $0xf0] sm:$0xff]  ;;  %v844_v9 = vld [vmem:[#allocation6 + $0x108] sm:$0xff]  ;;  %v5689_v14 = vpack.c.bf16 %v849_v56, %v845_v53  ;;  %v859_v53 = vld [vmem:[#allocation6 + $0x180] sm:$0xff] }
 0x153   :  { %1003 = vmatprep.mubr.f32.mxu0 %v6936_v0  ;;  %1074 = vmatprep.mubr.f32.mxu1 %v6936_v0  ;;  %v5677_v39 = vpack.c.bf16 %v841_v23, %v837_v32  ;;  %v5687_v23 = vpack.c.bf16 %v847_v52, %v843_v51  ;;  %v855_v32 = vld [vmem:[#allocation6 + $0x160] sm:$0xff] }
 0x154   :  { %6946 = vst [vmem:[#allocation66_spill] sm:$0xff] %v5689_v14  ;;  %v5699_v51 = vpack.c.bf16 %v855_v32, %v851_v17  ;;  %v863_v56 = vld [vmem:[#allocation6 + $0x1a0] sm:$0xff] }
 0x155   :  { %3544 = vmatpush1.bf16.msra.mxu0 %v5649_v30  ;;  %3608 = vmatpush1.bf16.msra.mxu1 %v5651_v34  ;;  %v848_v30 = vld [vmem:[#allocation6 + $0x128] sm:$0xff]  ;;  %v850_v34 = vld [vmem:[#allocation6 + $0x138] sm:$0xff]  ;;  %6942 = vst [vmem:[#allocation62_spill] sm:$0xff] %v5677_v39  ;;  %6945 = vst [vmem:[#allocation65_spill] sm:$0xff] %v5687_v23  ;;  %v5711_v17 = vpack.c.bf16 %v863_v56, %v859_v53 }
 0x156   :  { %3546 = vmatprep.subr.bf16.mxu0 %v5655_v40  ;;  %3610 = vmatprep.subr.bf16.mxu1 %v5657_v47  ;;  %v5681_v1 = vpack.c.bf16 %v848_v30, %v844_v9  ;;  %v5683_v10 = vpack.c.bf16 %v850_v34, %v846_v63  ;;  %v852_v47 = vld [vmem:[#allocation6 + $0x148] sm:$0xff]  ;;  %v854_v40 = vld [vmem:[#allocation6 + $0x158] sm:$0xff]  ;;  %v853_v30 = vld [vmem:[#allocation6 + $0x150] sm:$0xff]  ;;  %6949 = vst [vmem:[#allocation69_spill] sm:$0xff] %v5699_v51 }
 0x157   :  { %v857_v34 = vld [vmem:[#allocation6 + $0x170] sm:$0xff]  ;;  %6953 = vst [vmem:[#allocation73_spill] sm:$0xff] %v5711_v17 }
 0x158   :  { %6943 = vst [vmem:[#allocation63_spill] sm:$0xff] %v5681_v1  ;;  %6944 = vst [vmem:[#allocation64_spill] sm:$0xff] %v5683_v10  ;;  %v5701_v52 = vpack.c.bf16 %v857_v34, %v853_v30  ;;  %v867_v30 = vld [vmem:[#allocation6 + $0x1c0] sm:$0xff] }
 0x159   :  { %3548 = vmatpush1.bf16.msra.mxu0 %v5663_v3  ;;  %3612 = vmatpush1.bf16.msra.mxu1 %v5665_v26  ;;  %v856_v3 = vld [vmem:[#allocation6 + $0x168] sm:$0xff]  ;;  %v858_v26 = vld [vmem:[#allocation6 + $0x178] sm:$0xff]  ;;  %v871_v34 = vld [vmem:[#allocation6 + $0x1e0] sm:$0xff] }
 0x15a   :  { %3550 = vmatprep.subr.bf16.mxu0 %v5669_v44  ;;  %3614 = vmatprep.subr.bf16.mxu1 %v5671_v28  ;;  %v5693_v63 = vpack.c.bf16 %v856_v3, %v852_v47  ;;  %v5695_v9 = vpack.c.bf16 %v858_v26, %v854_v40  ;;  %v860_v28 = vld [vmem:[#allocation6 + $0x188] sm:$0xff]  ;;  %v862_v44 = vld [vmem:[#allocation6 + $0x198] sm:$0xff]  ;;  %6950 = vst [vmem:[#allocation70_spill] sm:$0xff] %v5701_v52  ;;  %v861_v3 = vld [vmem:[#allocation6 + $0x190] sm:$0xff] }
 0x15b   :  { %v865_v26 = vld [vmem:[#allocation6 + $0x1b0] sm:$0xff]  ;;  %v5723_v53 = vpack.c.bf16 %v871_v34, %v867_v30 }
 0x15c   :  { %6947 = vst [vmem:[#allocation67_spill] sm:$0xff] %v5693_v63  ;;  %6948 = vst [vmem:[#allocation68_spill] sm:$0xff] %v5695_v9  ;;  %v5713_v32 = vpack.c.bf16 %v865_v26, %v861_v3  ;;  %v875_v3 = vld [vmem:[#allocation6 + $0x200] sm:$0xff] }
 0x15d   :  { %3552 = vmatpush1.bf16.msra.mxu0 %v5675_v35  ;;  %3616 = vmatpush1.bf16.msra.mxu1 %v5677_v39  ;;  %v864_v35 = vld [vmem:[#allocation6 + $0x1a8] sm:$0xff]  ;;  %v866_v39 = vld [vmem:[#allocation6 + $0x1b8] sm:$0xff]  ;;  %6957 = vst [vmem:[#allocation77_spill] sm:$0xff] %v5723_v53  ;;  %v879_v26 = vld [vmem:[#allocation6 + $0x220] sm:$0xff] }
 0x15e   :  { %3554 = vmatprep.subr.bf16.mxu0 %v5681_v1  ;;  %3618 = vmatprep.subr.bf16.mxu1 %v5683_v10  ;;  %v5705_v40 = vpack.c.bf16 %v864_v35, %v860_v28  ;;  %v5707_v47 = vpack.c.bf16 %v866_v39, %v862_v44  ;;  %v868_v10 = vld [vmem:[#allocation6 + $0x1c8] sm:$0xff]  ;;  %v870_v1 = vld [vmem:[#allocation6 + $0x1d8] sm:$0xff]  ;;  %6954 = vst [vmem:[#allocation74_spill] sm:$0xff] %v5713_v32  ;;  %v869_v35 = vld [vmem:[#allocation6 + $0x1d0] sm:$0xff] }
 0x15f   :  { %v873_v39 = vld [vmem:[#allocation6 + $0x1f0] sm:$0xff]  ;;  %v5735_v30 = vpack.c.bf16 %v879_v26, %v875_v3 }
 0x160   :  { %6951 = vst [vmem:[#allocation71_spill] sm:$0xff] %v5705_v40  ;;  %6952 = vst [vmem:[#allocation72_spill] sm:$0xff] %v5707_v47  ;;  %v5725_v56 = vpack.c.bf16 %v873_v39, %v869_v35  ;;  %v883_v35 = vld [vmem:[#allocation6 + $0x240] sm:$0xff] }
 0x161   :  { %3556 = vmatpush1.bf16.msra.mxu0 %v5687_v23  ;;  %3620 = vmatpush1.bf16.msra.mxu1 %v5689_v14  ;;  %v872_v23 = vld [vmem:[#allocation6 + $0x1e8] sm:$0xff]  ;;  %v874_v14 = vld [vmem:[#allocation6 + $0x1f8] sm:$0xff]  ;;  %6961 = vst [vmem:[#allocation81_spill] sm:$0xff] %v5735_v30  ;;  %v887_v39 = vld [vmem:[#allocation6 + $0x260] sm:$0xff] }
 0x162   :  { %3558 = vmatprep.subr.bf16.mxu0 %v5693_v63  ;;  %3622 = vmatprep.subr.bf16.mxu1 %v5695_v9  ;;  %v5717_v44 = vpack.c.bf16 %v872_v23, %v868_v10  ;;  %v5719_v28 = vpack.c.bf16 %v874_v14, %v870_v1  ;;  %v876_v9 = vld [vmem:[#allocation6 + $0x208] sm:$0xff]  ;;  %v878_v63 = vld [vmem:[#allocation6 + $0x218] sm:$0xff]  ;;  %6958 = vst [vmem:[#allocation78_spill] sm:$0xff] %v5725_v56  ;;  %v877_v23 = vld [vmem:[#allocation6 + $0x210] sm:$0xff] }
 0x163   :  { %v881_v14 = vld [vmem:[#allocation6 + $0x230] sm:$0xff]  ;;  %v5747_v3 = vpack.c.bf16 %v887_v39, %v883_v35 }
 0x164   :  { %6955 = vst [vmem:[#allocation75_spill] sm:$0xff] %v5717_v44  ;;  %6956 = vst [vmem:[#allocation76_spill] sm:$0xff] %v5719_v28  ;;  %v5737_v34 = vpack.c.bf16 %v881_v14, %v877_v23  ;;  %v891_v23 = vld [vmem:[#allocation6 + $0x280] sm:$0xff] }
 0x165   :  { %3560 = vmatpush1.bf16.msra.mxu0 %v5699_v51  ;;  %3624 = vmatpush1.bf16.msra.mxu1 %v5701_v52  ;;  %v880_v51 = vld [vmem:[#allocation6 + $0x228] sm:$0xff]  ;;  %v882_v52 = vld [vmem:[#allocation6 + $0x238] sm:$0xff]  ;;  %6965 = vst [vmem:[#allocation85_spill] sm:$0xff] %v5747_v3  ;;  %v895_v14 = vld [vmem:[#allocation6 + $0x2a0] sm:$0xff] }
 0x166   :  { %3562 = vmatprep.subr.bf16.mxu0 %v5705_v40  ;;  %3626 = vmatprep.subr.bf16.mxu1 %v5707_v47  ;;  %v5729_v1 = vpack.c.bf16 %v880_v51, %v876_v9  ;;  %v5731_v10 = vpack.c.bf16 %v882_v52, %v878_v63  ;;  %v884_v47 = vld [vmem:[#allocation6 + $0x248] sm:$0xff]  ;;  %v886_v40 = vld [vmem:[#allocation6 + $0x258] sm:$0xff]  ;;  %6962 = vst [vmem:[#allocation82_spill] sm:$0xff] %v5737_v34  ;;  %v885_v51 = vld [vmem:[#allocation6 + $0x250] sm:$0xff] }
 0x167   :  { %v889_v52 = vld [vmem:[#allocation6 + $0x270] sm:$0xff]  ;;  %v5759_v35 = vpack.c.bf16 %v895_v14, %v891_v23 }
 0x168   :  { %6959 = vst [vmem:[#allocation79_spill] sm:$0xff] %v5729_v1  ;;  %6960 = vst [vmem:[#allocation80_spill] sm:$0xff] %v5731_v10  ;;  %v5749_v26 = vpack.c.bf16 %v889_v52, %v885_v51  ;;  %v899_v51 = vld [vmem:[#allocation6 + $0x2c0] sm:$0xff] }
 0x169   :  { %3564 = vmatpush1.bf16.msra.mxu0 %v5711_v17  ;;  %3628 = vmatpush1.bf16.msra.mxu1 %v5713_v32  ;;  %v888_v17 = vld [vmem:[#allocation6 + $0x268] sm:$0xff]  ;;  %v890_v32 = vld [vmem:[#allocation6 + $0x278] sm:$0xff]  ;;  %6969 = vst [vmem:[#allocation89_spill] sm:$0xff] %v5759_v35  ;;  %v903_v52 = vld [vmem:[#allocation6 + $0x2e0] sm:$0xff] }
 0x16a   :  { %3566 = vmatprep.subr.bf16.mxu0 %v5717_v44  ;;  %3630 = vmatprep.subr.bf16.mxu1 %v5719_v28  ;;  %v5741_v63 = vpack.c.bf16 %v888_v17, %v884_v47  ;;  %v5743_v9 = vpack.c.bf16 %v890_v32, %v886_v40  ;;  %v892_v28 = vld [vmem:[#allocation6 + $0x288] sm:$0xff]  ;;  %v894_v44 = vld [vmem:[#allocation6 + $0x298] sm:$0xff]  ;;  %6966 = vst [vmem:[#allocation86_spill] sm:$0xff] %v5749_v26  ;;  %v893_v17 = vld [vmem:[#allocation6 + $0x290] sm:$0xff] }
 0x16b   :  { %v897_v32 = vld [vmem:[#allocation6 + $0x2b0] sm:$0xff]  ;;  %v5771_v23 = vpack.c.bf16 %v903_v52, %v899_v51 }
 0x16c   :  { %6963 = vst [vmem:[#allocation83_spill] sm:$0xff] %v5741_v63  ;;  %6964 = vst [vmem:[#allocation84_spill] sm:$0xff] %v5743_v9  ;;  %v5761_v39 = vpack.c.bf16 %v897_v32, %v893_v17  ;;  %v907_v17 = vld [vmem:[#allocation6 + $0x300] sm:$0xff] }
 0x16d   :  { %3568 = vmatpush1.bf16.msra.mxu0 %v5723_v53  ;;  %3632 = vmatpush1.bf16.msra.mxu1 %v5725_v56  ;;  %v896_v53 = vld [vmem:[#allocation6 + $0x2a8] sm:$0xff]  ;;  %v898_v56 = vld [vmem:[#allocation6 + $0x2b8] sm:$0xff]  ;;  %6973 = vst [vmem:[#allocation93_spill] sm:$0xff] %v5771_v23  ;;  %v911_v32 = vld [vmem:[#allocation6 + $0x320] sm:$0xff] }
 0x16e   :  { %3570 = vmatprep.subr.bf16.mxu0 %v5729_v1  ;;  %3634 = vmatprep.subr.bf16.mxu1 %v5731_v10  ;;  %v5753_v40 = vpack.c.bf16 %v896_v53, %v892_v28  ;;  %v5755_v47 = vpack.c.bf16 %v898_v56, %v894_v44  ;;  %v900_v10 = vld [vmem:[#allocation6 + $0x2c8] sm:$0xff]  ;;  %v902_v1 = vld [vmem:[#allocation6 + $0x2d8] sm:$0xff]  ;;  %6970 = vst [vmem:[#allocation90_spill] sm:$0xff] %v5761_v39  ;;  %v901_v53 = vld [vmem:[#allocation6 + $0x2d0] sm:$0xff] }
 0x16f   :  { %v905_v56 = vld [vmem:[#allocation6 + $0x2f0] sm:$0xff]  ;;  %v5783_v51 = vpack.c.bf16 %v911_v32, %v907_v17 }
 0x170   :  { %6967 = vst [vmem:[#allocation87_spill] sm:$0xff] %v5753_v40  ;;  %6968 = vst [vmem:[#allocation88_spill] sm:$0xff] %v5755_v47  ;;  %v5773_v14 = vpack.c.bf16 %v905_v56, %v901_v53  ;;  %v915_v53 = vld [vmem:[#allocation6 + $0x340] sm:$0xff] }
 0x171   :  { %3572 = vmatpush1.bf16.msra.mxu0 %v5735_v30  ;;  %3636 = vmatpush1.bf16.msra.mxu1 %v5737_v34  ;;  %v904_v30 = vld [vmem:[#allocation6 + $0x2e8] sm:$0xff]  ;;  %v906_v34 = vld [vmem:[#allocation6 + $0x2f8] sm:$0xff]  ;;  %6977 = vst [vmem:[#allocation97_spill] sm:$0xff] %v5783_v51  ;;  %v919_v56 = vld [vmem:[#allocation6 + $0x360] sm:$0xff] }
 0x172   :  { %3574 = vmatprep.subr.bf16.mxu0 %v5741_v63  ;;  %3638 = vmatprep.subr.bf16.mxu1 %v5743_v9  ;;  %v5765_v44 = vpack.c.bf16 %v904_v30, %v900_v10  ;;  %v5767_v28 = vpack.c.bf16 %v906_v34, %v902_v1  ;;  %v908_v9 = vld [vmem:[#allocation6 + $0x308] sm:$0xff]  ;;  %v910_v63 = vld [vmem:[#allocation6 + $0x318] sm:$0xff]  ;;  %6974 = vst [vmem:[#allocation94_spill] sm:$0xff] %v5773_v14  ;;  %v909_v30 = vld [vmem:[#allocation6 + $0x310] sm:$0xff] }
 0x173   :  { %v913_v34 = vld [vmem:[#allocation6 + $0x330] sm:$0xff]  ;;  %v5795_v17 = vpack.c.bf16 %v919_v56, %v915_v53 }
 0x174   :  { %6971 = vst [vmem:[#allocation91_spill] sm:$0xff] %v5765_v44  ;;  %6972 = vst [vmem:[#allocation92_spill] sm:$0xff] %v5767_v28  ;;  %v5785_v52 = vpack.c.bf16 %v913_v34, %v909_v30  ;;  %v923_v30 = vld [vmem:[#allocation6 + $0x380] sm:$0xff] }
 0x175   :  { %3576 = vmatpush1.bf16.msra.mxu0 %v5747_v3  ;;  %3640 = vmatpush1.bf16.msra.mxu1 %v5749_v26  ;;  %v912_v3 = vld [vmem:[#allocation6 + $0x328] sm:$0xff]  ;;  %v914_v26 = vld [vmem:[#allocation6 + $0x338] sm:$0xff]  ;;  %v927_v34 = vld [vmem:[#allocation6 + $0x3a0] sm:$0xff] }
 0x176   :  { %3578 = vmatprep.subr.bf16.mxu0 %v5753_v40  ;;  %3642 = vmatprep.subr.bf16.mxu1 %v5755_v47  ;;  %v5777_v1 = vpack.c.bf16 %v912_v3, %v908_v9  ;;  %v5779_v10 = vpack.c.bf16 %v914_v26, %v910_v63  ;;  %v916_v47 = vld [vmem:[#allocation6 + $0x348] sm:$0xff]  ;;  %v918_v40 = vld [vmem:[#allocation6 + $0x358] sm:$0xff]  ;;  %6978 = vst [vmem:[#allocation98_spill] sm:$0xff] %v5785_v52  ;;  %v917_v3 = vld [vmem:[#allocation6 + $0x350] sm:$0xff] }
 0x177   :  { %v921_v26 = vld [vmem:[#allocation6 + $0x370] sm:$0xff]  ;;  %v5807_v53 = vpack.c.bf16 %v927_v34, %v923_v30 }
 0x178   :  { %6975 = vst [vmem:[#allocation95_spill] sm:$0xff] %v5777_v1  ;;  %6976 = vst [vmem:[#allocation96_spill] sm:$0xff] %v5779_v10  ;;  %v5797_v32 = vpack.c.bf16 %v921_v26, %v917_v3  ;;  %v931_v3 = vld [vmem:[#allocation6 + $0x3c0] sm:$0xff]  ;;  %v937_v26 = vld [vmem:[#allocation6 + $0x3f0] sm:$0xff] }
 0x179   :  { %3580 = vmatpush1.bf16.msra.mxu0 %v5759_v35  ;;  %3644 = vmatpush1.bf16.msra.mxu1 %v5761_v39  ;;  %v920_v35 = vld [vmem:[#allocation6 + $0x368] sm:$0xff]  ;;  %v922_v39 = vld [vmem:[#allocation6 + $0x378] sm:$0xff]  ;;  %6983 = vst [vmem:[#allocation103_spill] sm:$0xff] %v5807_v53 }
 0x17a   :  { %3582 = vmatprep.subr.bf16.mxu0 %v5765_v44  ;;  %3646 = vmatprep.subr.bf16.mxu1 %v5767_v28  ;;  %v5789_v63 = vpack.c.bf16 %v920_v35, %v916_v47  ;;  %v5791_v9 = vpack.c.bf16 %v922_v39, %v918_v40  ;;  %v924_v28 = vld [vmem:[#allocation6 + $0x388] sm:$0xff]  ;;  %v926_v44 = vld [vmem:[#allocation6 + $0x398] sm:$0xff]  ;;  %v925_v35 = vld [vmem:[#allocation6 + $0x390] sm:$0xff] }
 0x17b   :  { %v929_v39 = vld [vmem:[#allocation6 + $0x3b0] sm:$0xff] }
 0x17c   :  { %6979 = vst [vmem:[#allocation99_spill] sm:$0xff] %v5789_v63  ;;  %6980 = vst [vmem:[#allocation100_spill] sm:$0xff] %v5791_v9  ;;  %v5809_v56 = vpack.c.bf16 %v929_v39, %v925_v35 }
 0x17d   :  { %3584 = vmatpush1.bf16.msra.mxu0 %v5771_v23  ;;  %3648 = vmatpush1.bf16.msra.mxu1 %v5773_v14  ;;  %v928_v23 = vld [vmem:[#allocation6 + $0x3a8] sm:$0xff]  ;;  %v930_v14 = vld [vmem:[#allocation6 + $0x3b8] sm:$0xff] }
 0x17e   :  { %3586 = vmatprep.subr.bf16.mxu0 %v5777_v1  ;;  %3650 = vmatprep.subr.bf16.mxu1 %v5779_v10  ;;  %v5801_v40 = vpack.c.bf16 %v928_v23, %v924_v28  ;;  %v5803_v47 = vpack.c.bf16 %v930_v14, %v926_v44  ;;  %v932_v10 = vld [vmem:[#allocation6 + $0x3c8] sm:$0xff]  ;;  %v934_v1 = vld [vmem:[#allocation6 + $0x3d8] sm:$0xff]  ;;  %6984 = vst [vmem:[#allocation104_spill] sm:$0xff] %v5809_v56  ;;  %v935_v23 = vld [vmem:[#allocation6 + $0x3e0] sm:$0xff] }
 0x17f   :  { %v933_v14 = vld [vmem:[#allocation6 + $0x3d0] sm:$0xff]  ;;  %v5819_v30 = vpack.c.bf16 %v935_v23, %v931_v3 }
 0x180   :  { %6981 = vst [vmem:[#allocation101_spill] sm:$0xff] %v5801_v40  ;;  %6982 = vst [vmem:[#allocation102_spill] sm:$0xff] %v5803_v47  ;;  %v5821_v34 = vpack.c.bf16 %v937_v26, %v933_v14 }
 0x181   :  { %3588 = vmatpush1.bf16.msra.mxu0 %v5783_v51  ;;  %3652 = vmatpush1.bf16.msra.mxu1 %v5785_v52  ;;  %v936_v51 = vld [vmem:[#allocation6 + $0x3e8] sm:$0xff]  ;;  %v938_v52 = vld [vmem:[#allocation6 + $0x3f8] sm:$0xff]  ;;  %6987 = vst [vmem:[#allocation107_spill] sm:$0xff] %v5819_v30 }
 0x182   :  { %3590 = vmatprep.subr.bf16.mxu0 %v5789_v63  ;;  %3654 = vmatprep.subr.bf16.mxu1 %v5791_v9  ;;  %v5813_v44 = vpack.c.bf16 %v936_v51, %v932_v10  ;;  %v5815_v28 = vpack.c.bf16 %v938_v52, %v934_v1  ;;  %6988 = vst [vmem:[#allocation108_spill] sm:$0xff] %v5821_v34 }
 0x184   :  { %6985 = vst [vmem:[#allocation105_spill] sm:$0xff] %v5813_v44  ;;  %6986 = vst [vmem:[#allocation106_spill] sm:$0xff] %v5815_v28 }
 0x185   :  { %3592 = vmatpush1.bf16.msra.mxu0 %v5795_v17  ;;  %3656 = vmatpush1.bf16.msra.mxu1 %v5797_v32 }
 0x186   :  { %3594 = vmatprep.subr.bf16.mxu0 %v5801_v40  ;;  %3658 = vmatprep.subr.bf16.mxu1 %v5803_v47 }
 0x189   :  { %3596 = vmatpush1.bf16.msra.mxu0 %v5807_v53  ;;  %3660 = vmatpush1.bf16.msra.mxu1 %v5809_v56 }
 0x18a   :  { %3598 = vmatprep.subr.bf16.mxu0 %v5813_v44  ;;  %3662 = vmatprep.subr.bf16.mxu1 %v5815_v28 }
 0x18d   :  { %3600 = vmatpush1.bf16.msra.mxu0 %v5819_v30  ;;  %3664 = vmatpush1.bf16.msra.mxu1 %v5821_v34 }
 0x18e   :  { %3666 = vmatprep.subr.bf16.mxu0 %v5414_v11  ;;  %3698 = vmatprep.subr.bf16.mxu1 %v5416_v12 }
 0x190   :  { %1004 = vmatmul.mubr.f32.vlgmr.msra.gmra.mrb[16].mxu0 %v5639_v6  ;;  %1075 = vmatmul.mubr.f32.vlgmr.msra.gmra.mrb[16].mxu1 %v5639_v6 }
 0x191   :  { %3668 = vmatpush1.bf16.msra.mxu0 %v5418_v16  ;;  %3700 = vmatpush1.bf16.msra.mxu1 %v5427_v20 }
 0x192   :  { %3670 = vmatprep.subr.bf16.mxu0 %v5430_v24  ;;  %3702 = vmatprep.subr.bf16.mxu1 %v5432_v25 }
 0x193   :  { %1174 = vmatprep.mubr.f32.mxu0 %v6936_v0  ;;  %1245 = vmatprep.mubr.f32.mxu1 %v6936_v0 }
 0x195   :  { %3672 = vmatpush1.bf16.msra.mxu0 %v5436_v29  ;;  %3704 = vmatpush1.bf16.msra.mxu1 %v5443_v33 }
 0x196   :  { %3674 = vmatprep.subr.bf16.mxu0 %v5447_v37  ;;  %3706 = vmatprep.subr.bf16.mxu1 %v5449_v38 }
 0x199   :  { %3676 = vmatpush1.bf16.msra.mxu0 %v5453_v42  ;;  %3708 = vmatpush1.bf16.msra.mxu1 %v5460_v46 }
 0x19a   :  { %3678 = vmatprep.subr.bf16.mxu0 %v5464_v50  ;;  %3710 = vmatprep.subr.bf16.mxu1 %v5468_v54 }
 0x19d   :  { %3680 = vmatpush1.bf16.msra.mxu0 %v5472_v57  ;;  %3712 = vmatpush1.bf16.msra.mxu1 %v5476_v61 }
 0x19e   :  { %3682 = vmatprep.subr.bf16.mxu0 %v5483_v2  ;;  %3714 = vmatprep.subr.bf16.mxu1 %v5487_v5 }
 0x1a1   :  { %3684 = vmatpush1.bf16.msra.mxu0 %v5491_v8  ;;  %3716 = vmatpush1.bf16.msra.mxu1 %v5495_v13 }
 0x1a2   :  { %3686 = vmatprep.subr.bf16.mxu0 %v5502_v18  ;;  %3718 = vmatprep.subr.bf16.mxu1 %v5506_v22 }
 0x1a5   :  { %3688 = vmatpush1.bf16.msra.mxu0 %v5510_v27  ;;  %3720 = vmatpush1.bf16.msra.mxu1 %v5514_v31 }
 0x1a6   :  { %3690 = vmatprep.subr.bf16.mxu0 %v5521_v36  ;;  %3722 = vmatprep.subr.bf16.mxu1 %v5525_v41 }
 0x1a9   :  { %3692 = vmatpush1.bf16.msra.mxu0 %v5529_v45  ;;  %3724 = vmatpush1.bf16.msra.mxu1 %v5533_v49 }
 0x1aa   :  { %3694 = vmatprep.subr.bf16.mxu0 %v5540_v55  ;;  %3726 = vmatprep.subr.bf16.mxu1 %v5544_v59 }
 0x1ad   :  { %3696 = vmatpush1.bf16.msra.mxu0 %v5548_v60  ;;  %3728 = vmatpush1.bf16.msra.mxu1 %v5552_v62 }
 0x1ae   :  { %3730 = vmatprep.subr.bf16.mxu0 %v5597_v4  ;;  %3794 = vmatprep.subr.bf16.mxu1 %v5599_v7 }
 0x223   :  { %v707_v6 = vpop.f32.mrb[2].mxu0  ;;  %v778_v1 = vpop.f32.mrb[2].mxu1 }
 0x224   :  { %v4947_v10 = vadd.f32 %v707_v6, %v5612_v19  ;;  %v709_v51 = vpop.f32.mrb[3].mxu0  ;;  %v780_v52 = vpop.f32.mrb[3].mxu1  ;;  %v4963_v26 = vadd.f32 %v778_v1, %v5629_v48 }
 0x225   :  { %v4948_v35 = vadd.f32 %v709_v51, %v5616_v21  ;;  %v4964_v23 = vadd.f32 %v780_v52, %v5623_v43  ;;  %v7016_v43 = vld [vmem:[#allocation69_spill] sm:$0xff] }
 0x226   :  { %v3362_v39 = vmul.f32 -1.442695, %v4947_v10 }
 0x227   :  { %v3363_v3 = vmul.f32 -1.442695, %v4948_v35  ;;  %v3364_v14 = vmul.f32 -1.442695, %v4964_v23 }
 0x228   :  { %5030 = vpow2.f32 %v3362_v39 }
 0x229   :  { %5032 = vpow2.f32 %v3363_v3 }
 0x22a   :  { %5034 = vpow2.f32 %v3364_v14  ;;  %v6995_v14 = vld [vmem:[#allocation55_spill] sm:$0xff] }
 0x22b   :  { %5036 = vtanh.f32 %v4963_v26  ;;  %v6996_v26 = vld [vmem:[#allocation56_spill] sm:$0xff] }
 0x232   :  { %v5031_v4 = vpop.eup %5030 }
 0x233   :  { %v5033_v62 = vpop.eup %5032  ;;  %v790_v7 = vadd.f32 1.0, %v5031_v4 }
 0x234   :  { %v796_v60 = vadd.f32 1.0, %v5033_v62  ;;  %v5035_v6 = vpop.eup %5034  ;;  %v6991_v62 = vld [vmem:[#allocation51_spill] sm:$0xff] }
 0x235   :  { %5038 = vrcp.f32 %v790_v7  ;;  %v5037_v19 = vpop.eup %5036  ;;  %v803_v39 = vadd.f32 1.0, %v5035_v6  ;;  %v6992_v7 = vld [vmem:[#allocation52_spill] sm:$0xff]  ;;  %v6997_v6 = vld [vmem:[#allocation57_spill] sm:$0xff] }
 0x236   :  { %5040 = vrcp.f32 %v796_v60  ;;  %v6990_v60 = vld [vmem:[#allocation50_spill] sm:$0xff] }
 0x237   :  { %5042 = vrcp.f32 %v803_v39  ;;  %v376_v39 = vld [vmem:[%s6656_s5] sm:$0xf] }
 0x23f   :  { %v5039_v51 = vpop.eup %5038 }
 0x240   :  { %v5041_v10 = vpop.eup %5040  ;;  %v807_v35 = vmul.f32 %v5039_v51, %v5037_v19  ;;  %v6993_v19 = vld [vmem:[#allocation53_spill] sm:$0xff]  ;;  %v6998_v51 = vld [vmem:[#allocation58_spill] sm:$0xff] }
 0x241   :  { %v806_v3 = vmul.f32 %v5041_v10, %v5632_v15  ;;  %v5043_v1 = vpop.eup %5042  ;;  %v6994_v15 = vld [vmem:[#allocation54_spill] sm:$0xff]  ;;  %v6999_v10 = vld [vmem:[#allocation59_spill] sm:$0xff] }
 0x243   :  { %v5870_v52 = vadd.f32 %v807_v35, %v806_v3  ;;  %v7000_v35 = vld [vmem:[#allocation60_spill] sm:$0xff]  ;;  %v7001_v3 = vld [vmem:[#allocation61_spill] sm:$0xff] }
 0x245   :  { %6989 = vst [vmem:[#allocation109_spill] sm:$0xff] %v5870_v52  ;;  %5044 = vtanh.f32 %v5870_v52 }
 0x24f   :  { %v5045_v4 = vpop.eup %5044 }
 0x250   :  { %v5873_v23 = vmul.f32 %v5045_v4, %v5043_v1  ;;  %v7002_v1 = vld [vmem:[#allocation62_spill] sm:$0xff]  ;;  %v7003_v4 = vld [vmem:[#allocation44_spill] sm:$0xff] }
 0x252   :  { %1175 = vmatmul.mubr.f32.vlgmr.msra.gmra.mrb[4].mxu0 %v5873_v23  ;;  %1246 = vmatmul.mubr.f32.vlgmr.msra.gmra.mrb[4].mxu1 %v5873_v23 }
 0x253   :  { %3732 = vmatpush1.bf16.msra.mxu0 %v5635_v58  ;;  %3796 = vmatpush1.bf16.msra.mxu1 %v6990_v60  ;;  %v7013_v58 = vld [vmem:[#allocation68_spill] sm:$0xff] }
 0x254   :  { %3734 = vmatprep.subr.bf16.mxu0 %v6991_v62  ;;  %3798 = vmatprep.subr.bf16.mxu1 %v6992_v7  ;;  %v7010_v7 = vld [vmem:[#allocation65_spill] sm:$0xff]  ;;  %v7011_v62 = vld [vmem:[#allocation66_spill] sm:$0xff] }
 0x257   :  { %3736 = vmatpush1.bf16.msra.mxu0 %v6993_v19  ;;  %3800 = vmatpush1.bf16.msra.mxu1 %v6994_v15 }
 0x258   :  { %3738 = vmatprep.subr.bf16.mxu0 %v6995_v14  ;;  %3802 = vmatprep.subr.bf16.mxu1 %v6996_v26  ;;  %v7004_v14 = vsub.s32 0, %v7003_v4  ;;  %v7006_v26 = vld [vmem:[#allocation63_spill] sm:$0xff] }
 0x25a   :  { %v5896_v15 = vrot.slane %v376_v39, %v7004_v14  ;;  %v7012_v14 = vld [vmem:[#allocation67_spill] sm:$0xff] }
 0x25b   :  { %3740 = vmatpush1.bf16.msra.mxu0 %v6997_v6  ;;  %3804 = vmatpush1.bf16.msra.mxu1 %v6998_v51  ;;  %v7007_v6 = vld [vmem:[#allocation64_spill] sm:$0xff] }
 0x25c   :  { %3742 = vmatprep.subr.bf16.mxu0 %v6999_v10  ;;  %3806 = vmatprep.subr.bf16.mxu1 %v7000_v35  ;;  %7005 = vst [vmem:[#allocation44_spill] sm:$0xff] %v5896_v15  ;;  %v7008_v10 = vsub.s32 1, %v7003_v4 }
 0x25e   :  { %v5902_v51 = vrot.slane %v376_v39, %v7008_v10  ;;  %v7014_v10 = vsub.s32 3, %v7003_v4 }
 0x25f   :  { %3744 = vmatpush1.bf16.msra.mxu0 %v7001_v3  ;;  %3808 = vmatpush1.bf16.msra.mxu1 %v7002_v1 }
 0x260   :  { %3746 = vmatprep.subr.bf16.mxu0 %v7006_v26  ;;  %3810 = vmatprep.subr.bf16.mxu1 %v7007_v6  ;;  %7009 = vst [vmem:[#allocation110_spill] sm:$0xff] %v5902_v51  ;;  %v5912_v48 = vrot.slane %v376_v39, %v7014_v10  ;;  %v7024_v10 = vld [vmem:[#allocation75_spill] sm:$0xff] }
 0x262   :  { %7015 = vst [vmem:[#allocation111_spill] sm:$0xff] %v5912_v48 }
 0x263   :  { %v1005_v35 = vpop.f32.mrb[16].mxu0  ;;  %v1076_v19 = vpop.f32.mrb[16].mxu1  ;;  %3748 = vmatpush1.bf16.msra.mxu0 %v7010_v7  ;;  %3812 = vmatpush1.bf16.msra.mxu1 %v7011_v62  ;;  %v7017_v7 = vld [vmem:[#allocation70_spill] sm:$0xff] }
 0x264   :  { %v1006_v1 = vadd.f32 %v1005_v35, %v5896_v15  ;;  %v1007_v3 = vpop.f32.mrb[17].mxu0  ;;  %v1078_v60 = vpop.f32.mrb[17].mxu1  ;;  %3750 = vmatprep.subr.bf16.mxu0 %v7012_v14  ;;  %3814 = vmatprep.subr.bf16.mxu1 %v7013_v58  ;;  %v7018_v35 = vld [vmem:[#allocation71_spill] sm:$0xff]  ;;  %v7019_v15 = vld [vmem:[#allocation72_spill] sm:$0xff]  ;;  %v7020_v14 = vld [vmem:[#allocation73_spill] sm:$0xff] }
 0x265   :  { %v1008_v6 = vadd.f32 %v1007_v3, %v5902_v51  ;;  %v1079_v58 = vadd.f32 %v1078_v60, %v5912_v48  ;;  %v7021_v3 = vld [vmem:[#allocation74_spill] sm:$0xff]  ;;  %v7028_v60 = vld [vmem:[#allocation79_spill] sm:$0xff]  ;;  %v7029_v48 = vld [vmem:[#allocation80_spill] sm:$0xff] }
 0x266   :  { %v3365_v26 = vmul.f32 -1.442695, %v1006_v1 }
 0x267   :  { %v3366_v52 = vmul.f32 -1.442695, %v1008_v6  ;;  %3752 = vmatpush1.bf16.msra.mxu0 %v7016_v43  ;;  %3816 = vmatpush1.bf16.msra.mxu1 %v7017_v7  ;;  %v7022_v6 = vsub.s32 2, %v7003_v4  ;;  %v7025_v43 = vld [vmem:[#allocation76_spill] sm:$0xff]  ;;  %v7026_v7 = vld [vmem:[#allocation77_spill] sm:$0xff] }
 0x268   :  { %5046 = vpow2.f32 %v3365_v26  ;;  %3754 = vmatprep.subr.bf16.mxu0 %v7018_v35  ;;  %3818 = vmatprep.subr.bf16.mxu1 %v7019_v15  ;;  %v3367_v26 = vmul.f32 -1.442695, %v1079_v58  ;;  %v7027_v35 = vld [vmem:[#allocation78_spill] sm:$0xff] }
 0x269   :  { %5048 = vpow2.f32 %v3366_v52  ;;  %v5923_v1 = vrot.slane %v376_v39, %v7022_v6  ;;  %v7030_v39 = vld [vmem:[#allocation81_spill] sm:$0xff]  ;;  %v7031_v6 = vld [vmem:[#allocation82_spill] sm:$0xff] }
 0x26a   :  { %5050 = vpow2.f32 %v3367_v26  ;;  %v7038_v26 = vld [vmem:[#allocation89_spill] sm:$0xff] }
 0x26b   :  { %3756 = vmatpush1.bf16.msra.mxu0 %v7020_v14  ;;  %3820 = vmatpush1.bf16.msra.mxu1 %v7021_v3  ;;  %7023 = vst [vmem:[#allocation112_spill] sm:$0xff] %v5923_v1  ;;  %v1077_v52 = vadd.f32 %v1076_v19, %v5923_v1  ;;  %v7034_v19 = vld [vmem:[#allocation85_spill] sm:$0xff]  ;;  %v7035_v1 = vld [vmem:[#allocation86_spill] sm:$0xff] }
 0x26c   :  { %3758 = vmatprep.subr.bf16.mxu0 %v7024_v10  ;;  %3822 = vmatprep.subr.bf16.mxu1 %v7025_v43  ;;  %v7032_v43 = vld [vmem:[#allocation83_spill] sm:$0xff] }
 0x26d   :  { %5052 = vtanh.f32 %v1077_v52  ;;  %v7040_v52 = vld [vmem:[#allocation91_spill] sm:$0xff] }
 0x26f   :  { %3760 = vmatpush1.bf16.msra.mxu0 %v7026_v7  ;;  %3824 = vmatpush1.bf16.msra.mxu1 %v7027_v35  ;;  %v7033_v7 = vld [vmem:[#allocation84_spill] sm:$0xff] }
 0x270   :  { %3762 = vmatprep.subr.bf16.mxu0 %v7028_v60  ;;  %3826 = vmatprep.subr.bf16.mxu1 %v7029_v48  ;;  %v7036_v48 = vld [vmem:[#allocation87_spill] sm:$0xff] }
 0x271   :  { %v7044_v60 = vld [vmem:[#allocation95_spill] sm:$0xff] }
 0x272   :  { %v5047_v3 = vpop.eup %5046 }
 0x273   :  { %v5049_v14 = vpop.eup %5048  ;;  %v1084_v4 = vadd.f32 1.0, %v5047_v3  ;;  %3764 = vmatpush1.bf16.msra.mxu0 %v7030_v39  ;;  %3828 = vmatpush1.bf16.msra.mxu1 %v7031_v6  ;;  %v7037_v3 = vld [vmem:[#allocation88_spill] sm:$0xff]  ;;  %v7039_v39 = vld [vmem:[#allocation90_spill] sm:$0xff] }
 0x274   :  { %v1090_v58 = vadd.f32 1.0, %v5049_v14  ;;  %3766 = vmatprep.subr.bf16.mxu0 %v7032_v43  ;;  %3830 = vmatprep.subr.bf16.mxu1 %v7033_v7  ;;  %v7041_v14 = vld [vmem:[#allocation92_spill] sm:$0xff]  ;;  %v5051_v43 = vpop.eup %5050 }
 0x275   :  { %5054 = vrcp.f32 %v1084_v4 }
 0x276   :  { %5056 = vrcp.f32 %v1090_v58  ;;  %v7042_v58 = vld [vmem:[#allocation93_spill] sm:$0xff] }
 0x277   :  { %3768 = vmatpush1.bf16.msra.mxu0 %v7034_v19  ;;  %3832 = vmatpush1.bf16.msra.mxu1 %v7035_v1  ;;  %v5053_v7 = vpop.eup %5052  ;;  %v7043_v19 = vld [vmem:[#allocation94_spill] sm:$0xff] }
 0x278   :  { %3770 = vmatprep.subr.bf16.mxu0 %v7036_v48  ;;  %3834 = vmatprep.subr.bf16.mxu1 %v7037_v3  ;;  %v1097_v48 = vadd.f32 1.0, %v5051_v43  ;;  %v7045_v3 = vld [vmem:[#allocation96_spill] sm:$0xff] }
 0x27a   :  { %5058 = vrcp.f32 %v1097_v48 }
 0x27b   :  { %3772 = vmatpush1.bf16.msra.mxu0 %v7038_v26  ;;  %3836 = vmatpush1.bf16.msra.mxu1 %v7039_v39 }
 0x27c   :  { %3774 = vmatprep.subr.bf16.mxu0 %v7040_v52  ;;  %3838 = vmatprep.subr.bf16.mxu1 %v7041_v14  ;;  %v7046_v52 = vld [vmem:[#allocation97_spill] sm:$0xff]  ;;  %v7047_v14 = vld [vmem:[#allocation98_spill] sm:$0xff] }
 0x27f   :  { %v5055_v4 = vpop.eup %5054  ;;  %3776 = vmatpush1.bf16.msra.mxu0 %v7042_v58  ;;  %3840 = vmatpush1.bf16.msra.mxu1 %v7043_v19 }
 0x280   :  { %v5057_v1 = vpop.eup %5056  ;;  %v1101_v6 = vmul.f32 %v5055_v4, %v5053_v7  ;;  %3778 = vmatprep.subr.bf16.mxu0 %v7044_v60  ;;  %3842 = vmatprep.subr.bf16.mxu1 %v7045_v3 }
 0x281   :  { %v1100_v26 = vmul.f32 0.0, %v5057_v1  ;;  %v7049_v1 = vld [vmem:[#allocation41_spill] sm:$0xff] }
 0x283   :  { %v5948_v39 = vadd.f32 %v1101_v6, %v1100_v26  ;;  %3780 = vmatpush1.bf16.msra.mxu0 %v7046_v52  ;;  %3844 = vmatpush1.bf16.msra.mxu1 %v7047_v14  ;;  %v7050_v6 = vld [vmem:[#allocation42_spill] sm:$0xff]  ;;  %v7051_v26 = vld [vmem:[#allocation43_spill] sm:$0xff] }
 0x284   :  { %3782 = vmatprep.subr.bf16.mxu0 %v5789_v63  ;;  %3846 = vmatprep.subr.bf16.mxu1 %v5791_v9  ;;  %v5059_v43 = vpop.eup %5058 }
 0x285   :  { %5060 = vtanh.f32 %v5948_v39 }
 0x287   :  { %3784 = vmatpush1.bf16.msra.mxu0 %v5795_v17  ;;  %3848 = vmatpush1.bf16.msra.mxu1 %v5797_v32 }
 0x288   :  { %3786 = vmatprep.subr.bf16.mxu0 %v5801_v40  ;;  %3850 = vmatprep.subr.bf16.mxu1 %v5803_v47 }
 0x28b   :  { %3788 = vmatpush1.bf16.msra.mxu0 %v5807_v53  ;;  %3852 = vmatpush1.bf16.msra.mxu1 %v5809_v56 }
 0x28c   :  { %3790 = vmatprep.subr.bf16.mxu0 %v5813_v44  ;;  %3854 = vmatprep.subr.bf16.mxu1 %v5815_v28 }
 0x28f   :  { %v5061_v48 = vpop.eup %5060  ;;  %3792 = vmatpush1.bf16.msra.mxu0 %v5819_v30  ;;  %3856 = vmatpush1.bf16.msra.mxu1 %v5821_v34 }
 0x290   :  { %v1104_v7 = vmul.f32 %v5061_v48, %v5059_v43  ;;  %3858 = vmatprep.subr.bf16.mxu0 %v5414_v11  ;;  %3890 = vmatprep.subr.bf16.mxu1 %v5416_v12  ;;  %v7052_v48 = vld [vmem:[#allocation45_spill] sm:$0xff] }
 0x292   :  { %1344 = vmatprep.mubr.f32.mxu0 %v1104_v7  ;;  %1415 = vmatprep.mubr.f32.mxu1 %v1104_v7 }
 0x293   :  { %1345 = vmatmul.mubr.f32.vlgmr.msra.gmra.mrb[18].mxu0 %v5873_v23  ;;  %1416 = vmatmul.mubr.f32.vlgmr.msra.gmra.mrb[18].mxu1 %v5873_v23  ;;  %v7048_v23 = vld [vmem:[#allocation40_spill] sm:$0xff] }
 0x294   :  { %3860 = vmatpush1.bf16.msra.mxu0 %v5418_v16  ;;  %3892 = vmatpush1.bf16.msra.mxu1 %v5427_v20 }
 0x295   :  { %3862 = vmatprep.subr.bf16.mxu0 %v5430_v24  ;;  %3894 = vmatprep.subr.bf16.mxu1 %v5432_v25 }
 0x296   :  { %1515 = vmatprep.mubr.f32.mxu0 %v6936_v0  ;;  %1586 = vmatprep.mubr.f32.mxu1 %v6936_v0 }
 0x298   :  { %3864 = vmatpush1.bf16.msra.mxu0 %v5436_v29  ;;  %3896 = vmatpush1.bf16.msra.mxu1 %v5443_v33 }
 0x299   :  { %3866 = vmatprep.subr.bf16.mxu0 %v5447_v37  ;;  %3898 = vmatprep.subr.bf16.mxu1 %v5449_v38 }
 0x29c   :  { %3868 = vmatpush1.bf16.msra.mxu0 %v5453_v42  ;;  %3900 = vmatpush1.bf16.msra.mxu1 %v5460_v46 }
 0x29d   :  { %3870 = vmatprep.subr.bf16.mxu0 %v5464_v50  ;;  %3902 = vmatprep.subr.bf16.mxu1 %v5468_v54 }
 0x2a0   :  { %3872 = vmatpush1.bf16.msra.mxu0 %v5472_v57  ;;  %3904 = vmatpush1.bf16.msra.mxu1 %v5476_v61 }
 0x2a1   :  { %3874 = vmatprep.subr.bf16.mxu0 %v5483_v2  ;;  %3906 = vmatprep.subr.bf16.mxu1 %v5487_v5 }
 0x2a4   :  { %3876 = vmatpush1.bf16.msra.mxu0 %v5491_v8  ;;  %3908 = vmatpush1.bf16.msra.mxu1 %v5495_v13 }
 0x2a5   :  { %3878 = vmatprep.subr.bf16.mxu0 %v5502_v18  ;;  %3910 = vmatprep.subr.bf16.mxu1 %v5506_v22 }
 0x2a8   :  { %3880 = vmatpush1.bf16.msra.mxu0 %v5510_v27  ;;  %3912 = vmatpush1.bf16.msra.mxu1 %v5514_v31 }
 0x2a9   :  { %3882 = vmatprep.subr.bf16.mxu0 %v5521_v36  ;;  %3914 = vmatprep.subr.bf16.mxu1 %v5525_v41 }
 0x2ac   :  { %3884 = vmatpush1.bf16.msra.mxu0 %v5529_v45  ;;  %3916 = vmatpush1.bf16.msra.mxu1 %v5533_v49 }
 0x2ad   :  { %3886 = vmatprep.subr.bf16.mxu0 %v5540_v55  ;;  %3918 = vmatprep.subr.bf16.mxu1 %v5544_v59  ;;  %v7053_v59 = vld [vmem:[#allocation47_spill] sm:$0xff] }
 0x2b0   :  { %3888 = vmatpush1.bf16.msra.mxu0 %v7048_v23  ;;  %3920 = vmatpush1.bf16.msra.mxu1 %v7049_v1  ;;  %v7054_v1 = vld [vmem:[#allocation48_spill] sm:$0xff] }
 0x2b1   :  { %3922 = vmatprep.subr.bf16.mxu0 %v7050_v6  ;;  %3986 = vmatprep.subr.bf16.mxu1 %v7051_v26 }
 0x325   :  { %v1176_v4 = vpop.f32.mrb[4].mxu0  ;;  %v1247_v43 = vpop.f32.mrb[4].mxu1 }
 0x326   :  { %v4949_v7 = vadd.f32 %v1176_v4, %v7052_v48  ;;  %v1178_v41 = vpop.f32.mrb[5].mxu0  ;;  %v1249_v45 = vpop.f32.mrb[5].mxu1  ;;  %v4965_v27 = vadd.f32 %v1247_v43, %v7054_v1  ;;  %v7061_v43 = vld [vmem:[#allocation54_spill] sm:$0xff] }
 0x327   :  { %v4950_v49 = vadd.f32 %v1178_v41, %v5616_v21  ;;  %v4966_v23 = vadd.f32 %v1249_v45, %v7053_v59 }
 0x328   :  { %v3368_v36 = vmul.f32 -1.442695, %v4949_v7 }
 0x329   :  { %v3369_v55 = vmul.f32 -1.442695, %v4950_v49  ;;  %v3370_v31 = vmul.f32 -1.442695, %v4966_v23 }
 0x32a   :  { %5062 = vpow2.f32 %v3368_v36 }
 0x32b   :  { %5064 = vpow2.f32 %v3369_v55  ;;  %v7055_v55 = vld [vmem:[#allocation109_spill] sm:$0xff] }
 0x32c   :  { %5066 = vpow2.f32 %v3370_v31 }
 0x32d   :  { %5068 = vtanh.f32 %v4965_v27  ;;  %v7058_v27 = vld [vmem:[#allocation51_spill] sm:$0xff] }
 0x334   :  { %v5063_v6 = vpop.eup %5062 }
 0x335   :  { %v5065_v22 = vpop.eup %5064  ;;  %v1259_v26 = vadd.f32 1.0, %v5063_v6 }
 0x336   :  { %v1265_v18 = vadd.f32 1.0, %v5065_v22  ;;  %v5067_v4 = vpop.eup %5066  ;;  %v7057_v22 = vld [vmem:[#allocation50_spill] sm:$0xff] }
 0x337   :  { %5070 = vrcp.f32 %v1259_v26  ;;  %v5069_v48 = vpop.eup %5068  ;;  %v1272_v36 = vadd.f32 1.0, %v5067_v4  ;;  %v7059_v26 = vld [vmem:[#allocation52_spill] sm:$0xff] }
 0x338   :  { %5072 = vrcp.f32 %v1265_v18  ;;  %v7056_v18 = vld [vmem:[#allocation49_spill] sm:$0xff]  ;;  %v7063_v4 = vld [vmem:[#allocation56_spill] sm:$0xff] }
 0x339   :  { %5074 = vrcp.f32 %v1272_v36  ;;  %v7067_v36 = vld [vmem:[#allocation60_spill] sm:$0xff] }
 0x341   :  { %v5071_v41 = vpop.eup %5070 }
 0x342   :  { %v5073_v7 = vpop.eup %5072  ;;  %v1276_v49 = vmul.f32 %v5071_v41, %v5069_v48  ;;  %v7062_v48 = vld [vmem:[#allocation55_spill] sm:$0xff]  ;;  %v7064_v41 = vld [vmem:[#allocation57_spill] sm:$0xff] }
 0x343   :  { %v1275_v21 = vmul.f32 %v5073_v7, %v7055_v55  ;;  %v5075_v23 = vpop.eup %5074  ;;  %v7065_v7 = vld [vmem:[#allocation58_spill] sm:$0xff]  ;;  %v7068_v55 = vld [vmem:[#allocation61_spill] sm:$0xff] }
 0x345   :  { %v6008_v45 = vadd.f32 %v1276_v49, %v1275_v21  ;;  %v7060_v21 = vld [vmem:[#allocation53_spill] sm:$0xff]  ;;  %v7066_v49 = vld [vmem:[#allocation59_spill] sm:$0xff] }
 0x347   :  { %5076 = vtanh.f32 %v6008_v45 }
 0x351   :  { %v5077_v6 = vpop.eup %5076 }
 0x352   :  { %v6011_v31 = vmul.f32 %v5077_v6, %v5075_v23  ;;  %v7069_v23 = vld [vmem:[#allocation62_spill] sm:$0xff]  ;;  %v7070_v6 = vld [vmem:[#allocation63_spill] sm:$0xff] }
 0x354   :  { %1516 = vmatmul.mubr.f32.vlgmr.msra.gmra.mrb[6].mxu0 %v6011_v31  ;;  %1587 = vmatmul.mubr.f32.vlgmr.msra.gmra.mrb[6].mxu1 %v6011_v31 }
 0x355   :  { %3924 = vmatpush1.bf16.msra.mxu0 %v7056_v18  ;;  %3988 = vmatpush1.bf16.msra.mxu1 %v7057_v22  ;;  %v7078_v22 = vld [vmem:[#allocation71_spill] sm:$0xff] }
 0x356   :  { %3926 = vmatprep.subr.bf16.mxu0 %v7058_v27  ;;  %3990 = vmatprep.subr.bf16.mxu1 %v7059_v26 }
 0x359   :  { %3928 = vmatpush1.bf16.msra.mxu0 %v7060_v21  ;;  %3992 = vmatpush1.bf16.msra.mxu1 %v7061_v43  ;;  %v7071_v21 = vld [vmem:[#allocation64_spill] sm:$0xff]  ;;  %v7072_v43 = vld [vmem:[#allocation65_spill] sm:$0xff] }
 0x35a   :  { %3930 = vmatprep.subr.bf16.mxu0 %v7062_v48  ;;  %3994 = vmatprep.subr.bf16.mxu1 %v7063_v4  ;;  %v7073_v48 = vld [vmem:[#allocation67_spill] sm:$0xff] }
 0x35d   :  { %3932 = vmatpush1.bf16.msra.mxu0 %v7064_v41  ;;  %3996 = vmatpush1.bf16.msra.mxu1 %v7065_v7  ;;  %v7074_v7 = vld [vmem:[#allocation68_spill] sm:$0xff] }
 0x35e   :  { %3934 = vmatprep.subr.bf16.mxu0 %v7066_v49  ;;  %3998 = vmatprep.subr.bf16.mxu1 %v7067_v36  ;;  %v7075_v49 = vld [vmem:[#allocation44_spill] sm:$0xff] }
 0x361   :  { %3936 = vmatpush1.bf16.msra.mxu0 %v7068_v55  ;;  %4000 = vmatpush1.bf16.msra.mxu1 %v7069_v23 }
 0x362   :  { %3938 = vmatprep.subr.bf16.mxu0 %v7070_v6  ;;  %4002 = vmatprep.subr.bf16.mxu1 %v7071_v21  ;;  %v7076_v6 = vld [vmem:[#allocation69_spill] sm:$0xff]  ;;  %v7077_v21 = vld [vmem:[#allocation70_spill] sm:$0xff] }
 0x365   :  { %3940 = vmatpush1.bf16.msra.mxu0 %v7072_v43  ;;  %4004 = vmatpush1.bf16.msra.mxu1 %v7011_v62 }
 0x366   :  { %v1346_v4 = vpop.f32.mrb[18].mxu0  ;;  %v1417_v41 = vpop.f32.mrb[18].mxu1  ;;  %3942 = vmatprep.subr.bf16.mxu0 %v7073_v48  ;;  %4006 = vmatprep.subr.bf16.mxu1 %v7074_v7  ;;  %v7079_v48 = vld [vmem:[#allocation73_spill] sm:$0xff]  ;;  %v7080_v7 = vld [vmem:[#allocation74_spill] sm:$0xff] }
 0x367   :  { %v1347_v36 = vadd.f32 %v1346_v4, %v7075_v49  ;;  %v1348_v26 = vpop.f32.mrb[19].mxu0  ;;  %v1419_v55 = vpop.f32.mrb[19].mxu1  ;;  %v7081_v4 = vld [vmem:[#allocation111_spill] sm:$0xff] }
 0x368   :  { %v1349_v23 = vadd.f32 %v1348_v26, %v5902_v51  ;;  %v1420_v49 = vadd.f32 %v1419_v55, %v7081_v4  ;;  %v7082_v26 = vld [vmem:[#allocation76_spill] sm:$0xff] }
 0x369   :  { %v3371_v27 = vmul.f32 -1.442695, %v1347_v36  ;;  %3944 = vmatpush1.bf16.msra.mxu0 %v7076_v6  ;;  %4008 = vmatpush1.bf16.msra.mxu1 %v7077_v21  ;;  %v7083_v36 = vld [vmem:[#allocation77_spill] sm:$0xff] }
 0x36a   :  { %v3372_v43 = vmul.f32 -1.442695, %v1349_v23  ;;  %3946 = vmatprep.subr.bf16.mxu0 %v7078_v22  ;;  %4010 = vmatprep.subr.bf16.mxu1 %v7019_v15  ;;  %v3373_v23 = vmul.f32 -1.442695, %v1420_v49  ;;  %v7084_v22 = vld [vmem:[#allocation79_spill] sm:$0xff]  ;;  %v7085_v15 = vld [vmem:[#allocation80_spill] sm:$0xff] }
 0x36b   :  { %5078 = vpow2.f32 %v3371_v27  ;;  %v7086_v27 = vld [vmem:[#allocation112_spill] sm:$0xff]  ;;  %v7087_v21 = vld [vmem:[#allocation81_spill] sm:$0xff] }
 0x36c   :  { %5080 = vpow2.f32 %v3372_v43  ;;  %v1418_v43 = vadd.f32 %v1417_v41, %v7086_v27  ;;  %v7093_v41 = vld [vmem:[#allocation87_spill] sm:$0xff] }
 0x36d   :  { %3948 = vmatpush1.bf16.msra.mxu0 %v7079_v48  ;;  %4012 = vmatpush1.bf16.msra.mxu1 %v7080_v7  ;;  %v7088_v7 = vld [vmem:[#allocation82_spill] sm:$0xff]  ;;  %5082 = vpow2.f32 %v3373_v23  ;;  %v7097_v23 = vld [vmem:[#allocation91_spill] sm:$0xff] }
 0x36e   :  { %3950 = vmatprep.subr.bf16.mxu0 %v7024_v10  ;;  %4014 = vmatprep.subr.bf16.mxu1 %v7082_v26  ;;  %v7089_v26 = vld [vmem:[#allocation83_spill] sm:$0xff]  ;;  %5084 = vtanh.f32 %v1418_v43 }
 0x371   :  { %3952 = vmatpush1.bf16.msra.mxu0 %v7083_v36  ;;  %4016 = vmatpush1.bf16.msra.mxu1 %v7027_v35  ;;  %v7090_v36 = vld [vmem:[#allocation84_spill] sm:$0xff] }
 0x372   :  { %3954 = vmatprep.subr.bf16.mxu0 %v7084_v22  ;;  %4018 = vmatprep.subr.bf16.mxu1 %v7085_v15  ;;  %v7091_v22 = vld [vmem:[#allocation85_spill] sm:$0xff]  ;;  %v7092_v15 = vld [vmem:[#allocation86_spill] sm:$0xff] }
 0x375   :  { %v5079_v48 = vpop.eup %5078  ;;  %3956 = vmatpush1.bf16.msra.mxu0 %v7087_v21  ;;  %4020 = vmatpush1.bf16.msra.mxu1 %v7088_v7  ;;  %v7094_v21 = vld [vmem:[#allocation88_spill] sm:$0xff]  ;;  %v7095_v7 = vld [vmem:[#allocation89_spill] sm:$0xff] }
 0x376   :  { %v5081_v55 = vpop.eup %5080  ;;  %v1425_v4 = vadd.f32 1.0, %v5079_v48  ;;  %3958 = vmatprep.subr.bf16.mxu0 %v7089_v26  ;;  %4022 = vmatprep.subr.bf16.mxu1 %v7090_v36  ;;  %v7096_v48 = vld [vmem:[#allocation90_spill] sm:$0xff]  ;;  %v7098_v26 = vld [vmem:[#allocation92_spill] sm:$0xff] }
 0x377   :  { %v1431_v49 = vadd.f32 1.0, %v5081_v55  ;;  %v5083_v43 = vpop.eup %5082 }
 0x378   :  { %5086 = vrcp.f32 %v1425_v4  ;;  %v5085_v55 = vpop.eup %5084 }
 0x379   :  { %5088 = vrcp.f32 %v1431_v49  ;;  %3960 = vmatpush1.bf16.msra.mxu0 %v7091_v22  ;;  %4024 = vmatpush1.bf16.msra.mxu1 %v7092_v15 }
 0x37a   :  { %3962 = vmatprep.subr.bf16.mxu0 %v7093_v41  ;;  %4026 = vmatprep.subr.bf16.mxu1 %v7094_v21 }
 0x37d   :  { %3964 = vmatpush1.bf16.msra.mxu0 %v7095_v7  ;;  %4028 = vmatpush1.bf16.msra.mxu1 %v7096_v48  ;;  %v1438_v7 = vadd.f32 1.0, %v5083_v43  ;;  %v7101_v43 = vld [vmem:[#allocation32_spill] sm:$0xff] }
 0x37e   :  { %3966 = vmatprep.subr.bf16.mxu0 %v7097_v23  ;;  %4030 = vmatprep.subr.bf16.mxu1 %v7098_v26 }
 0x37f   :  { %5090 = vrcp.f32 %v1438_v7 }
 0x381   :  { %3968 = vmatpush1.bf16.msra.mxu0 %v7042_v58  ;;  %4032 = vmatpush1.bf16.msra.mxu1 %v7043_v19 }
 0x382   :  { %v5087_v4 = vpop.eup %5086  ;;  %3970 = vmatprep.subr.bf16.mxu0 %v7044_v60  ;;  %4034 = vmatprep.subr.bf16.mxu1 %v7045_v3 }
 0x383   :  { %v5089_v49 = vpop.eup %5088  ;;  %v1442_v21 = vmul.f32 %v5087_v4, %v5085_v55  ;;  %v7102_v55 = vld [vmem:[#allocation33_spill] sm:$0xff]  ;;  %v7103_v4 = vld [vmem:[#allocation34_spill] sm:$0xff] }
 0x384   :  { %v1441_v48 = vmul.f32 %v5089_v49, %v5948_v39  ;;  %v7104_v49 = vld [vmem:[#allocation35_spill] sm:$0xff] }
 0x385   :  { %3972 = vmatpush1.bf16.msra.mxu0 %v7046_v52  ;;  %4036 = vmatpush1.bf16.msra.mxu1 %v7047_v14 }
 0x386   :  { %3974 = vmatprep.subr.bf16.mxu0 %v5789_v63  ;;  %4038 = vmatprep.subr.bf16.mxu1 %v5791_v9  ;;  %v6072_v58 = vadd.f32 %v1442_v21, %v1441_v48  ;;  %v7100_v48 = vld [vmem:[#allocation31_spill] sm:$0xff] }
 0x388   :  { %5092 = vtanh.f32 %v6072_v58 }
 0x389   :  { %3976 = vmatpush1.bf16.msra.mxu0 %v5795_v17  ;;  %4040 = vmatpush1.bf16.msra.mxu1 %v5797_v32  ;;  %v5091_v39 = vpop.eup %5090 }
 0x38a   :  { %3978 = vmatprep.subr.bf16.mxu0 %v5801_v40  ;;  %4042 = vmatprep.subr.bf16.mxu1 %v5803_v47 }
 0x38d   :  { %3980 = vmatpush1.bf16.msra.mxu0 %v5807_v53  ;;  %4044 = vmatpush1.bf16.msra.mxu1 %v5809_v56 }
 0x38e   :  { %3982 = vmatprep.subr.bf16.mxu0 %v5813_v44  ;;  %4046 = vmatprep.subr.bf16.mxu1 %v5815_v28 }
 0x391   :  { %3984 = vmatpush1.bf16.msra.mxu0 %v5819_v30  ;;  %4048 = vmatpush1.bf16.msra.mxu1 %v5821_v34 }
 0x392   :  { %v5093_v21 = vpop.eup %5092  ;;  %4050 = vmatprep.subr.bf16.mxu0 %v5414_v11  ;;  %4082 = vmatprep.subr.bf16.mxu1 %v5416_v12 }
 0x393   :  { %v1445_v7 = vmul.f32 %v5093_v21, %v5091_v39  ;;  %v7105_v39 = vld [vmem:[#allocation36_spill] sm:$0xff]  ;;  %v7106_v21 = vld [vmem:[#allocation37_spill] sm:$0xff] }
 0x395   :  { %1685 = vmatprep.mubr.f32.mxu0 %v1445_v7  ;;  %1756 = vmatprep.mubr.f32.mxu1 %v1445_v7  ;;  %v7107_v7 = vld [vmem:[#allocation38_spill] sm:$0xff] }
 0x396   :  { %1686 = vmatmul.mubr.f32.vlgmr.msra.gmra.mrb[20].mxu0 %v6011_v31  ;;  %1757 = vmatmul.mubr.f32.vlgmr.msra.gmra.mrb[20].mxu1 %v6011_v31  ;;  %v7099_v31 = vld [vmem:[#allocation30_spill] sm:$0xff] }
 0x397   :  { %4052 = vmatpush1.bf16.msra.mxu0 %v5418_v16  ;;  %4084 = vmatpush1.bf16.msra.mxu1 %v5427_v20 }
 0x398   :  { %4054 = vmatprep.subr.bf16.mxu0 %v5430_v24  ;;  %4086 = vmatprep.subr.bf16.mxu1 %v5432_v25 }
 0x399   :  { %1856 = vmatprep.mubr.f32.mxu0 %v6936_v0  ;;  %1927 = vmatprep.mubr.f32.mxu1 %v6936_v0 }
 0x39b   :  { %4056 = vmatpush1.bf16.msra.mxu0 %v5436_v29  ;;  %4088 = vmatpush1.bf16.msra.mxu1 %v5443_v33 }
 0x39c   :  { %4058 = vmatprep.subr.bf16.mxu0 %v5447_v37  ;;  %4090 = vmatprep.subr.bf16.mxu1 %v5449_v38 }
 0x39f   :  { %4060 = vmatpush1.bf16.msra.mxu0 %v5453_v42  ;;  %4092 = vmatpush1.bf16.msra.mxu1 %v5460_v46 }
 0x3a0   :  { %4062 = vmatprep.subr.bf16.mxu0 %v5464_v50  ;;  %4094 = vmatprep.subr.bf16.mxu1 %v5468_v54 }
 0x3a3   :  { %4064 = vmatpush1.bf16.msra.mxu0 %v5472_v57  ;;  %4096 = vmatpush1.bf16.msra.mxu1 %v5476_v61  ;;  %v7114_v61 = vld [vmem:[#allocation46_spill] sm:$0xff] }
 0x3a4   :  { %4066 = vmatprep.subr.bf16.mxu0 %v5483_v2  ;;  %4098 = vmatprep.subr.bf16.mxu1 %v5487_v5  ;;  %v7113_v5 = vld [vmem:[#allocation45_spill] sm:$0xff] }
 0x3a7   :  { %4068 = vmatpush1.bf16.msra.mxu0 %v5491_v8  ;;  %4100 = vmatpush1.bf16.msra.mxu1 %v5495_v13  ;;  %v7108_v8 = vld [vmem:[#allocation39_spill] sm:$0xff]  ;;  %v7109_v13 = vld [vmem:[#allocation40_spill] sm:$0xff] }
 0x3a8   :  { %4070 = vmatprep.subr.bf16.mxu0 %v7099_v31  ;;  %4102 = vmatprep.subr.bf16.mxu1 %v7100_v48  ;;  %v7110_v31 = vld [vmem:[#allocation41_spill] sm:$0xff]  ;;  %v7111_v48 = vld [vmem:[#allocation42_spill] sm:$0xff] }
 0x3ab   :  { %4072 = vmatpush1.bf16.msra.mxu0 %v7101_v43  ;;  %4104 = vmatpush1.bf16.msra.mxu1 %v7102_v55  ;;  %v7112_v43 = vld [vmem:[#allocation43_spill] sm:$0xff] }
 0x3ac   :  { %4074 = vmatprep.subr.bf16.mxu0 %v7103_v4  ;;  %4106 = vmatprep.subr.bf16.mxu1 %v7104_v49 }
 0x3af   :  { %4076 = vmatpush1.bf16.msra.mxu0 %v7105_v39  ;;  %4108 = vmatpush1.bf16.msra.mxu1 %v7106_v21 }
 0x3b0   :  { %4078 = vmatprep.subr.bf16.mxu0 %v7107_v7  ;;  %4110 = vmatprep.subr.bf16.mxu1 %v7108_v8 }
 0x3b3   :  { %4080 = vmatpush1.bf16.msra.mxu0 %v7109_v13  ;;  %4112 = vmatpush1.bf16.msra.mxu1 %v7110_v31 }
 0x3b4   :  { %4114 = vmatprep.subr.bf16.mxu0 %v7111_v48  ;;  %4178 = vmatprep.subr.bf16.mxu1 %v7112_v43 }
 0x427   :  { %v1517_v55 = vpop.f32.mrb[6].mxu0  ;;  %v1588_v4 = vpop.f32.mrb[6].mxu1 }
 0x428   :  { %v4951_v49 = vadd.f32 %v1517_v55, %v7113_v5  ;;  %v1519_v2 = vpop.f32.mrb[7].mxu0  ;;  %v1590_v39 = vpop.f32.mrb[7].mxu1  ;;  %v4967_v31 = vadd.f32 %v1588_v4, %v7054_v1  ;;  %v7121_v4 = vld [vmem:[#allocation56_spill] sm:$0xff] }
 0x429   :  { %v4952_v21 = vadd.f32 %v1519_v2, %v7114_v61  ;;  %v4968_v13 = vadd.f32 %v1590_v39, %v7053_v59 }
 0x42a   :  { %v3374_v57 = vmul.f32 -1.442695, %v4951_v49 }
 0x42b   :  { %v3375_v7 = vmul.f32 -1.442695, %v4952_v21  ;;  %v3376_v8 = vmul.f32 -1.442695, %v4968_v13 }
 0x42c   :  { %5094 = vpow2.f32 %v3374_v57 }
 0x42d   :  { %5096 = vpow2.f32 %v3375_v7 }
 0x42e   :  { %5098 = vpow2.f32 %v3376_v8 }
 0x42f   :  { %5100 = vtanh.f32 %v4967_v31  ;;  %v7119_v31 = vld [vmem:[#allocation54_spill] sm:$0xff] }
 0x436   :  { %v5095_v48 = vpop.eup %5094 }
 0x437   :  { %v5097_v54 = vpop.eup %5096  ;;  %v1600_v43 = vadd.f32 1.0, %v5095_v48 }
 0x438   :  { %v1606_v50 = vadd.f32 1.0, %v5097_v54  ;;  %v5099_v55 = vpop.eup %5098  ;;  %v7116_v54 = vld [vmem:[#allocation51_spill] sm:$0xff] }
 0x439   :  { %5102 = vrcp.f32 %v1600_v43  ;;  %v5101_v5 = vpop.eup %5100  ;;  %v1613_v57 = vadd.f32 1.0, %v5099_v55  ;;  %v7120_v43 = vld [vmem:[#allocation55_spill] sm:$0xff]  ;;  %v7122_v55 = vld [vmem:[#allocation57_spill] sm:$0xff] }
 0x43a   :  { %5104 = vrcp.f32 %v1606_v50  ;;  %v7115_v50 = vld [vmem:[#allocation50_spill] sm:$0xff] }
 0x43b   :  { %5106 = vrcp.f32 %v1613_v57  ;;  %v7126_v57 = vld [vmem:[#allocation61_spill] sm:$0xff] }
 0x443   :  { %v5103_v2 = vpop.eup %5102 }
 0x444   :  { %v5105_v49 = vpop.eup %5104  ;;  %v1617_v21 = vmul.f32 %v5103_v2, %v5101_v5  ;;  %v7117_v5 = vld [vmem:[#allocation52_spill] sm:$0xff]  ;;  %v7123_v2 = vld [vmem:[#allocation58_spill] sm:$0xff] }
 0x445   :  { %v1616_v7 = vmul.f32 %v5105_v49, %v6008_v45  ;;  %v5107_v13 = vpop.eup %5106  ;;  %v7118_v45 = vld [vmem:[#allocation53_spill] sm:$0xff]  ;;  %v7124_v49 = vld [vmem:[#allocation59_spill] sm:$0xff] }
 0x447   :  { %v6128_v39 = vadd.f32 %v1617_v21, %v1616_v7  ;;  %v7125_v21 = vld [vmem:[#allocation60_spill] sm:$0xff]  ;;  %v7127_v7 = vld [vmem:[#allocation62_spill] sm:$0xff] }
 0x449   :  { %5108 = vtanh.f32 %v6128_v39 }
 0x453   :  { %v5109_v48 = vpop.eup %5108 }
 0x454   :  { %v6131_v8 = vmul.f32 %v5109_v48, %v5107_v13  ;;  %v7128_v13 = vld [vmem:[#allocation63_spill] sm:$0xff]  ;;  %v7129_v48 = vld [vmem:[#allocation64_spill] sm:$0xff] }
 0x456   :  { %1857 = vmatmul.mubr.f32.vlgmr.msra.gmra.mrb[8].mxu0 %v6131_v8  ;;  %1928 = vmatmul.mubr.f32.vlgmr.msra.gmra.mrb[8].mxu1 %v6131_v8 }
 0x457   :  { %4116 = vmatpush1.bf16.msra.mxu0 %v7056_v18  ;;  %4180 = vmatpush1.bf16.msra.mxu1 %v7115_v50 }
 0x458   :  { %4118 = vmatprep.subr.bf16.mxu0 %v7116_v54  ;;  %4182 = vmatprep.subr.bf16.mxu1 %v7117_v5  ;;  %v7138_v5 = vld [vmem:[#allocation74_spill] sm:$0xff] }
 0x45b   :  { %4120 = vmatpush1.bf16.msra.mxu0 %v7118_v45  ;;  %4184 = vmatpush1.bf16.msra.mxu1 %v7119_v31  ;;  %v7130_v31 = vld [vmem:[#allocation65_spill] sm:$0xff] }
 0x45c   :  { %4122 = vmatprep.subr.bf16.mxu0 %v7120_v43  ;;  %4186 = vmatprep.subr.bf16.mxu1 %v7121_v4  ;;  %v7131_v4 = vld [vmem:[#allocation67_spill] sm:$0xff]  ;;  %v7133_v43 = vld [vmem:[#allocation44_spill] sm:$0xff] }
 0x45f   :  { %4124 = vmatpush1.bf16.msra.mxu0 %v7122_v55  ;;  %4188 = vmatpush1.bf16.msra.mxu1 %v7123_v2  ;;  %v7132_v55 = vld [vmem:[#allocation68_spill] sm:$0xff] }
 0x460   :  { %4126 = vmatprep.subr.bf16.mxu0 %v7124_v49  ;;  %4190 = vmatprep.subr.bf16.mxu1 %v7125_v21 }
 0x463   :  { %4128 = vmatpush1.bf16.msra.mxu0 %v7126_v57  ;;  %4192 = vmatpush1.bf16.msra.mxu1 %v7127_v7 }
 0x464   :  { %4130 = vmatprep.subr.bf16.mxu0 %v7128_v13  ;;  %4194 = vmatprep.subr.bf16.mxu1 %v7129_v48  ;;  %v7134_v13 = vld [vmem:[#allocation70_spill] sm:$0xff] }
 0x467   :  { %4132 = vmatpush1.bf16.msra.mxu0 %v7130_v31  ;;  %4196 = vmatpush1.bf16.msra.mxu1 %v7011_v62  ;;  %v7135_v31 = vld [vmem:[#allocation71_spill] sm:$0xff]  ;;  %v7136_v62 = vld [vmem:[#allocation72_spill] sm:$0xff] }
 0x468   :  { %4134 = vmatprep.subr.bf16.mxu0 %v7131_v4  ;;  %4198 = vmatprep.subr.bf16.mxu1 %v7132_v55  ;;  %v7137_v55 = vld [vmem:[#allocation73_spill] sm:$0xff] }
 0x469   :  { %v1687_v2 = vpop.f32.mrb[20].mxu0  ;;  %v1758_v49 = vpop.f32.mrb[20].mxu1 }
 0x46a   :  { %v1688_v21 = vadd.f32 %v1687_v2, %v7133_v43  ;;  %v1689_v45 = vpop.f32.mrb[21].mxu0  ;;  %v1760_v57 = vpop.f32.mrb[21].mxu1  ;;  %v7139_v2 = vld [vmem:[#allocation76_spill] sm:$0xff] }
 0x46b   :  { %v1690_v7 = vadd.f32 %v1689_v45, %v5902_v51  ;;  %4136 = vmatpush1.bf16.msra.mxu0 %v7076_v6  ;;  %4200 = vmatpush1.bf16.msra.mxu1 %v7134_v13  ;;  %v7140_v45 = vld [vmem:[#allocation111_spill] sm:$0xff]  ;;  %v7141_v6 = vld [vmem:[#allocation77_spill] sm:$0xff] }
 0x46c   :  { %v3377_v48 = vmul.f32 -1.442695, %v1688_v21  ;;  %4138 = vmatprep.subr.bf16.mxu0 %v7135_v31  ;;  %4202 = vmatprep.subr.bf16.mxu1 %v7136_v62  ;;  %v1761_v51 = vadd.f32 %v1760_v57, %v7140_v45  ;;  %v7142_v21 = vld [vmem:[#allocation79_spill] sm:$0xff]  ;;  %v7143_v62 = vld [vmem:[#allocation80_spill] sm:$0xff] }
 0x46d   :  { %v3378_v4 = vmul.f32 -1.442695, %v1690_v7 }
 0x46e   :  { %5110 = vpow2.f32 %v3377_v48  ;;  %v3379_v7 = vmul.f32 -1.442695, %v1761_v51  ;;  %v7144_v48 = vld [vmem:[#allocation81_spill] sm:$0xff]  ;;  %v7147_v51 = vld [vmem:[#allocation88_spill] sm:$0xff] }
 0x46f   :  { %5112 = vpow2.f32 %v3378_v4  ;;  %4140 = vmatpush1.bf16.msra.mxu0 %v7137_v55  ;;  %4204 = vmatpush1.bf16.msra.mxu1 %v7138_v5  ;;  %v1759_v4 = vadd.f32 %v1758_v49, %v7086_v27  ;;  %v7145_v5 = vld [vmem:[#allocation82_spill] sm:$0xff]  ;;  %v7146_v55 = vld [vmem:[#allocation83_spill] sm:$0xff]  ;;  %v7148_v49 = vld [vmem:[#allocation89_spill] sm:$0xff] }
 0x470   :  { %4142 = vmatprep.subr.bf16.mxu0 %v7024_v10  ;;  %4206 = vmatprep.subr.bf16.mxu1 %v7139_v2  ;;  %5114 = vpow2.f32 %v3379_v7  ;;  %v7150_v7 = vld [vmem:[#allocation93_spill] sm:$0xff] }
 0x471   :  { %5116 = vtanh.f32 %v1759_v4 }
 0x473   :  { %4144 = vmatpush1.bf16.msra.mxu0 %v7141_v6  ;;  %4208 = vmatpush1.bf16.msra.mxu1 %v7027_v35 }
 0x474   :  { %4146 = vmatprep.subr.bf16.mxu0 %v7142_v21  ;;  %4210 = vmatprep.subr.bf16.mxu1 %v7143_v62 }
 0x477   :  { %4148 = vmatpush1.bf16.msra.mxu0 %v7144_v48  ;;  %4212 = vmatpush1.bf16.msra.mxu1 %v7145_v5 }
 0x478   :  { %v5111_v10 = vpop.eup %5110  ;;  %4150 = vmatprep.subr.bf16.mxu0 %v7146_v55  ;;  %4214 = vmatprep.subr.bf16.mxu1 %v7090_v36  ;;  %v7149_v55 = vld [vmem:[#allocation90_spill] sm:$0xff] }
 0x479   :  { %v5113_v57 = vpop.eup %5112  ;;  %v1766_v6 = vadd.f32 1.0, %v5111_v10 }
 0x47a   :  { %v1772_v35 = vadd.f32 1.0, %v5113_v57  ;;  %v5115_v10 = vpop.eup %5114 }
 0x47b   :  { %5118 = vrcp.f32 %v1766_v6  ;;  %4152 = vmatpush1.bf16.msra.mxu0 %v7091_v22  ;;  %4216 = vmatpush1.bf16.msra.mxu1 %v7092_v15  ;;  %v5117_v6 = vpop.eup %5116 }
 0x47c   :  { %5120 = vrcp.f32 %v1772_v35  ;;  %4154 = vmatprep.subr.bf16.mxu0 %v7093_v41  ;;  %4218 = vmatprep.subr.bf16.mxu1 %v7147_v51 }
 0x47f   :  { %4156 = vmatpush1.bf16.msra.mxu0 %v7148_v49  ;;  %4220 = vmatpush1.bf16.msra.mxu1 %v7149_v55  ;;  %v1779_v49 = vadd.f32 1.0, %v5115_v10  ;;  %v7152_v10 = vld [vmem:[#allocation23_spill] sm:$0xff] }
 0x480   :  { %4158 = vmatprep.subr.bf16.mxu0 %v7097_v23  ;;  %4222 = vmatprep.subr.bf16.mxu1 %v7098_v26 }
 0x481   :  { %5122 = vrcp.f32 %v1779_v49 }
 0x483   :  { %4160 = vmatpush1.bf16.msra.mxu0 %v7150_v7  ;;  %4224 = vmatpush1.bf16.msra.mxu1 %v7043_v19 }
 0x484   :  { %4162 = vmatprep.subr.bf16.mxu0 %v7044_v60  ;;  %4226 = vmatprep.subr.bf16.mxu1 %v7045_v3 }
 0x485   :  { %v5119_v35 = vpop.eup %5118 }
 0x486   :  { %v5121_v4 = vpop.eup %5120  ;;  %v1783_v57 = vmul.f32 %v5119_v35, %v5117_v6  ;;  %v7153_v6 = vld [vmem:[#allocation24_spill] sm:$0xff]  ;;  %v7154_v35 = vld [vmem:[#allocation25_spill] sm:$0xff] }
 0x487   :  { %v1782_v55 = vmul.f32 %v5121_v4, %v6072_v58  ;;  %4164 = vmatpush1.bf16.msra.mxu0 %v7046_v52  ;;  %4228 = vmatpush1.bf16.msra.mxu1 %v7047_v14  ;;  %v7155_v4 = vld [vmem:[#allocation26_spill] sm:$0xff] }
 0x488   :  { %4166 = vmatprep.subr.bf16.mxu0 %v5789_v63  ;;  %4230 = vmatprep.subr.bf16.mxu1 %v5791_v9 }
 0x489   :  { %v6192_v19 = vadd.f32 %v1783_v57, %v1782_v55  ;;  %v7156_v57 = vld [vmem:[#allocation27_spill] sm:$0xff] }
 0x48b   :  { %4168 = vmatpush1.bf16.msra.mxu0 %v5795_v17  ;;  %4232 = vmatpush1.bf16.msra.mxu1 %v5797_v32  ;;  %5124 = vtanh.f32 %v6192_v19  ;;  %v5123_v58 = vpop.eup %5122 }
 0x48c   :  { %4170 = vmatprep.subr.bf16.mxu0 %v5801_v40  ;;  %4234 = vmatprep.subr.bf16.mxu1 %v5803_v47 }
 0x48f   :  { %4172 = vmatpush1.bf16.msra.mxu0 %v5807_v53  ;;  %4236 = vmatpush1.bf16.msra.mxu1 %v5809_v56 }
 0x490   :  { %4174 = vmatprep.subr.bf16.mxu0 %v5813_v44  ;;  %4238 = vmatprep.subr.bf16.mxu1 %v5815_v28 }
 0x493   :  { %4176 = vmatpush1.bf16.msra.mxu0 %v5819_v30  ;;  %4240 = vmatpush1.bf16.msra.mxu1 %v5821_v34 }
 0x494   :  { %4242 = vmatprep.subr.bf16.mxu0 %v5414_v11  ;;  %4274 = vmatprep.subr.bf16.mxu1 %v5416_v12 }
 0x495   :  { %v5125_v55 = vpop.eup %5124 }
 0x496   :  { %v1786_v49 = vmul.f32 %v5125_v55, %v5123_v58  ;;  %v7157_v58 = vld [vmem:[#allocation28_spill] sm:$0xff]  ;;  %v7158_v55 = vld [vmem:[#allocation29_spill] sm:$0xff] }
 0x498   :  { %2026 = vmatprep.mubr.f32.mxu0 %v1786_v49  ;;  %2097 = vmatprep.mubr.f32.mxu1 %v1786_v49  ;;  %v7159_v49 = vld [vmem:[#allocation30_spill] sm:$0xff] }
 0x499   :  { %2027 = vmatmul.mubr.f32.vlgmr.msra.gmra.mrb[22].mxu0 %v6131_v8  ;;  %2098 = vmatmul.mubr.f32.vlgmr.msra.gmra.mrb[22].mxu1 %v6131_v8  ;;  %v7151_v8 = vld [vmem:[#allocation22_spill] sm:$0xff] }
 0x49a   :  { %4244 = vmatpush1.bf16.msra.mxu0 %v5418_v16  ;;  %4276 = vmatpush1.bf16.msra.mxu1 %v5427_v20 }
 0x49b   :  { %4246 = vmatprep.subr.bf16.mxu0 %v5430_v24  ;;  %4278 = vmatprep.subr.bf16.mxu1 %v5432_v25 }
 0x49c   :  { %2197 = vmatprep.mubr.f32.mxu0 %v6936_v0  ;;  %2268 = vmatprep.mubr.f32.mxu1 %v6936_v0 }
 0x49e   :  { %4248 = vmatpush1.bf16.msra.mxu0 %v5436_v29  ;;  %4280 = vmatpush1.bf16.msra.mxu1 %v5443_v33 }
 0x49f   :  { %4250 = vmatprep.subr.bf16.mxu0 %v5447_v37  ;;  %4282 = vmatprep.subr.bf16.mxu1 %v5449_v38  ;;  %v7173_v38 = vld [vmem:[#allocation45_spill] sm:$0xff] }
 0x4a2   :  { %4252 = vmatpush1.bf16.msra.mxu0 %v5453_v42  ;;  %4284 = vmatpush1.bf16.msra.mxu1 %v5460_v46  ;;  %v7160_v42 = vld [vmem:[#allocation31_spill] sm:$0xff]  ;;  %v7161_v46 = vld [vmem:[#allocation32_spill] sm:$0xff] }
 0x4a3   :  { %4254 = vmatprep.subr.bf16.mxu0 %v7151_v8  ;;  %4286 = vmatprep.subr.bf16.mxu1 %v7152_v10  ;;  %v7162_v8 = vld [vmem:[#allocation33_spill] sm:$0xff]  ;;  %v7163_v10 = vld [vmem:[#allocation34_spill] sm:$0xff] }
 0x4a6   :  { %4256 = vmatpush1.bf16.msra.mxu0 %v7153_v6  ;;  %4288 = vmatpush1.bf16.msra.mxu1 %v7154_v35  ;;  %v7164_v6 = vld [vmem:[#allocation35_spill] sm:$0xff]  ;;  %v7165_v35 = vld [vmem:[#allocation36_spill] sm:$0xff] }
 0x4a7   :  { %4258 = vmatprep.subr.bf16.mxu0 %v7155_v4  ;;  %4290 = vmatprep.subr.bf16.mxu1 %v7156_v57  ;;  %v7166_v4 = vld [vmem:[#allocation37_spill] sm:$0xff]  ;;  %v7167_v57 = vld [vmem:[#allocation38_spill] sm:$0xff] }
 0x4aa   :  { %4260 = vmatpush1.bf16.msra.mxu0 %v7157_v58  ;;  %4292 = vmatpush1.bf16.msra.mxu1 %v7158_v55  ;;  %v7168_v58 = vld [vmem:[#allocation39_spill] sm:$0xff]  ;;  %v7169_v55 = vld [vmem:[#allocation40_spill] sm:$0xff] }
 0x4ab   :  { %4262 = vmatprep.subr.bf16.mxu0 %v7159_v49  ;;  %4294 = vmatprep.subr.bf16.mxu1 %v7160_v42  ;;  %v7170_v49 = vld [vmem:[#allocation41_spill] sm:$0xff]  ;;  %v7171_v42 = vld [vmem:[#allocation42_spill] sm:$0xff] }
 0x4ae   :  { %4264 = vmatpush1.bf16.msra.mxu0 %v7161_v46  ;;  %4296 = vmatpush1.bf16.msra.mxu1 %v7162_v8  ;;  %v7172_v46 = vld [vmem:[#allocation43_spill] sm:$0xff] }
 0x4af   :  { %4266 = vmatprep.subr.bf16.mxu0 %v7163_v10  ;;  %4298 = vmatprep.subr.bf16.mxu1 %v7164_v6 }
 0x4b2   :  { %4268 = vmatpush1.bf16.msra.mxu0 %v7165_v35  ;;  %4300 = vmatpush1.bf16.msra.mxu1 %v7166_v4 }
 0x4b3   :  { %4270 = vmatprep.subr.bf16.mxu0 %v7167_v57  ;;  %4302 = vmatprep.subr.bf16.mxu1 %v7168_v58 }
 0x4b6   :  { %4272 = vmatpush1.bf16.msra.mxu0 %v7169_v55  ;;  %4304 = vmatpush1.bf16.msra.mxu1 %v7170_v49 }
 0x4b7   :  { %4306 = vmatprep.subr.bf16.mxu0 %v7171_v42  ;;  %4370 = vmatprep.subr.bf16.mxu1 %v7172_v46 }
 0x529   :  { %v1858_v8 = vpop.f32.mrb[8].mxu0  ;;  %v1929_v10 = vpop.f32.mrb[8].mxu1 }
 0x52a   :  { %v4953_v6 = vadd.f32 %v1858_v8, %v7173_v38  ;;  %v1860_v37 = vpop.f32.mrb[9].mxu0  ;;  %v1931_v35 = vpop.f32.mrb[9].mxu1  ;;  %v4969_v49 = vadd.f32 %v1929_v10, %v7054_v1 }
 0x52b   :  { %v4954_v4 = vadd.f32 %v1860_v37, %v7114_v61  ;;  %v4970_v55 = vadd.f32 %v1931_v35, %v7053_v59 }
 0x52c   :  { %v3380_v33 = vmul.f32 -1.442695, %v4953_v6 }
 0x52d   :  { %v3381_v57 = vmul.f32 -1.442695, %v4954_v4  ;;  %v3382_v58 = vmul.f32 -1.442695, %v4970_v55  ;;  %v7179_v55 = vld [vmem:[#allocation57_spill] sm:$0xff] }
 0x52e   :  { %5126 = vpow2.f32 %v3380_v33 }
 0x52f   :  { %5128 = vpow2.f32 %v3381_v57 }
 0x530   :  { %5130 = vpow2.f32 %v3382_v58 }
 0x531   :  { %5132 = vtanh.f32 %v4969_v49  ;;  %v7180_v49 = vld [vmem:[#allocation58_spill] sm:$0xff] }
 0x538   :  { %v5127_v42 = vpop.eup %5126 }
 0x539   :  { %v5129_v29 = vpop.eup %5128  ;;  %v1941_v46 = vadd.f32 1.0, %v5127_v42 }
 0x53a   :  { %v1947_v0 = vadd.f32 1.0, %v5129_v29  ;;  %v5131_v8 = vpop.eup %5130  ;;  %v7174_v29 = vld [vmem:[#allocation52_spill] sm:$0xff] }
 0x53b   :  { %5134 = vrcp.f32 %v1941_v46  ;;  %v5133_v38 = vpop.eup %5132  ;;  %v1954_v33 = vadd.f32 1.0, %v5131_v8  ;;  %v7176_v46 = vld [vmem:[#allocation54_spill] sm:$0xff]  ;;  %v7181_v8 = vld [vmem:[#allocation59_spill] sm:$0xff] }
 0x53c   :  { %5136 = vrcp.f32 %v1947_v0  ;;  %v7177_v0 = vld [vmem:[#allocation55_spill] sm:$0xff] }
 0x53d   :  { %5138 = vrcp.f32 %v1954_v33  ;;  %v7185_v33 = vld [vmem:[#allocation63_spill] sm:$0xff] }
 0x545   :  { %v5135_v37 = vpop.eup %5134 }
 0x546   :  { %v5137_v6 = vpop.eup %5136  ;;  %v1958_v4 = vmul.f32 %v5135_v37, %v5133_v38  ;;  %v7175_v38 = vld [vmem:[#allocation53_spill] sm:$0xff]  ;;  %v7182_v37 = vld [vmem:[#allocation60_spill] sm:$0xff] }
 0x547   :  { %v1957_v57 = vmul.f32 %v5137_v6, %v6128_v39  ;;  %v5139_v10 = vpop.eup %5138  ;;  %v7178_v39 = vld [vmem:[#allocation56_spill] sm:$0xff]  ;;  %v7183_v6 = vld [vmem:[#allocation61_spill] sm:$0xff] }
 0x549   :  { %v6248_v35 = vadd.f32 %v1958_v4, %v1957_v57  ;;  %v7184_v4 = vld [vmem:[#allocation62_spill] sm:$0xff]  ;;  %v7186_v57 = vld [vmem:[#allocation64_spill] sm:$0xff] }
 0x54b   :  { %5140 = vtanh.f32 %v6248_v35 }
 0x555   :  { %v5141_v42 = vpop.eup %5140 }
 0x556   :  { %v6251_v58 = vmul.f32 %v5141_v42, %v5139_v10  ;;  %v7187_v10 = vld [vmem:[#allocation65_spill] sm:$0xff]  ;;  %v7188_v42 = vld [vmem:[#allocation66_spill] sm:$0xff] }
 0x558   :  { %2198 = vmatmul.mubr.f32.vlgmr.msra.gmra.mrb[10].mxu0 %v6251_v58  ;;  %2269 = vmatmul.mubr.f32.vlgmr.msra.gmra.mrb[10].mxu1 %v6251_v58 }
 0x559   :  { %4308 = vmatpush1.bf16.msra.mxu0 %v7056_v18  ;;  %4372 = vmatpush1.bf16.msra.mxu1 %v7115_v50 }
 0x55a   :  { %4310 = vmatprep.subr.bf16.mxu0 %v7116_v54  ;;  %4374 = vmatprep.subr.bf16.mxu1 %v7174_v29 }
 0x55d   :  { %4312 = vmatpush1.bf16.msra.mxu0 %v7175_v38  ;;  %4376 = vmatpush1.bf16.msra.mxu1 %v7176_v46  ;;  %v7191_v46 = vld [vmem:[#allocation69_spill] sm:$0xff] }
 0x55e   :  { %4314 = vmatprep.subr.bf16.mxu0 %v7177_v0  ;;  %4378 = vmatprep.subr.bf16.mxu1 %v7178_v39  ;;  %v7189_v39 = vld [vmem:[#allocation67_spill] sm:$0xff] }
 0x561   :  { %4316 = vmatpush1.bf16.msra.mxu0 %v7179_v55  ;;  %4380 = vmatpush1.bf16.msra.mxu1 %v7180_v49  ;;  %v7190_v55 = vld [vmem:[#allocation68_spill] sm:$0xff] }
 0x562   :  { %4318 = vmatprep.subr.bf16.mxu0 %v7181_v8  ;;  %4382 = vmatprep.subr.bf16.mxu1 %v7182_v37 }
 0x565   :  { %4320 = vmatpush1.bf16.msra.mxu0 %v7183_v6  ;;  %4384 = vmatpush1.bf16.msra.mxu1 %v7184_v4  ;;  %v7195_v4 = vld [vmem:[#allocation74_spill] sm:$0xff] }
 0x566   :  { %4322 = vmatprep.subr.bf16.mxu0 %v7185_v33  ;;  %4386 = vmatprep.subr.bf16.mxu1 %v7186_v57  ;;  %v7192_v33 = vld [vmem:[#allocation110_spill] sm:$0xff] }
 0x569   :  { %4324 = vmatpush1.bf16.msra.mxu0 %v7187_v10  ;;  %4388 = vmatpush1.bf16.msra.mxu1 %v7188_v42  ;;  %v7193_v10 = vld [vmem:[#allocation72_spill] sm:$0xff] }
 0x56a   :  { %4326 = vmatprep.subr.bf16.mxu0 %v7189_v39  ;;  %4390 = vmatprep.subr.bf16.mxu1 %v7190_v55  ;;  %v7194_v55 = vld [vmem:[#allocation73_spill] sm:$0xff] }
 0x56c   :  { %v2028_v49 = vpop.f32.mrb[22].mxu0  ;;  %v2099_v8 = vpop.f32.mrb[22].mxu1 }
 0x56d   :  { %v2029_v37 = vadd.f32 %v2028_v49, %v7133_v43  ;;  %v2030_v0 = vpop.f32.mrb[23].mxu0  ;;  %v2101_v6 = vpop.f32.mrb[23].mxu1  ;;  %4328 = vmatpush1.bf16.msra.mxu0 %v7191_v46  ;;  %4392 = vmatpush1.bf16.msra.mxu1 %v7134_v13  ;;  %v7196_v49 = vld [vmem:[#allocation75_spill] sm:$0xff]  ;;  %v7197_v13 = vld [vmem:[#allocation77_spill] sm:$0xff] }
 0x56e   :  { %v2031_v57 = vadd.f32 %v2030_v0, %v7192_v33  ;;  %4330 = vmatprep.subr.bf16.mxu0 %v7135_v31  ;;  %4394 = vmatprep.subr.bf16.mxu1 %v7193_v10  ;;  %v2102_v43 = vadd.f32 %v2101_v6, %v7140_v45  ;;  %v7198_v0 = vld [vmem:[#allocation78_spill] sm:$0xff] }
 0x56f   :  { %v3383_v42 = vmul.f32 -1.442695, %v2029_v37 }
 0x570   :  { %v3384_v39 = vmul.f32 -1.442695, %v2031_v57  ;;  %v3385_v37 = vmul.f32 -1.442695, %v2102_v43  ;;  %v2100_v57 = vadd.f32 %v2099_v8, %v7086_v27  ;;  %v7200_v43 = vld [vmem:[#allocation89_spill] sm:$0xff]  ;;  %v7201_v8 = vld [vmem:[#allocation90_spill] sm:$0xff] }
 0x571   :  { %5142 = vpow2.f32 %v3383_v42  ;;  %4332 = vmatpush1.bf16.msra.mxu0 %v7194_v55  ;;  %4396 = vmatpush1.bf16.msra.mxu1 %v7195_v4 }
 0x572   :  { %5144 = vpow2.f32 %v3384_v39  ;;  %4334 = vmatprep.subr.bf16.mxu0 %v7196_v49  ;;  %4398 = vmatprep.subr.bf16.mxu1 %v7139_v2  ;;  %v7199_v39 = vld [vmem:[#allocation83_spill] sm:$0xff] }
 0x573   :  { %5146 = vpow2.f32 %v3385_v37  ;;  %v7202_v37 = vld [vmem:[#allocation94_spill] sm:$0xff] }
 0x574   :  { %5148 = vtanh.f32 %v2100_v57 }
 0x575   :  { %4336 = vmatpush1.bf16.msra.mxu0 %v7197_v13  ;;  %4400 = vmatpush1.bf16.msra.mxu1 %v7198_v0 }
 0x576   :  { %4338 = vmatprep.subr.bf16.mxu0 %v7142_v21  ;;  %4402 = vmatprep.subr.bf16.mxu1 %v7143_v62 }
 0x579   :  { %4340 = vmatpush1.bf16.msra.mxu0 %v7144_v48  ;;  %4404 = vmatpush1.bf16.msra.mxu1 %v7145_v5 }
 0x57a   :  { %4342 = vmatprep.subr.bf16.mxu0 %v7199_v39  ;;  %4406 = vmatprep.subr.bf16.mxu1 %v7090_v36 }
 0x57b   :  { %v5143_v6 = vpop.eup %5142 }
 0x57c   :  { %v5145_v42 = vpop.eup %5144  ;;  %v2107_v13 = vadd.f32 1.0, %v5143_v6 }
 0x57d   :  { %v2113_v0 = vadd.f32 1.0, %v5145_v42  ;;  %4344 = vmatpush1.bf16.msra.mxu0 %v7091_v22  ;;  %4408 = vmatpush1.bf16.msra.mxu1 %v7092_v15  ;;  %v5147_v57 = vpop.eup %5146 }
 0x57e   :  { %5150 = vrcp.f32 %v2107_v13  ;;  %4346 = vmatprep.subr.bf16.mxu0 %v7093_v41  ;;  %4410 = vmatprep.subr.bf16.mxu1 %v7147_v51  ;;  %v5149_v13 = vpop.eup %5148 }
 0x57f   :  { %5152 = vrcp.f32 %v2113_v0 }
 0x581   :  { %4348 = vmatpush1.bf16.msra.mxu0 %v7200_v43  ;;  %4412 = vmatpush1.bf16.msra.mxu1 %v7201_v8  ;;  %v2120_v43 = vadd.f32 1.0, %v5147_v57  ;;  %v7203_v57 = vmov 0.0  }
 0x582   :  { %4350 = vmatprep.subr.bf16.mxu0 %v7097_v23  ;;  %4414 = vmatprep.subr.bf16.mxu1 %v7098_v26 }
 0x583   :  { %5154 = vrcp.f32 %v2120_v43 }
 0x585   :  { %4352 = vmatpush1.bf16.msra.mxu0 %v7150_v7  ;;  %4416 = vmatpush1.bf16.msra.mxu1 %v7202_v37 }
 0x586   :  { %4354 = vmatprep.subr.bf16.mxu0 %v7044_v60  ;;  %4418 = vmatprep.subr.bf16.mxu1 %v7045_v3 }
 0x588   :  { %v5151_v6 = vpop.eup %5150 }
 0x589   :  { %v5153_v0 = vpop.eup %5152  ;;  %v2124_v42 = vmul.f32 %v5151_v6, %v5149_v13  ;;  %4356 = vmatpush1.bf16.msra.mxu0 %v7046_v52  ;;  %4420 = vmatpush1.bf16.msra.mxu1 %v7047_v14  ;;  %v7204_v13 = vld [vmem:[#allocation16_spill] sm:$0xff]  ;;  %v7205_v6 = vld [vmem:[#allocation17_spill] sm:$0xff] }
 0x58a   :  { %v2123_v26 = vmul.f32 %v5153_v0, %v6192_v19  ;;  %4358 = vmatprep.subr.bf16.mxu0 %v5789_v63  ;;  %4422 = vmatprep.subr.bf16.mxu1 %v5791_v9  ;;  %v7206_v0 = vld [vmem:[#allocation18_spill] sm:$0xff] }
 0x58c   :  { %v6312_v37 = vadd.f32 %v2124_v42, %v2123_v26  ;;  %v7207_v42 = vld [vmem:[#allocation19_spill] sm:$0xff] }
 0x58d   :  { %4360 = vmatpush1.bf16.msra.mxu0 %v5795_v17  ;;  %4424 = vmatpush1.bf16.msra.mxu1 %v5797_v32  ;;  %v5155_v19 = vpop.eup %5154 }
 0x58e   :  { %4362 = vmatprep.subr.bf16.mxu0 %v5801_v40  ;;  %4426 = vmatprep.subr.bf16.mxu1 %v5803_v47  ;;  %5156 = vtanh.f32 %v6312_v37 }
 0x591   :  { %4364 = vmatpush1.bf16.msra.mxu0 %v5807_v53  ;;  %4428 = vmatpush1.bf16.msra.mxu1 %v5809_v56 }
 0x592   :  { %4366 = vmatprep.subr.bf16.mxu0 %v5813_v44  ;;  %4430 = vmatprep.subr.bf16.mxu1 %v5815_v28 }
 0x595   :  { %4368 = vmatpush1.bf16.msra.mxu0 %v5819_v30  ;;  %4432 = vmatpush1.bf16.msra.mxu1 %v5821_v34 }
 0x596   :  { %4434 = vmatprep.subr.bf16.mxu0 %v5414_v11  ;;  %4466 = vmatprep.subr.bf16.mxu1 %v5416_v12 }
 0x598   :  { %v5157_v26 = vpop.eup %5156 }
 0x599   :  { %v2127_v43 = vmul.f32 %v5157_v26, %v5155_v19  ;;  %v7209_v19 = vld [vmem:[#allocation21_spill] sm:$0xff]  ;;  %v7210_v26 = vld [vmem:[#allocation22_spill] sm:$0xff] }
 0x59b   :  { %2367 = vmatprep.mubr.f32.mxu0 %v2127_v43  ;;  %2438 = vmatprep.mubr.f32.mxu1 %v2127_v43  ;;  %v7211_v43 = vld [vmem:[#allocation23_spill] sm:$0xff] }
 0x59c   :  { %2368 = vmatmul.mubr.f32.vlgmr.msra.gmra.mrb[24].mxu0 %v6251_v58  ;;  %2439 = vmatmul.mubr.f32.vlgmr.msra.gmra.mrb[24].mxu1 %v6251_v58  ;;  %v7208_v58 = vld [vmem:[#allocation20_spill] sm:$0xff] }
 0x59d   :  { %4436 = vmatpush1.bf16.msra.mxu0 %v5418_v16  ;;  %4468 = vmatpush1.bf16.msra.mxu1 %v5427_v20  ;;  %v7232_v20 = vld [vmem:[#allocation45_spill] sm:$0xff] }
 0x59e   :  { %4438 = vmatprep.subr.bf16.mxu0 %v5430_v24  ;;  %4470 = vmatprep.subr.bf16.mxu1 %v5432_v25  ;;  %v7212_v25 = vld [vmem:[#allocation24_spill] sm:$0xff]  ;;  %v7213_v24 = vld [vmem:[#allocation25_spill] sm:$0xff] }
 0x59f   :  { %2538 = vmatprep.mubr.f32.mxu0 %v7203_v57  ;;  %2609 = vmatprep.mubr.f32.mxu1 %v7203_v57  ;;  %v7214_v57 = vld [vmem:[#allocation26_spill] sm:$0xff] }
 0x5a1   :  { %4440 = vmatpush1.bf16.msra.mxu0 %v7204_v13  ;;  %4472 = vmatpush1.bf16.msra.mxu1 %v7205_v6  ;;  %v7215_v13 = vld [vmem:[#allocation27_spill] sm:$0xff]  ;;  %v7216_v6 = vld [vmem:[#allocation28_spill] sm:$0xff] }
 0x5a2   :  { %4442 = vmatprep.subr.bf16.mxu0 %v7206_v0  ;;  %4474 = vmatprep.subr.bf16.mxu1 %v7207_v42  ;;  %v7217_v0 = vld [vmem:[#allocation29_spill] sm:$0xff]  ;;  %v7218_v42 = vld [vmem:[#allocation30_spill] sm:$0xff] }
 0x5a5   :  { %4444 = vmatpush1.bf16.msra.mxu0 %v7208_v58  ;;  %4476 = vmatpush1.bf16.msra.mxu1 %v7209_v19  ;;  %v7219_v58 = vld [vmem:[#allocation31_spill] sm:$0xff]  ;;  %v7220_v19 = vld [vmem:[#allocation32_spill] sm:$0xff] }
 0x5a6   :  { %4446 = vmatprep.subr.bf16.mxu0 %v7210_v26  ;;  %4478 = vmatprep.subr.bf16.mxu1 %v7211_v43  ;;  %v7221_v26 = vld [vmem:[#allocation33_spill] sm:$0xff]  ;;  %v7222_v43 = vld [vmem:[#allocation34_spill] sm:$0xff] }
 0x5a9   :  { %4448 = vmatpush1.bf16.msra.mxu0 %v7212_v25  ;;  %4480 = vmatpush1.bf16.msra.mxu1 %v7213_v24  ;;  %v7223_v25 = vld [vmem:[#allocation35_spill] sm:$0xff]  ;;  %v7224_v24 = vld [vmem:[#allocation36_spill] sm:$0xff] }
 0x5aa   :  { %4450 = vmatprep.subr.bf16.mxu0 %v7214_v57  ;;  %4482 = vmatprep.subr.bf16.mxu1 %v7215_v13  ;;  %v7225_v57 = vld [vmem:[#allocation37_spill] sm:$0xff]  ;;  %v7226_v13 = vld [vmem:[#allocation38_spill] sm:$0xff] }
 0x5ad   :  { %4452 = vmatpush1.bf16.msra.mxu0 %v7216_v6  ;;  %4484 = vmatpush1.bf16.msra.mxu1 %v7217_v0  ;;  %v7227_v6 = vld [vmem:[#allocation39_spill] sm:$0xff]  ;;  %v7228_v0 = vld [vmem:[#allocation40_spill] sm:$0xff] }
 0x5ae   :  { %4454 = vmatprep.subr.bf16.mxu0 %v7218_v42  ;;  %4486 = vmatprep.subr.bf16.mxu1 %v7219_v58  ;;  %v7229_v42 = vld [vmem:[#allocation41_spill] sm:$0xff]  ;;  %v7230_v58 = vld [vmem:[#allocation42_spill] sm:$0xff] }
 0x5b1   :  { %4456 = vmatpush1.bf16.msra.mxu0 %v7220_v19  ;;  %4488 = vmatpush1.bf16.msra.mxu1 %v7221_v26  ;;  %v7231_v19 = vld [vmem:[#allocation43_spill] sm:$0xff] }
 0x5b2   :  { %4458 = vmatprep.subr.bf16.mxu0 %v7222_v43  ;;  %4490 = vmatprep.subr.bf16.mxu1 %v7223_v25 }
 0x5b5   :  { %4460 = vmatpush1.bf16.msra.mxu0 %v7224_v24  ;;  %4492 = vmatpush1.bf16.msra.mxu1 %v7225_v57 }
 0x5b6   :  { %4462 = vmatprep.subr.bf16.mxu0 %v7226_v13  ;;  %4494 = vmatprep.subr.bf16.mxu1 %v7227_v6 }
 0x5b9   :  { %4464 = vmatpush1.bf16.msra.mxu0 %v7228_v0  ;;  %4496 = vmatpush1.bf16.msra.mxu1 %v7229_v42 }
 0x5ba   :  { %4498 = vmatprep.subr.bf16.mxu0 %v7230_v58  ;;  %4562 = vmatprep.subr.bf16.mxu1 %v7231_v19 }
 0x62b   :  { %v2199_v26 = vpop.f32.mrb[10].mxu0  ;;  %v2270_v43 = vpop.f32.mrb[10].mxu1 }
 0x62c   :  { %v4955_v25 = vadd.f32 %v2199_v26, %v7232_v20  ;;  %v2201_v16 = vpop.f32.mrb[11].mxu0  ;;  %v2272_v24 = vpop.f32.mrb[11].mxu1  ;;  %v4971_v42 = vadd.f32 %v2270_v43, %v7054_v1  ;;  %v7239_v43 = vld [vmem:[#allocation60_spill] sm:$0xff] }
 0x62d   :  { %v4956_v57 = vadd.f32 %v2201_v16, %v7114_v61  ;;  %v4972_v0 = vadd.f32 %v2272_v24, %v7053_v59 }
 0x62e   :  { %v3386_v12 = vmul.f32 -1.442695, %v4955_v25 }
 0x62f   :  { %v3387_v13 = vmul.f32 -1.442695, %v4956_v57  ;;  %v3388_v6 = vmul.f32 -1.442695, %v4972_v0 }
 0x630   :  { %5158 = vpow2.f32 %v3386_v12 }
 0x631   :  { %5160 = vpow2.f32 %v3387_v13 }
 0x632   :  { %5162 = vpow2.f32 %v3388_v6 }
 0x633   :  { %5164 = vtanh.f32 %v4971_v42  ;;  %v7237_v42 = vld [vmem:[#allocation58_spill] sm:$0xff] }
 0x63a   :  { %v5159_v58 = vpop.eup %5158 }
 0x63b   :  { %v5161_v11 = vpop.eup %5160  ;;  %v2282_v19 = vadd.f32 1.0, %v5159_v58 }
 0x63c   :  { %v2288_v34 = vadd.f32 1.0, %v5161_v11  ;;  %v5163_v26 = vpop.eup %5162  ;;  %v7233_v11 = vld [vmem:[#allocation54_spill] sm:$0xff] }
 0x63d   :  { %5166 = vrcp.f32 %v2282_v19  ;;  %v5165_v20 = vpop.eup %5164  ;;  %v2295_v12 = vadd.f32 1.0, %v5163_v26  ;;  %v7238_v19 = vld [vmem:[#allocation59_spill] sm:$0xff]  ;;  %v7240_v26 = vld [vmem:[#allocation61_spill] sm:$0xff] }
 0x63e   :  { %5168 = vrcp.f32 %v2288_v34  ;;  %v7235_v34 = vld [vmem:[#allocation56_spill] sm:$0xff] }
 0x63f   :  { %5170 = vrcp.f32 %v2295_v12  ;;  %v7244_v12 = vld [vmem:[#allocation65_spill] sm:$0xff] }
 0x647   :  { %v5167_v16 = vpop.eup %5166 }
 0x648   :  { %v5169_v25 = vpop.eup %5168  ;;  %v2299_v57 = vmul.f32 %v5167_v16, %v5165_v20  ;;  %v7234_v20 = vld [vmem:[#allocation55_spill] sm:$0xff]  ;;  %v7241_v16 = vld [vmem:[#allocation62_spill] sm:$0xff] }
 0x649   :  { %v2298_v13 = vmul.f32 %v5169_v25, %v6248_v35  ;;  %v5171_v0 = vpop.eup %5170  ;;  %v7236_v35 = vld [vmem:[#allocation57_spill] sm:$0xff]  ;;  %v7242_v25 = vld [vmem:[#allocation63_spill] sm:$0xff] }
 0x64b   :  { %v6368_v24 = vadd.f32 %v2299_v57, %v2298_v13  ;;  %v7243_v57 = vld [vmem:[#allocation64_spill] sm:$0xff]  ;;  %v7245_v13 = vld [vmem:[#allocation66_spill] sm:$0xff] }
 0x64d   :  { %5172 = vtanh.f32 %v6368_v24 }
 0x657   :  { %v5173_v58 = vpop.eup %5172 }
 0x658   :  { %v6371_v6 = vmul.f32 %v5173_v58, %v5171_v0  ;;  %v7246_v0 = vld [vmem:[#allocation67_spill] sm:$0xff]  ;;  %v7247_v58 = vld [vmem:[#allocation68_spill] sm:$0xff] }
 0x65a   :  { %2539 = vmatmul.mubr.f32.vlgmr.msra.gmra.mrb[12].mxu0 %v6371_v6  ;;  %2610 = vmatmul.mubr.f32.vlgmr.msra.gmra.mrb[12].mxu1 %v6371_v6 }
 0x65b   :  { %4500 = vmatpush1.bf16.msra.mxu0 %v7056_v18  ;;  %4564 = vmatpush1.bf16.msra.mxu1 %v7115_v50 }
 0x65c   :  { %4502 = vmatprep.subr.bf16.mxu0 %v7116_v54  ;;  %4566 = vmatprep.subr.bf16.mxu1 %v7174_v29 }
 0x65f   :  { %4504 = vmatpush1.bf16.msra.mxu0 %v7175_v38  ;;  %4568 = vmatpush1.bf16.msra.mxu1 %v7233_v11 }
 0x660   :  { %4506 = vmatprep.subr.bf16.mxu0 %v7234_v20  ;;  %4570 = vmatprep.subr.bf16.mxu1 %v7235_v34 }
 0x663   :  { %4508 = vmatpush1.bf16.msra.mxu0 %v7236_v35  ;;  %4572 = vmatpush1.bf16.msra.mxu1 %v7237_v42 }
 0x664   :  { %4510 = vmatprep.subr.bf16.mxu0 %v7238_v19  ;;  %4574 = vmatprep.subr.bf16.mxu1 %v7239_v43  ;;  %v7248_v43 = vld [vmem:[#allocation70_spill] sm:$0xff] }
 0x667   :  { %4512 = vmatpush1.bf16.msra.mxu0 %v7240_v26  ;;  %4576 = vmatpush1.bf16.msra.mxu1 %v7241_v16  ;;  %v7249_v26 = vld [vmem:[#allocation44_spill] sm:$0xff] }
 0x668   :  { %4514 = vmatprep.subr.bf16.mxu0 %v7242_v25  ;;  %4578 = vmatprep.subr.bf16.mxu1 %v7243_v57 }
 0x66b   :  { %4516 = vmatpush1.bf16.msra.mxu0 %v7244_v12  ;;  %4580 = vmatpush1.bf16.msra.mxu1 %v7245_v13 }
 0x66c   :  { %4518 = vmatprep.subr.bf16.mxu0 %v7246_v0  ;;  %4582 = vmatprep.subr.bf16.mxu1 %v7247_v58 }
 0x66f   :  { %v2369_v42 = vpop.f32.mrb[24].mxu0  ;;  %v2440_v19 = vpop.f32.mrb[24].mxu1  ;;  %4520 = vmatpush1.bf16.msra.mxu0 %v7191_v46  ;;  %4584 = vmatpush1.bf16.msra.mxu1 %v7248_v43 }
 0x670   :  { %v2370_v16 = vadd.f32 %v2369_v42, %v7249_v26  ;;  %v2371_v35 = vpop.f32.mrb[25].mxu0  ;;  %v2442_v25 = vpop.f32.mrb[25].mxu1  ;;  %4522 = vmatprep.subr.bf16.mxu0 %v7135_v31  ;;  %4586 = vmatprep.subr.bf16.mxu1 %v7193_v10  ;;  %v7250_v26 = vld [vmem:[#allocation77_spill] sm:$0xff]  ;;  %v7251_v31 = vld [vmem:[#allocation78_spill] sm:$0xff] }
 0x671   :  { %v2372_v13 = vadd.f32 %v2371_v35, %v7192_v33  ;;  %v2443_v42 = vadd.f32 %v2442_v25, %v7140_v45 }
 0x672   :  { %v3389_v12 = vmul.f32 -1.442695, %v2370_v16  ;;  %v2441_v16 = vadd.f32 %v2440_v19, %v7086_v27  ;;  %v7252_v19 = vld [vmem:[#allocation89_spill] sm:$0xff] }
 0x673   :  { %v3390_v0 = vmul.f32 -1.442695, %v2372_v13  ;;  %4524 = vmatpush1.bf16.msra.mxu0 %v7194_v55  ;;  %4588 = vmatpush1.bf16.msra.mxu1 %v7195_v4  ;;  %v3391_v35 = vmul.f32 -1.442695, %v2443_v42  ;;  %v7253_v42 = vld [vmem:[#allocation92_spill] sm:$0xff] }
 0x674   :  { %5174 = vpow2.f32 %v3389_v12  ;;  %4526 = vmatprep.subr.bf16.mxu0 %v7196_v49  ;;  %4590 = vmatprep.subr.bf16.mxu1 %v7139_v2 }
 0x675   :  { %5176 = vpow2.f32 %v3390_v0 }
 0x676   :  { %5178 = vpow2.f32 %v3391_v35  ;;  %v7254_v35 = vld [vmem:[#allocation94_spill] sm:$0xff] }
 0x677   :  { %4528 = vmatpush1.bf16.msra.mxu0 %v7250_v26  ;;  %4592 = vmatpush1.bf16.msra.mxu1 %v7251_v31  ;;  %5180 = vtanh.f32 %v2441_v16 }
 0x678   :  { %4530 = vmatprep.subr.bf16.mxu0 %v7142_v21  ;;  %4594 = vmatprep.subr.bf16.mxu1 %v7143_v62 }
 0x67b   :  { %4532 = vmatpush1.bf16.msra.mxu0 %v7144_v48  ;;  %4596 = vmatpush1.bf16.msra.mxu1 %v7145_v5 }
 0x67c   :  { %4534 = vmatprep.subr.bf16.mxu0 %v7199_v39  ;;  %4598 = vmatprep.subr.bf16.mxu1 %v7090_v36 }
 0x67e   :  { %v5175_v25 = vpop.eup %5174 }
 0x67f   :  { %v5177_v12 = vpop.eup %5176  ;;  %v2448_v13 = vadd.f32 1.0, %v5175_v25  ;;  %4536 = vmatpush1.bf16.msra.mxu0 %v7091_v22  ;;  %4600 = vmatpush1.bf16.msra.mxu1 %v7092_v15 }
 0x680   :  { %v2454_v0 = vadd.f32 1.0, %v5177_v12  ;;  %4538 = vmatprep.subr.bf16.mxu0 %v7093_v41  ;;  %4602 = vmatprep.subr.bf16.mxu1 %v7147_v51  ;;  %v5179_v16 = vpop.eup %5178 }
 0x681   :  { %5182 = vrcp.f32 %v2448_v13  ;;  %v5181_v25 = vpop.eup %5180 }
 0x682   :  { %5184 = vrcp.f32 %v2454_v0 }
 0x683   :  { %4540 = vmatpush1.bf16.msra.mxu0 %v7252_v19  ;;  %4604 = vmatpush1.bf16.msra.mxu1 %v7201_v8 }
 0x684   :  { %4542 = vmatprep.subr.bf16.mxu0 %v7097_v23  ;;  %4606 = vmatprep.subr.bf16.mxu1 %v7253_v42  ;;  %v2461_v23 = vadd.f32 1.0, %v5179_v16 }
 0x686   :  { %5186 = vrcp.f32 %v2461_v23  ;;  %v7257_v23 = vld [vmem:[#allocation11_spill] sm:$0xff] }
 0x687   :  { %4544 = vmatpush1.bf16.msra.mxu0 %v7150_v7  ;;  %4608 = vmatpush1.bf16.msra.mxu1 %v7254_v35 }
 0x688   :  { %4546 = vmatprep.subr.bf16.mxu0 %v7044_v60  ;;  %4610 = vmatprep.subr.bf16.mxu1 %v7045_v3 }
 0x68b   :  { %v5183_v12 = vpop.eup %5182  ;;  %4548 = vmatpush1.bf16.msra.mxu0 %v7046_v52  ;;  %4612 = vmatpush1.bf16.msra.mxu1 %v7047_v14 }
 0x68c   :  { %v5185_v13 = vpop.eup %5184  ;;  %v2465_v0 = vmul.f32 %v5183_v12, %v5181_v25  ;;  %4550 = vmatprep.subr.bf16.mxu0 %v5789_v63  ;;  %4614 = vmatprep.subr.bf16.mxu1 %v5791_v9 }
 0x68d   :  { %v2464_v35 = vmul.f32 %v5185_v13, %v6312_v37  ;;  %v7255_v37 = vld [vmem:[#allocation108_spill] sm:$0xff] }
 0x68e   :  { %v7258_v13 = vld [vmem:[#allocation12_spill] sm:$0xff] }
 0x68f   :  { %4552 = vmatpush1.bf16.msra.mxu0 %v5795_v17  ;;  %4616 = vmatpush1.bf16.msra.mxu1 %v5797_v32  ;;  %v6434_v3 = vadd.f32 %v2465_v0, %v2464_v35  ;;  %v7256_v35 = vld [vmem:[#allocation10_spill] sm:$0xff]  ;;  %v7259_v0 = vld [vmem:[#allocation13_spill] sm:$0xff] }
 0x690   :  { %4554 = vmatprep.subr.bf16.mxu0 %v5801_v40  ;;  %4618 = vmatprep.subr.bf16.mxu1 %v5803_v47  ;;  %v5187_v16 = vpop.eup %5186 }
 0x691   :  { %5188 = vtanh.f32 %v6434_v3 }
 0x693   :  { %4556 = vmatpush1.bf16.msra.mxu0 %v5807_v53  ;;  %4620 = vmatpush1.bf16.msra.mxu1 %v5809_v56 }
 0x694   :  { %4558 = vmatprep.subr.bf16.mxu0 %v5813_v44  ;;  %4622 = vmatprep.subr.bf16.mxu1 %v5815_v28  ;;  %v7272_v28 = vld [vmem:[#allocation25_spill] sm:$0xff] }
 0x695   :  { %v7291_v44 = vld [vmem:[#allocation45_spill] sm:$0xff] }
 0x697   :  { %4560 = vmatpush1.bf16.msra.mxu0 %v5819_v30  ;;  %4624 = vmatpush1.bf16.msra.mxu1 %v7255_v37  ;;  %v7260_v30 = vld [vmem:[#allocation14_spill] sm:$0xff]  ;;  %v7261_v37 = vld [vmem:[#allocation15_spill] sm:$0xff] }
 0x698   :  { %4626 = vmatprep.subr.bf16.mxu0 %v7256_v35  ;;  %4658 = vmatprep.subr.bf16.mxu1 %v7257_v23  ;;  %v7262_v35 = vmov 0.0   ;;  %v7263_v23 = vld [vmem:[#allocation16_spill] sm:$0xff] }
 0x69b   :  { %v5189_v25 = vpop.eup %5188 }
 0x69c   :  { %v2468_v12 = vmul.f32 %v5189_v25, %v5187_v16  ;;  %v7264_v16 = vld [vmem:[#allocation17_spill] sm:$0xff]  ;;  %v7265_v25 = vld [vmem:[#allocation18_spill] sm:$0xff] }
 0x69e   :  { %2708 = vmatprep.mubr.f32.mxu0 %v2468_v12  ;;  %2779 = vmatprep.mubr.f32.mxu1 %v2468_v12  ;;  %v7266_v12 = vld [vmem:[#allocation19_spill] sm:$0xff] }
 0x69f   :  { %2709 = vmatmul.mubr.f32.vlgmr.msra.gmra.mrb[26].mxu0 %v6371_v6  ;;  %2780 = vmatmul.mubr.f32.vlgmr.msra.gmra.mrb[26].mxu1 %v6371_v6  ;;  %v7267_v6 = vld [vmem:[#allocation20_spill] sm:$0xff] }
 0x6a0   :  { %4628 = vmatpush1.bf16.msra.mxu0 %v7258_v13  ;;  %4660 = vmatpush1.bf16.msra.mxu1 %v7259_v0  ;;  %v7268_v13 = vld [vmem:[#allocation21_spill] sm:$0xff]  ;;  %v7269_v0 = vld [vmem:[#allocation22_spill] sm:$0xff] }
 0x6a1   :  { %4630 = vmatprep.subr.bf16.mxu0 %v7260_v30  ;;  %4662 = vmatprep.subr.bf16.mxu1 %v7261_v37  ;;  %v7270_v30 = vld [vmem:[#allocation23_spill] sm:$0xff]  ;;  %v7271_v37 = vld [vmem:[#allocation24_spill] sm:$0xff] }
 0x6a2   :  { %2879 = vmatprep.mubr.f32.mxu0 %v7262_v35  ;;  %2950 = vmatprep.mubr.f32.mxu1 %v7262_v35  ;;  %v7273_v35 = vld [vmem:[#allocation26_spill] sm:$0xff] }
 0x6a4   :  { %4632 = vmatpush1.bf16.msra.mxu0 %v7263_v23  ;;  %4664 = vmatpush1.bf16.msra.mxu1 %v7264_v16  ;;  %v7274_v23 = vld [vmem:[#allocation27_spill] sm:$0xff]  ;;  %v7275_v16 = vld [vmem:[#allocation28_spill] sm:$0xff] }
 0x6a5   :  { %4634 = vmatprep.subr.bf16.mxu0 %v7265_v25  ;;  %4666 = vmatprep.subr.bf16.mxu1 %v7266_v12  ;;  %v7276_v25 = vld [vmem:[#allocation29_spill] sm:$0xff]  ;;  %v7277_v12 = vld [vmem:[#allocation30_spill] sm:$0xff] }
 0x6a8   :  { %4636 = vmatpush1.bf16.msra.mxu0 %v7267_v6  ;;  %4668 = vmatpush1.bf16.msra.mxu1 %v7268_v13  ;;  %v7278_v6 = vld [vmem:[#allocation31_spill] sm:$0xff]  ;;  %v7279_v13 = vld [vmem:[#allocation32_spill] sm:$0xff] }
 0x6a9   :  { %4638 = vmatprep.subr.bf16.mxu0 %v7269_v0  ;;  %4670 = vmatprep.subr.bf16.mxu1 %v7270_v30  ;;  %v7280_v0 = vld [vmem:[#allocation33_spill] sm:$0xff]  ;;  %v7281_v30 = vld [vmem:[#allocation34_spill] sm:$0xff] }
 0x6ac   :  { %4640 = vmatpush1.bf16.msra.mxu0 %v7271_v37  ;;  %4672 = vmatpush1.bf16.msra.mxu1 %v7272_v28  ;;  %v7282_v37 = vld [vmem:[#allocation35_spill] sm:$0xff]  ;;  %v7283_v28 = vld [vmem:[#allocation36_spill] sm:$0xff] }
 0x6ad   :  { %4642 = vmatprep.subr.bf16.mxu0 %v7273_v35  ;;  %4674 = vmatprep.subr.bf16.mxu1 %v7274_v23  ;;  %v7284_v35 = vld [vmem:[#allocation37_spill] sm:$0xff]  ;;  %v7285_v23 = vld [vmem:[#allocation38_spill] sm:$0xff] }
 0x6b0   :  { %4644 = vmatpush1.bf16.msra.mxu0 %v7275_v16  ;;  %4676 = vmatpush1.bf16.msra.mxu1 %v7276_v25  ;;  %v7286_v16 = vld [vmem:[#allocation39_spill] sm:$0xff]  ;;  %v7287_v25 = vld [vmem:[#allocation40_spill] sm:$0xff] }
 0x6b1   :  { %4646 = vmatprep.subr.bf16.mxu0 %v7277_v12  ;;  %4678 = vmatprep.subr.bf16.mxu1 %v7278_v6  ;;  %v7288_v12 = vld [vmem:[#allocation41_spill] sm:$0xff]  ;;  %v7289_v6 = vld [vmem:[#allocation42_spill] sm:$0xff] }
 0x6b4   :  { %4648 = vmatpush1.bf16.msra.mxu0 %v7279_v13  ;;  %4680 = vmatpush1.bf16.msra.mxu1 %v7280_v0  ;;  %v7290_v13 = vld [vmem:[#allocation43_spill] sm:$0xff] }
 0x6b5   :  { %4650 = vmatprep.subr.bf16.mxu0 %v7281_v30  ;;  %4682 = vmatprep.subr.bf16.mxu1 %v7282_v37 }
 0x6b8   :  { %4652 = vmatpush1.bf16.msra.mxu0 %v7283_v28  ;;  %4684 = vmatpush1.bf16.msra.mxu1 %v7284_v35 }
 0x6b9   :  { %4654 = vmatprep.subr.bf16.mxu0 %v7285_v23  ;;  %4686 = vmatprep.subr.bf16.mxu1 %v7286_v16 }
 0x6bc   :  { %4656 = vmatpush1.bf16.msra.mxu0 %v7287_v25  ;;  %4688 = vmatpush1.bf16.msra.mxu1 %v7288_v12 }
 0x6bd   :  { %4690 = vmatprep.subr.bf16.mxu0 %v7289_v6  ;;  %4754 = vmatprep.subr.bf16.mxu1 %v7290_v13 }
 0x72d   :  { %v2540_v0 = vpop.f32.mrb[12].mxu0  ;;  %v2611_v30 = vpop.f32.mrb[12].mxu1 }
 0x72e   :  { %v4957_v37 = vadd.f32 %v2540_v0, %v7291_v44  ;;  %v2542_v56 = vpop.f32.mrb[13].mxu0  ;;  %v2613_v28 = vpop.f32.mrb[13].mxu1  ;;  %v4973_v12 = vadd.f32 %v2611_v30, %v7054_v1 }
 0x72f   :  { %v4958_v35 = vadd.f32 %v2542_v56, %v7114_v61  ;;  %v4974_v16 = vadd.f32 %v2613_v28, %v7053_v59 }
 0x730   :  { %v3392_v53 = vmul.f32 -1.442695, %v4957_v37 }
 0x731   :  { %v3393_v23 = vmul.f32 -1.442695, %v4958_v35  ;;  %v3394_v25 = vmul.f32 -1.442695, %v4974_v16 }
 0x732   :  { %5190 = vpow2.f32 %v3392_v53 }
 0x733   :  { %5192 = vpow2.f32 %v3393_v23 }
 0x734   :  { %5194 = vpow2.f32 %v3394_v25  ;;  %v7298_v25 = vld [vmem:[#allocation62_spill] sm:$0xff] }
 0x735   :  { %5196 = vtanh.f32 %v4973_v12  ;;  %v7299_v12 = vld [vmem:[#allocation63_spill] sm:$0xff] }
 0x73c   :  { %v5191_v6 = vpop.eup %5190 }
 0x73d   :  { %v5193_v47 = vpop.eup %5192  ;;  %v2623_v13 = vadd.f32 1.0, %v5191_v6 }
 0x73e   :  { %v2629_v40 = vadd.f32 1.0, %v5193_v47  ;;  %v5195_v0 = vpop.eup %5194  ;;  %v7294_v47 = vld [vmem:[#allocation58_spill] sm:$0xff] }
 0x73f   :  { %5198 = vrcp.f32 %v2623_v13  ;;  %v5197_v44 = vpop.eup %5196  ;;  %v2636_v53 = vadd.f32 1.0, %v5195_v0  ;;  %v7297_v13 = vld [vmem:[#allocation61_spill] sm:$0xff] }
 0x740   :  { %5200 = vrcp.f32 %v2629_v40  ;;  %v7293_v40 = vld [vmem:[#allocation57_spill] sm:$0xff] }
 0x741   :  { %5202 = vrcp.f32 %v2636_v53  ;;  %v7300_v0 = vld [vmem:[#allocation65_spill] sm:$0xff] }
 0x749   :  { %v5199_v56 = vpop.eup %5198 }
 0x74a   :  { %v5201_v37 = vpop.eup %5200  ;;  %v2640_v35 = vmul.f32 %v5199_v56, %v5197_v44  ;;  %v7295_v44 = vld [vmem:[#allocation59_spill] sm:$0xff]  ;;  %v7301_v56 = vld [vmem:[#allocation66_spill] sm:$0xff] }
 0x74b   :  { %v2639_v23 = vmul.f32 %v5201_v37, %v6368_v24  ;;  %v5203_v30 = vpop.eup %5202  ;;  %v7296_v24 = vld [vmem:[#allocation60_spill] sm:$0xff]  ;;  %v7302_v37 = vld [vmem:[#allocation67_spill] sm:$0xff] }
 0x74d   :  { %v6488_v28 = vadd.f32 %v2640_v35, %v2639_v23  ;;  %v7303_v23 = vld [vmem:[#allocation71_spill] sm:$0xff] }
 0x74f   :  { %7292 = vst [vmem:[#allocation95_spill] sm:$0xff] %v6488_v28  ;;  %5204 = vtanh.f32 %v6488_v28 }
 0x759   :  { %v5205_v6 = vpop.eup %5204 }
 0x75a   :  { %v6491_v16 = vmul.f32 %v5205_v6, %v5203_v30  ;;  %v7304_v30 = vld [vmem:[#allocation44_spill] sm:$0xff] }
 0x75c   :  { %2880 = vmatmul.mubr.f32.vlgmr.msra.gmra.mrb[14].mxu0 %v6491_v16  ;;  %2951 = vmatmul.mubr.f32.vlgmr.msra.gmra.mrb[14].mxu1 %v6491_v16 }
 0x75d   :  { %4692 = vmatpush1.bf16.msra.mxu0 %v7056_v18  ;;  %4756 = vmatpush1.bf16.msra.mxu1 %v7115_v50 }
 0x75e   :  { %4694 = vmatprep.subr.bf16.mxu0 %v7116_v54  ;;  %4758 = vmatprep.subr.bf16.mxu1 %v7174_v29 }
 0x761   :  { %4696 = vmatpush1.bf16.msra.mxu0 %v7175_v38  ;;  %4760 = vmatpush1.bf16.msra.mxu1 %v7233_v11 }
 0x762   :  { %4698 = vmatprep.subr.bf16.mxu0 %v7234_v20  ;;  %4762 = vmatprep.subr.bf16.mxu1 %v7235_v34 }
 0x765   :  { %4700 = vmatpush1.bf16.msra.mxu0 %v7293_v40  ;;  %4764 = vmatpush1.bf16.msra.mxu1 %v7294_v47 }
 0x766   :  { %4702 = vmatprep.subr.bf16.mxu0 %v7295_v44  ;;  %4766 = vmatprep.subr.bf16.mxu1 %v7296_v24 }
 0x769   :  { %4704 = vmatpush1.bf16.msra.mxu0 %v7297_v13  ;;  %4768 = vmatpush1.bf16.msra.mxu1 %v7298_v25 }
 0x76a   :  { %4706 = vmatprep.subr.bf16.mxu0 %v7299_v12  ;;  %4770 = vmatprep.subr.bf16.mxu1 %v7243_v57 }
 0x76d   :  { %4708 = vmatpush1.bf16.msra.mxu0 %v7300_v0  ;;  %4772 = vmatpush1.bf16.msra.mxu1 %v7301_v56 }
 0x76e   :  { %4710 = vmatprep.subr.bf16.mxu0 %v7302_v37  ;;  %4774 = vmatprep.subr.bf16.mxu1 %v7247_v58 }
 0x771   :  { %4712 = vmatpush1.bf16.msra.mxu0 %v7191_v46  ;;  %4776 = vmatpush1.bf16.msra.mxu1 %v7248_v43 }
 0x772   :  { %v2710_v35 = vpop.f32.mrb[26].mxu0  ;;  %v2781_v53 = vpop.f32.mrb[26].mxu1  ;;  %4714 = vmatprep.subr.bf16.mxu0 %v7303_v23  ;;  %4778 = vmatprep.subr.bf16.mxu1 %v7193_v10 }
 0x773   :  { %v2711_v6 = vadd.f32 %v2710_v35, %v7304_v30  ;;  %v2712_v28 = vpop.f32.mrb[27].mxu0  ;;  %v2783_v1 = vpop.f32.mrb[27].mxu1  ;;  %v7309_v30 = vld [vmem:[#allocation102_spill] sm:$0xff] }
 0x774   :  { %v2713_v59 = vadd.f32 %v2712_v28, %v7192_v33  ;;  %v2784_v35 = vadd.f32 %v2783_v1, %v7140_v45  ;;  %v7308_v33 = vld [vmem:[#allocation101_spill] sm:$0xff] }
 0x775   :  { %v3395_v61 = vmul.f32 -1.442695, %v2711_v6  ;;  %4716 = vmatpush1.bf16.msra.mxu0 %v7194_v55  ;;  %4780 = vmatpush1.bf16.msra.mxu1 %v7195_v4 }
 0x776   :  { %v3396_v46 = vmul.f32 -1.442695, %v2713_v59  ;;  %4718 = vmatprep.subr.bf16.mxu0 %v7196_v49  ;;  %4782 = vmatprep.subr.bf16.mxu1 %v7139_v2  ;;  %v3397_v59 = vmul.f32 -1.442695, %v2784_v35  ;;  %v7306_v35 = vld [vmem:[#allocation94_spill] sm:$0xff] }
 0x777   :  { %5206 = vpow2.f32 %v3395_v61  ;;  %v2782_v61 = vadd.f32 %v2781_v53, %v7086_v27  ;;  %v7305_v53 = vld [vmem:[#allocation91_spill] sm:$0xff] }
 0x778   :  { %5208 = vpow2.f32 %v3396_v46 }
 0x779   :  { %4720 = vmatpush1.bf16.msra.mxu0 %v7250_v26  ;;  %4784 = vmatpush1.bf16.msra.mxu1 %v7251_v31  ;;  %5210 = vpow2.f32 %v3397_v59  ;;  %v7307_v59 = vld [vmem:[#allocation96_spill] sm:$0xff] }
 0x77a   :  { %4722 = vmatprep.subr.bf16.mxu0 %v7142_v21  ;;  %4786 = vmatprep.subr.bf16.mxu1 %v7143_v62  ;;  %5212 = vtanh.f32 %v2782_v61 }
 0x77d   :  { %4724 = vmatpush1.bf16.msra.mxu0 %v7144_v48  ;;  %4788 = vmatpush1.bf16.msra.mxu1 %v7145_v5 }
 0x77e   :  { %4726 = vmatprep.subr.bf16.mxu0 %v7199_v39  ;;  %4790 = vmatprep.subr.bf16.mxu1 %v7090_v36 }
 0x781   :  { %v5207_v46 = vpop.eup %5206  ;;  %4728 = vmatpush1.bf16.msra.mxu0 %v7091_v22  ;;  %4792 = vmatpush1.bf16.msra.mxu1 %v7092_v15 }
 0x782   :  { %v5209_v1 = vpop.eup %5208  ;;  %v2789_v28 = vadd.f32 1.0, %v5207_v46  ;;  %4730 = vmatprep.subr.bf16.mxu0 %v7093_v41  ;;  %4794 = vmatprep.subr.bf16.mxu1 %v7147_v51 }
 0x783   :  { %v2795_v6 = vadd.f32 1.0, %v5209_v1  ;;  %v5211_v61 = vpop.eup %5210 }
 0x784   :  { %5214 = vrcp.f32 %v2789_v28  ;;  %v5213_v46 = vpop.eup %5212  ;;  %v2802_v27 = vadd.f32 1.0, %v5211_v61  ;;  %v7312_v61 = vld [vmem:[#allocation105_spill] sm:$0xff] }
 0x785   :  { %5216 = vrcp.f32 %v2795_v6  ;;  %4732 = vmatpush1.bf16.msra.mxu0 %v7252_v19  ;;  %4796 = vmatpush1.bf16.msra.mxu1 %v7201_v8 }
 0x786   :  { %4734 = vmatprep.subr.bf16.mxu0 %v7305_v53  ;;  %4798 = vmatprep.subr.bf16.mxu1 %v7253_v42  ;;  %5218 = vrcp.f32 %v2802_v27 }
 0x789   :  { %4736 = vmatpush1.bf16.msra.mxu0 %v7150_v7  ;;  %4800 = vmatpush1.bf16.msra.mxu1 %v7306_v35 }
 0x78a   :  { %4738 = vmatprep.subr.bf16.mxu0 %v7044_v60  ;;  %4802 = vmatprep.subr.bf16.mxu1 %v7307_v59 }
 0x78d   :  { %4740 = vmatpush1.bf16.msra.mxu0 %v7046_v52  ;;  %4804 = vmatpush1.bf16.msra.mxu1 %v7047_v14 }
 0x78e   :  { %v5215_v1 = vpop.eup %5214  ;;  %4742 = vmatprep.subr.bf16.mxu0 %v5789_v63  ;;  %4806 = vmatprep.subr.bf16.mxu1 %v5791_v9  ;;  %v7310_v63 = vld [vmem:[#allocation103_spill] sm:$0xff]  ;;  %v7311_v9 = vld [vmem:[#allocation104_spill] sm:$0xff] }
 0x78f   :  { %v5217_v28 = vpop.eup %5216  ;;  %v2806_v6 = vmul.f32 %v5215_v1, %v5213_v46  ;;  %v7314_v46 = vld [vmem:[#allocation107_spill] sm:$0xff]  ;;  %v7315_v1 = vld [vmem:[#allocation108_spill] sm:$0xff] }
 0x790   :  { %v2805_v45 = vmul.f32 %v5217_v28, %v6434_v3  ;;  %v7313_v3 = vld [vmem:[#allocation106_spill] sm:$0xff] }
 0x791   :  { %4744 = vmatpush1.bf16.msra.mxu0 %v5795_v17  ;;  %4808 = vmatpush1.bf16.msra.mxu1 %v5797_v32  ;;  %v7316_v28 = vld [vmem:[#allocation42_spill] sm:$0xff] }
 0x792   :  { %4746 = vmatprep.subr.bf16.mxu0 %v7308_v33  ;;  %4810 = vmatprep.subr.bf16.mxu1 %v7309_v30  ;;  %v6556_v52 = vadd.f32 %v2806_v6, %v2805_v45  ;;  %v7317_v30 = vld [vmem:[#allocation43_spill] sm:$0xff]  ;;  %v5219_v45 = vpop.eup %5218 }
 0x794   :  { %5220 = vtanh.f32 %v6556_v52 }
 0x795   :  { %4748 = vmatpush1.bf16.msra.mxu0 %v7310_v63  ;;  %4812 = vmatpush1.bf16.msra.mxu1 %v7311_v9 }
 0x796   :  { %4750 = vmatprep.subr.bf16.mxu0 %v7312_v61  ;;  %4814 = vmatprep.subr.bf16.mxu1 %v7313_v3 }
 0x799   :  { %4752 = vmatpush1.bf16.msra.mxu0 %v7314_v46  ;;  %4816 = vmatpush1.bf16.msra.mxu1 %v7315_v1 }
 0x79a   :  { %4818 = vmatprep.subr.bf16.mxu0 %v7316_v28  ;;  %4882 = vmatprep.subr.bf16.mxu1 %v7317_v30 }
 0x79e   :  { %v5221_v27 = vpop.eup %5220 }
 0x79f   :  { %v2809_v6 = vmul.f32 %v5221_v27, %v5219_v45 }
 0x7a1   :  { %3049 = vmatprep.mubr.f32.mxu0 %v2809_v6  ;;  %3120 = vmatprep.mubr.f32.mxu1 %v2809_v6 }
 0x7a2   :  { %3050 = vmatmul.mubr.f32.vlgmr.msra.gmra.mrb[28].mxu0 %v6491_v16  ;;  %3121 = vmatmul.mubr.f32.vlgmr.msra.gmra.mrb[28].mxu1 %v6491_v16 }
 0x7a3   :  { %4820 = vmatpush1.bf16.msra.mxu0 %v7056_v18  ;;  %4884 = vmatpush1.bf16.msra.mxu1 %v7115_v50  ;;  %v7318_v18 = vld [vmem:[#allocation69_spill] sm:$0xff] }
 0x7a4   :  { %4822 = vmatprep.subr.bf16.mxu0 %v7116_v54  ;;  %4886 = vmatprep.subr.bf16.mxu1 %v7174_v29  ;;  %v7324_v54 = vld [vmem:[#allocation46_spill] sm:$0xff] }
 0x7a7   :  { %4824 = vmatpush1.bf16.msra.mxu0 %v7175_v38  ;;  %4888 = vmatpush1.bf16.msra.mxu1 %v7233_v11  ;;  %v7327_v11 = vld [vmem:[#allocation95_spill] sm:$0xff] }
 0x7a8   :  { %4826 = vmatprep.subr.bf16.mxu0 %v7234_v20  ;;  %4890 = vmatprep.subr.bf16.mxu1 %v7235_v34 }
 0x7ab   :  { %4828 = vmatpush1.bf16.msra.mxu0 %v7293_v40  ;;  %4892 = vmatpush1.bf16.msra.mxu1 %v7294_v47 }
 0x7ac   :  { %4830 = vmatprep.subr.bf16.mxu0 %v7295_v44  ;;  %4894 = vmatprep.subr.bf16.mxu1 %v7296_v24  ;;  %v7329_v44 = vld [vmem:[#allocation110_spill] sm:$0xff] }
 0x7af   :  { %4832 = vmatpush1.bf16.msra.mxu0 %v7297_v13  ;;  %4896 = vmatpush1.bf16.msra.mxu1 %v7298_v25 }
 0x7b0   :  { %4834 = vmatprep.subr.bf16.mxu0 %v7299_v12  ;;  %4898 = vmatprep.subr.bf16.mxu1 %v7243_v57  ;;  %v7330_v12 = vld [vmem:[#allocation111_spill] sm:$0xff] }
 0x7b3   :  { %4836 = vmatpush1.bf16.msra.mxu0 %v7300_v0  ;;  %4900 = vmatpush1.bf16.msra.mxu1 %v7301_v56 }
 0x7b4   :  { %4838 = vmatprep.subr.bf16.mxu0 %v7302_v37  ;;  %4902 = vmatprep.subr.bf16.mxu1 %v7247_v58  ;;  %v7331_v37 = vld [vmem:[#allocation112_spill] sm:$0xff] }
 0x7b7   :  { %4840 = vmatpush1.bf16.msra.mxu0 %v7318_v18  ;;  %4904 = vmatpush1.bf16.msra.mxu1 %v7248_v43 }
 0x7b8   :  { %4842 = vmatprep.subr.bf16.mxu0 %v7303_v23  ;;  %4906 = vmatprep.subr.bf16.mxu1 %v7193_v10 }
 0x7bb   :  { %4844 = vmatpush1.bf16.msra.mxu0 %v7194_v55  ;;  %4908 = vmatpush1.bf16.msra.mxu1 %v7195_v4 }
 0x7bc   :  { %4846 = vmatprep.subr.bf16.mxu0 %v7196_v49  ;;  %4910 = vmatprep.subr.bf16.mxu1 %v7139_v2 }
 0x7bf   :  { %4848 = vmatpush1.bf16.msra.mxu0 %v7250_v26  ;;  %4912 = vmatpush1.bf16.msra.mxu1 %v7251_v31 }
 0x7c0   :  { %4850 = vmatprep.subr.bf16.mxu0 %v7142_v21  ;;  %4914 = vmatprep.subr.bf16.mxu1 %v7143_v62  ;;  %v7319_v62 = vld [vmem:[#allocation97_spill] sm:$0xff] }
 0x7c3   :  { %4852 = vmatpush1.bf16.msra.mxu0 %v7144_v48  ;;  %4916 = vmatpush1.bf16.msra.mxu1 %v7145_v5  ;;  %v7326_v48 = vld [vmem:[#allocation48_spill] sm:$0xff] }
 0x7c4   :  { %4854 = vmatprep.subr.bf16.mxu0 %v7199_v39  ;;  %4918 = vmatprep.subr.bf16.mxu1 %v7090_v36  ;;  %v7322_v36 = vld [vmem:[#allocation102_spill] sm:$0xff] }
 0x7c7   :  { %4856 = vmatpush1.bf16.msra.mxu0 %v7091_v22  ;;  %4920 = vmatpush1.bf16.msra.mxu1 %v7092_v15  ;;  %v7320_v15 = vld [vmem:[#allocation99_spill] sm:$0xff]  ;;  %v7321_v22 = vld [vmem:[#allocation100_spill] sm:$0xff] }
 0x7c8   :  { %4858 = vmatprep.subr.bf16.mxu0 %v7093_v41  ;;  %4922 = vmatprep.subr.bf16.mxu1 %v7147_v51 }
 0x7cb   :  { %4860 = vmatpush1.bf16.msra.mxu0 %v7252_v19  ;;  %4924 = vmatpush1.bf16.msra.mxu1 %v7201_v8 }
 0x7cc   :  { %4862 = vmatprep.subr.bf16.mxu0 %v7305_v53  ;;  %4926 = vmatprep.subr.bf16.mxu1 %v7253_v42  ;;  %v7328_v42 = vld [vmem:[#allocation44_spill] sm:$0xff] }
 0x7cf   :  { %4864 = vmatpush1.bf16.msra.mxu0 %v7150_v7  ;;  %4928 = vmatpush1.bf16.msra.mxu1 %v7306_v35 }
 0x7d0   :  { %4866 = vmatprep.subr.bf16.mxu0 %v7044_v60  ;;  %4930 = vmatprep.subr.bf16.mxu1 %v7307_v59 }
 0x7d3   :  { %4868 = vmatpush1.bf16.msra.mxu0 %v7319_v62  ;;  %4932 = vmatpush1.bf16.msra.mxu1 %v7047_v14  ;;  %v7323_v14 = vld [vmem:[#allocation45_spill] sm:$0xff] }
 0x7d4   :  { %4870 = vmatprep.subr.bf16.mxu0 %v7320_v15  ;;  %4934 = vmatprep.subr.bf16.mxu1 %v7321_v22 }
 0x7d7   :  { %4872 = vmatpush1.bf16.msra.mxu0 %v5795_v17  ;;  %4936 = vmatpush1.bf16.msra.mxu1 %v5797_v32 }
 0x7d8   :  { %4874 = vmatprep.subr.bf16.mxu0 %v7308_v33  ;;  %4938 = vmatprep.subr.bf16.mxu1 %v7322_v36 }
 0x7db   :  { %4876 = vmatpush1.bf16.msra.mxu0 %v7310_v63  ;;  %4940 = vmatpush1.bf16.msra.mxu1 %v7311_v9  ;;  %v7325_v9 = vld [vmem:[#allocation47_spill] sm:$0xff] }
 0x7dc   :  { %4878 = vmatprep.subr.bf16.mxu0 %v7312_v61  ;;  %4942 = vmatprep.subr.bf16.mxu1 %v7313_v3 }
 0x7df   :  { %4880 = vmatpush1.bf16.msra.mxu0 %v7314_v46  ;;  %4944 = vmatpush1.bf16.msra.mxu1 %v7315_v1 }
 0x82f   :  { %v2881_v60 = vpop.f32.mrb[14].mxu0  ;;  %v2952_v17 = vpop.f32.mrb[14].mxu1 }
 0x830   :  { %v4959_v32 = vadd.f32 %v2881_v60, %v7323_v14  ;;  %v2883_v41 = vpop.f32.mrb[15].mxu0  ;;  %v2954_v50 = vpop.f32.mrb[15].mxu1  ;;  %v4975_v51 = vadd.f32 %v2952_v17, %v7326_v48 }
 0x831   :  { %v4960_v5 = vadd.f32 %v2883_v41, %v7324_v54  ;;  %v4976_v2 = vadd.f32 %v2954_v50, %v7325_v9 }
 0x832   :  { %v3398_v31 = vmul.f32 -1.442695, %v4959_v32 }
 0x833   :  { %v3399_v63 = vmul.f32 -1.442695, %v4960_v5  ;;  %v3400_v21 = vmul.f32 -1.442695, %v4976_v2 }
 0x834   :  { %5222 = vpow2.f32 %v3398_v31 }
 0x835   :  { %5224 = vpow2.f32 %v3399_v63 }
 0x836   :  { %5226 = vpow2.f32 %v3400_v21 }
 0x837   :  { %5228 = vtanh.f32 %v4975_v51 }
 0x83e   :  { %v5223_v7 = vpop.eup %5222 }
 0x83f   :  { %v5225_v29 = vpop.eup %5224  ;;  %v2964_v38 = vadd.f32 1.0, %v5223_v7 }
 0x840   :  { %v2970_v55 = vadd.f32 1.0, %v5225_v29  ;;  %v5227_v4 = vpop.eup %5226 }
 0x841   :  { %5230 = vrcp.f32 %v2964_v38  ;;  %v5229_v33 = vpop.eup %5228  ;;  %v2977_v8 = vadd.f32 1.0, %v5227_v4 }
 0x842   :  { %5232 = vrcp.f32 %v2970_v55 }
 0x843   :  { %5234 = vrcp.f32 %v2977_v8 }
 0x84b   :  { %v5231_v10 = vpop.eup %5230 }
 0x84c   :  { %v5233_v49 = vpop.eup %5232  ;;  %v2981_v39 = vmul.f32 %v5231_v10, %v5229_v33 }
 0x84d   :  { %v2980_v20 = vmul.f32 %v5233_v49, %v7327_v11  ;;  %v5235_v43 = vpop.eup %5234  ;;  %v3407_v49 = vld [vmem:[%s6657_s6] ss:$0 sm:$0xff] }
 0x84e   :  { %v3408_v11 = vld [vmem:[#allocation3] ss:$0 sm:$0xff] }
 0x84f   :  { %v2982_v34 = vadd.f32 %v2981_v39, %v2980_v20 }
 0x851   :  { %5236 = vtanh.f32 %v2982_v34 }
 0x85b   :  { %v5237_v26 = vpop.eup %5236 }
 0x85c   :  { %v2984_v57 = vmul.f32 %v5237_v26, %v5235_v43 }
 0x875   :  { %v3051_v58 = vpop.f32.mrb[28].mxu0  ;;  %v3122_v19 = vpop.f32.mrb[28].mxu1 }
 0x876   :  { %v3052_v16 = vadd.f32 %v3051_v58, %v7328_v42  ;;  %v3053_v40 = vpop.f32.mrb[29].mxu0  ;;  %v3124_v47 = vpop.f32.mrb[29].mxu1  ;;  %v3123_v23 = vadd.f32 %v3122_v19, %v7331_v37 }
 0x877   :  { %v3054_v24 = vadd.f32 %v3053_v40, %v7329_v44  ;;  %v3125_v0 = vadd.f32 %v3124_v47, %v7330_v12 }
 0x878   :  { %v3401_v13 = vmul.f32 -1.442695, %v3052_v16 }
 0x879   :  { %v3402_v25 = vmul.f32 -1.442695, %v3054_v24  ;;  %v3403_v56 = vmul.f32 -1.442695, %v3125_v0 }
 0x87a   :  { %5238 = vpow2.f32 %v3401_v13 }
 0x87b   :  { %5240 = vpow2.f32 %v3402_v25 }
 0x87c   :  { %5242 = vpow2.f32 %v3403_v56 }
 0x87d   :  { %5244 = vtanh.f32 %v3123_v23 }
 0x884   :  { %v5239_v30 = vpop.eup %5238 }
 0x885   :  { %v5241_v53 = vpop.eup %5240  ;;  %v3130_v35 = vadd.f32 1.0, %v5239_v30 }
 0x886   :  { %v3136_v59 = vadd.f32 1.0, %v5241_v53  ;;  %v5243_v61 = vpop.eup %5242 }
 0x887   :  { %5246 = vrcp.f32 %v3130_v35  ;;  %v5245_v3 = vpop.eup %5244  ;;  %v3143_v45 = vadd.f32 1.0, %v5243_v61 }
 0x888   :  { %5248 = vrcp.f32 %v3136_v59 }
 0x889   :  { %5250 = vrcp.f32 %v3143_v45 }
 0x891   :  { %v5247_v46 = vpop.eup %5246 }
 0x892   :  { %v5249_v1 = vpop.eup %5248  ;;  %v3147_v28 = vmul.f32 %v5247_v46, %v5245_v3 }
 0x893   :  { %v3146_v27 = vmul.f32 %v5249_v1, %v6556_v52  ;;  %v5251_v18 = vpop.eup %5250 }
 0x895   :  { %v3148_v6 = vadd.f32 %v3147_v28, %v3146_v27 }
 0x897   :  { %5252 = vtanh.f32 %v3148_v6 }
 0x8a1   :  { %v5253_v62 = vpop.eup %5252 }
 0x8a2   :  { %v3150_v15 = vmul.f32 %v5253_v62, %v5251_v18 }
 0x8a4   :  { %3215 = vmatprep.mubr.f32.mxu0 %v3150_v15  ;;  %3286 = vmatprep.mubr.f32.mxu1 %v3150_v15 }
 0x8a5   :  { %3216 = vmatmul.mubr.f32.vlgmr.msra.gmra.mrb[30].mxu0 %v2984_v57  ;;  %3287 = vmatmul.mubr.f32.vlgmr.msra.gmra.mrb[30].mxu1 %v2984_v57 }
 0x978   :  { %v3217_v22 = vpop.f32.mrb[30].mxu0  ;;  %v3288_v36 = vpop.f32.mrb[30].mxu1 }
 0x979   :  { %v3218_v60 = vadd.f32 %v3217_v22, %v7328_v42  ;;  %v3219_v17 = vpop.f32.mrb[31].mxu0  ;;  %v3290_v14 = vpop.f32.mrb[31].mxu1  ;;  %v3289_v5 = vadd.f32 %v3288_v36, %v7331_v37 }
 0x97a   :  { %v3220_v32 = vadd.f32 %v3219_v17, %v7329_v44  ;;  %v3291_v50 = vadd.f32 %v3290_v14, %v7330_v12 }
 0x97b   :  { %v3404_v41 = vmul.f32 -1.442695, %v3218_v60 }
 0x97c   :  { %v3405_v52 = vmul.f32 -1.442695, %v3220_v32  ;;  %v3406_v54 = vmul.f32 -1.442695, %v3291_v50 }
 0x97d   :  { %5254 = vpow2.f32 %v3404_v41 }
 0x97e   :  { %5256 = vpow2.f32 %v3405_v52 }
 0x97f   :  { %5258 = vpow2.f32 %v3406_v54 }
 0x980   :  { %5260 = vtanh.f32 %v3289_v5 }
 0x987   :  { %v5255_v31 = vpop.eup %5254 }
 0x988   :  { %v5257_v63 = vpop.eup %5256  ;;  %v3296_v9 = vadd.f32 1.0, %v5255_v31 }
 0x989   :  { %v3302_v2 = vadd.f32 1.0, %v5257_v63  ;;  %v5259_v21 = vpop.eup %5258 }
 0x98a   :  { %5262 = vrcp.f32 %v3296_v9  ;;  %v5261_v48 = vpop.eup %5260  ;;  %v3309_v38 = vadd.f32 1.0, %v5259_v21 }
 0x98b   :  { %5264 = vrcp.f32 %v3302_v2 }
 0x98c   :  { %5266 = vrcp.f32 %v3309_v38 }
 0x994   :  { %v5263_v51 = vpop.eup %5262 }
 0x995   :  { %v5265_v7 = vpop.eup %5264  ;;  %v3313_v29 = vmul.f32 %v5263_v51, %v5261_v48 }
 0x996   :  { %v3312_v55 = vmul.f32 %v5265_v7, %v3148_v6  ;;  %v5267_v33 = vpop.eup %5266 }
 0x998   :  { %v3314_v4 = vadd.f32 %v3313_v29, %v3312_v55 }
 0x99a   :  { %5268 = vtanh.f32 %v3314_v4 }
 0x9a4   :  { %v5269_v10 = vpop.eup %5268 }
 0x9a5   :  { %v3316_v39 = vmul.f32 %v5269_v10, %v5267_v33 }
 0x9a7   :  { %v3324_v8 = vmul.f32 %v3407_v49, %v3316_v39 }
 0x9a9   :  { %3325 = vadd.xlane.f32.xlu0 %v3324_v8 }
 0xa36   :  { %v3326_v20 = vpop.xlane.xlu0 %3325 }
 0xa37   :  { %v3334_v34 = vadd.f32 %v3408_v11, %v3326_v20 }
 0xa39   :  { %3336 = vst.msk [vmem:[%s6659_s8] sm:$0xff] %vm3335_vm1, %v3334_v34 }
 0xa3a   :  { %3341 = vsyncpa [#allocation5], 1 }
 0xa3b   :  { %3342 = vsyncpa [#allocation7], 1 }

</bundles_post_ra>
